<compile_context>
chip_gen: v5e
topology: v5e:2x2
jax: 0.10.0
libtpu: 0.0.40
codegen_flags: <defaults>
</compile_context>

<pallas_src>
import math
from functools import partial

import jax
import jax.numpy as jnp
from jax.experimental import pallas as pl
from jax.experimental.pallas import tpu as pltpu

BN_EPS = 1e-5
ACT_DTYPE = jnp.bfloat16


# ----------------------------- helpers ------------------------------------
def _round_up(v, m):
    return ((v + m - 1) // m) * m


def _pad_to(x, axis, size, value=0.0):
    cur = x.shape[axis]
    if cur == size:
        return x
    widths = [(0, 0)] * x.ndim
    widths[axis] = (0, size - cur)
    return jnp.pad(x, widths, constant_values=value)


# -------------------- generation-aware VMEM budget --------------------------
def _chip_vmem_bytes():
    try:
        info = pltpu.get_tpu_info()
        cap = int(getattr(info, "vmem_capacity_bytes", 0))
        if cap > 0:
            return cap
    except Exception:
        pass
    return 64 * 1024 * 1024          # conservative (v7x-sized) fallback


_VMEM_LIMIT = int(min(_chip_vmem_bytes() * 0.75, 100 * 1024 * 1024))
_TILE_BUDGET = int(_VMEM_LIMIT * 0.85)


def _largest_tile(total, cap, mult):
    """Largest t <= cap with t % mult == 0 and total % t == 0 (total % mult == 0)."""
    cap = max(mult, (min(cap, total) // mult) * mult)
    t = cap
    while t > mult:
        if total % t == 0:
            return t
        t -= mult
    return mult


def _gemm_tile_bytes(tm, tn, tk, nk, has_res, out_bytes):
    b = 2 * 2 * (tm * tk + tk * tn)        # bf16 x & w tiles, double-buffered
    b += 2 * out_bytes * tm * tn           # output tile, double-buffered
    b += 2 * 4 * tn                        # f32 bias row
    if has_res:
        b += 2 * 2 * tm * tn               # bf16 residual tile
    if nk > 1:
        b += 4 * tm * tn                   # f32 accumulator scratch
    return b


# --------------------------- Pallas kernels --------------------------------
def _gemm_1k_kernel(x_ref, w_ref, b_ref, *rest, relu, has_res):
    """Single-K-step conv-as-GEMM: no scratch accumulator, direct epilogue."""
    if has_res:
        r_ref, o_ref = rest
    else:
        (o_ref,) = rest
    acc = jnp.dot(x_ref[...], w_ref[...], preferred_element_type=jnp.float32)
    acc = acc + b_ref[...]
    if has_res:
        acc = acc + r_ref[...].astype(jnp.float32)
    if relu:
        acc = jnp.maximum(acc, 0.0)
    o_ref[...] = acc.astype(o_ref.dtype)


def _gemm_nk_kernel(x_ref, w_ref, b_ref, *rest, relu, has_res):
    """K-tiled conv-as-GEMM with f32 accumulator + fused bias/res/ReLU epilogue."""
    if has_res:
        r_ref, o_ref, acc_ref = rest
    else:
        o_ref, acc_ref = rest
    k = pl.program_id(2)

    @pl.when(k == 0)
    def _():
        acc_ref[...] = jnp.zeros_like(acc_ref)

    acc_ref[...] += jnp.dot(x_ref[...], w_ref[...],
                            preferred_element_type=jnp.float32)

    @pl.when(k == pl.num_programs(2) - 1)
    def _():
        acc = acc_ref[...] + b_ref[...]
        if has_res:
            acc = acc + r_ref[...].astype(jnp.float32)
        if relu:
            acc = jnp.maximum(acc, 0.0)
        o_ref[...] = acc.astype(o_ref.dtype)


def _maxpool_phase_kernel(ee_ref, eo_ref, oe_ref, oo_ref, o_ref):
    """3x3/stride-2 max-pool from 4 even/odd spatial phase slabs (per image)."""
    _, hp1, wp1, _ = ee_ref.shape            # (1, ho+1, wo+1, c)
    ho, wo = hp1 - 1, wp1 - 1
    ee = ee_ref[...].astype(jnp.float32)
    eo = eo_ref[...].astype(jnp.float32)
    oe = oe_ref[...].astype(jnp.float32)
    oo = oo_ref[...].astype(jnp.float32)
    m = ee[:, :ho, :wo, :]
    m = jnp.maximum(m, ee[:, :ho, 1:, :])
    m = jnp.maximum(m, ee[:, 1:, :wo, :])
    m = jnp.maximum(m, ee[:, 1:, 1:, :])
    m = jnp.maximum(m, eo[:, :ho, :wo, :])
    m = jnp.maximum(m, eo[:, 1:, :wo, :])
    m = jnp.maximum(m, oe[:, :ho, :wo, :])
    m = jnp.maximum(m, oe[:, :ho, 1:, :])
    m = jnp.maximum(m, oo[:, :ho, :wo, :])
    o_ref[...] = m.astype(o_ref.dtype)


def _head_kernel(x_ref, w_ref, b_ref, o_ref):
    """Global average pool + fully-connected layer (bf16 MXU, f32 epilogue)."""
    pooled = jnp.mean(x_ref[...].astype(jnp.float32), axis=1)       # (Nb, C)
    o_ref[...] = (jnp.dot(pooled.astype(jnp.bfloat16), w_ref[...],
                          preferred_element_type=jnp.float32) + b_ref[...])


# ---------------------------- kernel wrappers -------------------------------
def gemm_bn(x, wmat, bias, residual=None, relu=True, out_dtype=ACT_DTYPE):
    """(x @ wmat) + bias [+ residual] [relu] — bf16 MXU, f32 accumulate.

    wmat is pre-padded (Kp, Np) bf16 with the BN scale already folded in;
    bias is (1, N) f32 (unpadded along N).
    """
    M, K = x.shape
    Kp, Np = wmat.shape
    N = bias.shape[1]
    assert Kp == _round_up(K, 128) and Np == _round_up(N, 128)
    out_bytes = jnp.dtype(out_dtype).itemsize
    has_res = residual is not None

    Mp = _round_up(M, 16)

    # Tile selection: lane-dense, as large as the per-chip VMEM budget allows.
    tn = _largest_tile(Np, 512, 128)
    tk = Kp                                   # full-K first: fewest acc passes
    while tk > 128 and _gemm_tile_bytes(128, tn, tk, Kp // tk,
                                        has_res, out_bytes) > _TILE_BUDGET:
        tk = _largest_tile(Kp, tk - 128, 128)
    nk = Kp // tk

    tm = 16
    t = (min(1024, Mp) // 16) * 16
    while t >= 16:
        if Mp % t == 0 and _gemm_tile_bytes(t, tn, tk, nk, has_res,
                                            out_bytes) <= _TILE_BUDGET:
            tm = t
            break
        t -= 16
    # Keep >=2 parallel grid tiles so dual-TensorCore chips (v7x) stay busy.
    if Np == tn and Mp == tm and Mp >= 64:
        tm = _largest_tile(Mp, Mp // 2, 16)

    xp = _pad_to(_pad_to(x.astype(jnp.bfloat16), 0, Mp), 1, Kp)
    bp = _pad_to(bias.astype(jnp.float32), 1, Np)
    args = [xp, wmat, bp]

    if nk == 1:
        grid = (Mp // tm, Np // tn)
        in_specs = [
            pl.BlockSpec((tm, tk), lambda i, j: (i, 0)),
            pl.BlockSpec((tk, tn), lambda i, j: (0, j)),
            pl.BlockSpec((1, tn), lambda i, j: (0, j)),
        ]
        res_spec = pl.BlockSpec((tm, tn), lambda i, j: (i, j))
        out_spec = pl.BlockSpec((tm, tn), lambda i, j: (i, j))
        scratch = []
        sem = ("parallel", "parallel")
        kern = partial(_gemm_1k_kernel, relu=relu, has_res=has_res)
    else:
        grid = (Mp // tm, Np // tn, nk)
        in_specs = [
            pl.BlockSpec((tm, tk), lambda i, j, k: (i, k)),
            pl.BlockSpec((tk, tn), lambda i, j, k: (k, j)),
            pl.BlockSpec((1, tn), lambda i, j, k: (0, j)),
        ]
        res_spec = pl.BlockSpec((tm, tn), lambda i, j, k: (i, j))
        out_spec = pl.BlockSpec((tm, tn), lambda i, j, k: (i, j))
        scratch = [pltpu.VMEM((tm, tn), jnp.float32)]
        sem = ("parallel", "parallel", "arbitrary")
        kern = partial(_gemm_nk_kernel, relu=relu, has_res=has_res)

    if has_res:
        rp = _pad_to(_pad_to(residual.astype(jnp.bfloat16), 0, Mp), 1, Np)
        args.append(rp)
        in_specs.append(res_spec)

    out = pl.pallas_call(
        kern,
        out_shape=jax.ShapeDtypeStruct((Mp, Np), out_dtype),
        grid_spec=pltpu.PrefetchScalarGridSpec(
            num_scalar_prefetch=0,
            grid=grid,
            in_specs=in_specs,
            out_specs=out_spec,
            scratch_shapes=scratch),
        compiler_params=pltpu.CompilerParams(
            dimension_semantics=sem,
            vmem_limit_bytes=_VMEM_LIMIT),
    )(*args)
    if Mp != M or Np != N:
        out = out[:M, :N]
    return out


def _im2col(x, kh, kw, stride, pad):
    # TODO(synk): still materializes kh*kw-expanded patches in HBM for 3x3/7x7;
    # a halo-blocked direct-conv kernel would remove this expansion.
    n, h, w, c = x.shape
    xp = jnp.pad(x, ((0, 0), (pad, pad), (pad, pad), (0, 0)))
    hp, wp = h + 2 * pad, w + 2 * pad
    ho = (hp - kh) // stride + 1
    wo = (wp - kw) // stride + 1
    cols = []
    for i in range(kh):
        for j in range(kw):
            s = jax.lax.slice(
                xp, (0, i, j, 0),
                (n, i + stride * (ho - 1) + 1, j + stride * (wo - 1) + 1, c),
                (1, stride, stride, 1))
            cols.append(s)
    patches = jnp.concatenate(cols, axis=-1)          # (n, ho, wo, kh*kw*c)
    return patches.reshape(n * ho * wo, kh * kw * c), (n, ho, wo)


def conv_bn(x, layer, ksize, stride, pad, relu=True, residual=None):
    """Conv2d (folded BN, pre-laid-out weights) [+ residual] [+ ReLU]."""
    n, h, w, c = x.shape
    if ksize == 1 and pad == 0:
        xs = x if stride == 1 else x[:, ::stride, ::stride, :]
        n, ho, wo, _ = xs.shape
        cols = xs.reshape(n * ho * wo, c)             # no im2col for 1x1
    else:
        cols, (n, ho, wo) = _im2col(x, ksize, ksize, stride, pad)
    o = layer['bias'].shape[1]
    res2d = (residual.reshape(n * ho * wo, o)
             if residual is not None else None)
    out = gemm_bn(cols, layer['wmat'], layer['bias'],
                  residual=res2d, relu=relu, out_dtype=x.dtype)
    return out.reshape(n, ho, wo, o)


def maxpool_3x3_s2_p1(x):
    """3x3/stride-2/pad-1 max-pool via even/odd phase decomposition."""
    n, h, w, c = x.shape
    assert h % 2 == 0 and w % 2 == 0, "maxpool phase trick needs even H, W"
    neg = float(jnp.finfo(x.dtype).min)
    xp = jnp.pad(x, ((0, 0), (1, 1), (1, 1), (0, 0)), constant_values=neg)
    ho, wo = h // 2, w // 2
    # Four phase slabs (total bytes == one copy of the padded input).
    ee = xp[:, 0::2, 0::2, :]
    eo = xp[:, 0::2, 1::2, :]
    oe = xp[:, 1::2, 0::2, :]
    oo = xp[:, 1::2, 1::2, :]

    in_spec = pl.BlockSpec((1, ho + 1, wo + 1, c), lambda b: (b, 0, 0, 0))
    out = pl.pallas_call(
        _maxpool_phase_kernel,
        out_shape=jax.ShapeDtypeStruct((n, ho, wo, c), x.dtype),
        grid_spec=pltpu.PrefetchScalarGridSpec(
            num_scalar_prefetch=0,
            grid=(n,),
            in_specs=[in_spec] * 4,
            out_specs=pl.BlockSpec((1, ho, wo, c), lambda b: (b, 0, 0, 0))),
        compiler_params=pltpu.CompilerParams(
            dimension_semantics=("parallel",),
            vmem_limit_bytes=_VMEM_LIMIT),
    )(ee, eo, oe, oo)
    return out


def avgpool_fc(x, fc_wt, fc_b):
    """Global average pool + FC head (bf16 weights, f32 output)."""
    n, h, w, c = x.shape
    cp, ncp = fc_wt.shape
    classes = fc_b.shape[0]
    nb = max(8, _round_up(n, 8))                      # >=8 sublanes for MXU
    xf = x.reshape(n, h * w, c)
    xf = _pad_to(_pad_to(xf, 2, cp), 0, nb)
    bp = _pad_to(fc_b.reshape(1, -1).astype(jnp.float32), 1, ncp)
    out = pl.pallas_call(
        _head_kernel,
        out_shape=jax.ShapeDtypeStruct((nb, ncp), jnp.float32),
        in_specs=[pl.BlockSpec(memory_space=pltpu.MemorySpace.VMEM)] * 3,
        out_specs=pl.BlockSpec(memory_space=pltpu.MemorySpace.VMEM),
    )(xf, fc_wt, bp)
    return out[:n, :classes]


# ------------------------------ parameters ----------------------------------
def _kaiming_conv(key, out_c, in_c, kh, kw):
    fan_out = out_c * kh * kw
    std = math.sqrt(2.0 / fan_out)
    return std * jax.random.normal(key, (out_c, in_c, kh, kw), jnp.float32)


def _bn_params(c):
    return dict(gamma=jnp.ones((c,), jnp.float32),
                beta=jnp.zeros((c,), jnp.float32),
                mean=jnp.zeros((c,), jnp.float32),
                var=jnp.ones((c,), jnp.float32))


def init_params(key, num_classes=10, num_channels=64):
    keys = iter(jax.random.split(key, 128))
    p = {}
    c1 = num_channels
    p['conv1'] = _kaiming_conv(next(keys), c1, 3, 7, 7)
    p['bn1'] = _bn_params(c1)
    block_units = [3, 4, 6, 3]
    blocks = []
    in_c = c1
    for b, n_units in enumerate(block_units):
        planes = num_channels * (2 ** b)
        out_c = planes * 4
        blk = {
            'downsample': dict(w=_kaiming_conv(next(keys), out_c, in_c, 1, 1),
                               bn=_bn_params(out_c)),
            'units': [],
        }
        unit_in = in_c
        for _ in range(n_units):
            unit = dict(
                w1=_kaiming_conv(next(keys), planes, unit_in, 1, 1),
                bn1=_bn_params(planes),
                w2=_kaiming_conv(next(keys), planes, planes, 3, 3),
                bn2=_bn_params(planes),
                w3=_kaiming_conv(next(keys), out_c, planes, 1, 1),
                bn3=_bn_params(out_c),
            )
            blk['units'].append(unit)
            unit_in = out_c
        blocks.append(blk)
        in_c = out_c
    # weight-reuse quirk from the reference forward (conv3_3 reused in unit 4)
    blocks[1]['units'][3]['w3'] = blocks[1]['units'][2]['w3']
    blocks[2]['units'][3]['w3'] = blocks[2]['units'][2]['w3']
    p['blocks'] = blocks
    fan_in = num_channels * 8 * 4
    bound = 1.0 / math.sqrt(fan_in)
    kw_, kb_ = jax.random.split(next(keys))
    p['fc_w'] = jax.random.uniform(kw_, (num_classes, fan_in), jnp.float32,
                                   -bound, bound)
    p['fc_b'] = jax.random.uniform(kb_, (num_classes,), jnp.float32,
                                   -bound, bound)
    return p


def _fold_conv_bn(w_oihw, bn):
    """OIHW weight -> pre-padded (Kp, Np) bf16 with BN scale folded; bias f32."""
    o, c, kh, kw = w_oihw.shape
    scale = bn['gamma'] * jax.lax.rsqrt(bn['var'] + BN_EPS)
    bias = bn['beta'] - bn['mean'] * scale
    wmat = jnp.transpose(w_oihw, (2, 3, 1, 0)).reshape(kh * kw * c, o)
    wmat = wmat * scale[None, :]                       # fold BN scale into W
    kp = _round_up(kh * kw * c, 128)
    np_ = _round_up(o, 128)
    wmat = _pad_to(_pad_to(wmat, 0, kp), 1, np_).astype(jnp.bfloat16)
    return dict(wmat=wmat, bias=bias.reshape(1, -1).astype(jnp.float32))


def prepare_params(params):
    """One-time (outside jit) BN fold + weight re-layout + padding."""
    p = dict(conv1=_fold_conv_bn(params['conv1'], params['bn1']), blocks=[])
    for blk in params['blocks']:
        nb = dict(downsample=_fold_conv_bn(blk['downsample']['w'],
                                           blk['downsample']['bn']),
                  units=[])
        for u in blk['units']:
            nb['units'].append(dict(
                c1=_fold_conv_bn(u['w1'], u['bn1']),
                c2=_fold_conv_bn(u['w2'], u['bn2']),
                c3=_fold_conv_bn(u['w3'], u['bn3'])))
        p['blocks'].append(nb)
    cin_fc = params['fc_w'].shape[1]
    nclass = params['fc_w'].shape[0]
    fcw = _pad_to(_pad_to(params['fc_w'].T.astype(jnp.float32), 0,
                          _round_up(cin_fc, 128)), 1, _round_up(nclass, 128))
    p['fc_wt'] = fcw.astype(jnp.bfloat16)
    p['fc_b'] = params['fc_b'].astype(jnp.float32)
    return p


# ------------------------------ forward -------------------------------------
def resnet50_forward(params, x_nchw):
    x = jnp.transpose(x_nchw, (0, 2, 3, 1)).astype(ACT_DTYPE)  # NCHW -> NHWC
    out = conv_bn(x, params['conv1'], ksize=7, stride=2, pad=3, relu=True)
    out = maxpool_3x3_s2_p1(out)
    for b, blk in enumerate(params['blocks']):
        stride = 1 if b == 0 else 2
        identity = conv_bn(out, blk['downsample'], ksize=1, stride=stride,
                           pad=0, relu=False)
        for i, u in enumerate(blk['units']):
            s = stride if i == 0 else 1
            res = identity if i == 0 else out
            h = conv_bn(out, u['c1'], ksize=1, stride=1, pad=0, relu=True)
            h = conv_bn(h, u['c2'], ksize=3, stride=s, pad=1, relu=True)
            out = conv_bn(h, u['c3'], ksize=1, stride=1, pad=0, relu=True,
                          residual=res)
    return avgpool_fc(out, params['fc_wt'], params['fc_b'])


if __name__ == "__main__":
    key = jax.random.PRNGKey(0)
    pkey, xkey = jax.random.split(key)
    num_channels = 8        # small width (module default is 64)
    num_classes = 10
    raw_params = init_params(pkey, num_classes=num_classes,
                             num_channels=num_channels)
    params = prepare_params(raw_params)          # hoisted out of the jit
    x = jax.random.normal(xkey, (2, 3, 32, 32), jnp.float32)   # NCHW input
    fwd = jax.jit(resnet50_forward)
    out = fwd(params, x)
    jax.block_until_ready(out)
    assert out.shape == (2, num_classes)
    assert bool(jnp.all(jnp.isfinite(out)))
    print("KERNEL_OK")
</pallas_src>

<mosaic_0001>
module attributes {stable_mosaic.version = 11 : i64} {
  func.func @_gemm_1k_kernel(%arg0: i32, %arg1: i32, %arg2: memref<256x256xbf16, #tpu.memory_space<vmem>>, %arg3: memref<256x128xbf16, #tpu.memory_space<vmem>>, %arg4: memref<1x128xf32, #tpu.memory_space<vmem>>, %arg5: memref<256x128xbf16, #tpu.memory_space<vmem>>) attributes {dimension_semantics = [#tpu.dimension_semantics<parallel>, #tpu.dimension_semantics<parallel>], iteration_bounds = array<i64: 2, 1>, scalar_prefetch = 0 : i64, scratch_operands = 0 : i64, tpu.core_type = #tpu.core_type<tc>, window_params = [{transform_indices = @transform_0, window_bounds = array<i64: 256, 256>}, {transform_indices = @transform_1, window_bounds = array<i64: 256, 128>}, {transform_indices = @transform_2, window_bounds = array<i64: 1, 128>}, {transform_indices = @transform_3, window_bounds = array<i64: 256, 128>}]} {
    %c0 = arith.constant 0 : index
    %c0_0 = arith.constant 0 : index
    %0 = vector.load %arg2[%c0, %c0_0] : memref<256x256xbf16, #tpu.memory_space<vmem>>, vector<256x256xbf16>
    %c0_1 = arith.constant 0 : index
    %c0_2 = arith.constant 0 : index
    %1 = vector.load %arg3[%c0_1, %c0_2] : memref<256x128xbf16, #tpu.memory_space<vmem>>, vector<256x128xbf16>
    %cst = arith.constant dense<0.000000e+00> : vector<256x128xf32>
    %2 = tpu.matmul %0, %1, %cst {dimension_numbers = #tpu.dot_dimension_numbers<[1], [0], [0], [1], [0, 0, 1, 1], [], []>} : vector<256x256xbf16>, vector<256x128xbf16>, vector<256x128xf32> -> vector<256x128xf32>
    %c0_3 = arith.constant 0 : index
    %c0_4 = arith.constant 0 : index
    %3 = vector.load %arg4[%c0_3, %c0_4] : memref<1x128xf32, #tpu.memory_space<vmem>>, vector<1x128xf32>
    %4 = vector.broadcast %3 : vector<1x128xf32> to vector<256x128xf32>
    %5 = arith.addf %2, %4 : vector<256x128xf32>
    %cst_5 = arith.constant 0.000000e+00 : f32
    %6 = vector.broadcast %cst_5 : f32 to vector<256x128xf32>
    %7 = arith.maximumf %5, %6 : vector<256x128xf32>
    %8 = arith.truncf %7 : vector<256x128xf32> to vector<256x128xbf16>
    %c0_6 = arith.constant 0 : index
    %c0_7 = arith.constant 0 : index
    %9 = vector.load %arg5[%c0_6, %c0_7] : memref<256x128xbf16, #tpu.memory_space<vmem>>, vector<256x128xbf16>
    tpu.vector_store %arg5[%c0_6, %c0_7], %8 {strides = array<i32>} : memref<256x128xbf16, #tpu.memory_space<vmem>>, vector<256x128xbf16>,
    return
  }
  func.func @transform_0(%arg0: i32, %arg1: i32) -> (i32, i32) {
    %c0_i32 = arith.constant 0 : i32
    %c0_i32_0 = arith.constant 0 : i32
    return %arg0, %c0_i32 : i32, i32
  }
  func.func @transform_1(%arg0: i32, %arg1: i32) -> (i32, i32) {
    %c0_i32 = arith.constant 0 : i32
    %c0_i32_0 = arith.constant 0 : i32
    return %c0_i32, %arg1 : i32, i32
  }
  func.func @transform_2(%arg0: i32, %arg1: i32) -> (i32, i32) {
    %c0_i32 = arith.constant 0 : i32
    %c0_i32_0 = arith.constant 0 : i32
    return %c0_i32, %arg1 : i32, i32
  }
  func.func @transform_3(%arg0: i32, %arg1: i32) -> (i32, i32) {
    %c0_i32 = arith.constant 0 : i32
    return %arg0, %arg1 : i32, i32
  }
}

module attributes {stable_mosaic.version = 11 : i64} {
  func.func @_gemm_1k_kernel(%arg0: i32, %arg1: i32, %arg2: memref<64x128xbf16, #tpu.memory_space<vmem>>, %arg3: memref<128x128xbf16, #tpu.memory_space<vmem>>, %arg4: memref<1x128xf32, #tpu.memory_space<vmem>>, %arg5: memref<64x128xbf16, #tpu.memory_space<vmem>>) attributes {dimension_semantics = [#tpu.dimension_semantics<parallel>, #tpu.dimension_semantics<parallel>], iteration_bounds = array<i64: 2, 1>, scalar_prefetch = 0 : i64, scratch_operands = 0 : i64, tpu.core_type = #tpu.core_type<tc>, window_params = [{transform_indices = @transform_0, window_bounds = array<i64: 64, 128>}, {transform_indices = @transform_1, window_bounds = array<i64: 128, 128>}, {transform_indices = @transform_2, window_bounds = array<i64: 1, 128>}, {transform_indices = @transform_3, window_bounds = array<i64: 64, 128>}]} {
    %c0 = arith.constant 0 : index
    %c0_0 = arith.constant 0 : index
    %0 = vector.load %arg2[%c0, %c0_0] : memref<64x128xbf16, #tpu.memory_space<vmem>>, vector<64x128xbf16>
    %c0_1 = arith.constant 0 : index
    %c0_2 = arith.constant 0 : index
    %1 = vector.load %arg3[%c0_1, %c0_2] : memref<128x128xbf16, #tpu.memory_space<vmem>>, vector<128x128xbf16>
    %cst = arith.constant dense<0.000000e+00> : vector<64x128xf32>
    %2 = tpu.matmul %0, %1, %cst {dimension_numbers = #tpu.dot_dimension_numbers<[1], [0], [0], [1], [0, 0, 1, 1], [], []>} : vector<64x128xbf16>, vector<128x128xbf16>, vector<64x128xf32> -> vector<64x128xf32>
    %c0_3 = arith.constant 0 : index
    %c0_4 = arith.constant 0 : index
    %3 = vector.load %arg4[%c0_3, %c0_4] : memref<1x128xf32, #tpu.memory_space<vmem>>, vector<1x128xf32>
    %4 = vector.broadcast %3 : vector<1x128xf32> to vector<64x128xf32>
    %5 = arith.addf %2, %4 : vector<64x128xf32>
    %cst_5 = arith.constant 0.000000e+00 : f32
    %6 = vector.broadcast %cst_5 : f32 to vector<64x128xf32>
    %7 = arith.maximumf %5, %6 : vector<64x128xf32>
    %8 = arith.truncf %7 : vector<64x128xf32> to vector<64x128xbf16>
    %c0_6 = arith.constant 0 : index
    %c0_7 = arith.constant 0 : index
    %9 = vector.load %arg5[%c0_6, %c0_7] : memref<64x128xbf16, #tpu.memory_space<vmem>>, vector<64x128xbf16>
    tpu.vector_store %arg5[%c0_6, %c0_7], %8 {strides = array<i32>} : memref<64x128xbf16, #tpu.memory_space<vmem>>, vector<64x128xbf16>,
    return
  }
  func.func @transform_0(%arg0: i32, %arg1: i32) -> (i32, i32) {
    %c0_i32 = arith.constant 0 : i32
    %c0_i32_0 = arith.constant 0 : i32
    return %arg0, %c0_i32 : i32, i32
  }
  func.func @transform_1(%arg0: i32, %arg1: i32) -> (i32, i32) {
    %c0_i32 = arith.constant 0 : i32
    %c0_i32_0 = arith.constant 0 : i32
    return %c0_i32, %arg1 : i32, i32
  }
  func.func @transform_2(%arg0: i32, %arg1: i32) -> (i32, i32) {
    %c0_i32 = arith.constant 0 : i32
    %c0_i32_0 = arith.constant 0 : i32
    return %c0_i32, %arg1 : i32, i32
  }
  func.func @transform_3(%arg0: i32, %arg1: i32) -> (i32, i32) {
    %c0_i32 = arith.constant 0 : i32
    return %arg0, %arg1 : i32, i32
  }
}

module attributes {stable_mosaic.version = 11 : i64} {
  func.func @_maxpool_phase_kernel(%arg0: i32, %arg1: memref<1x9x9x8xbf16, #tpu.memory_space<vmem>>, %arg2: memref<1x9x9x8xbf16, #tpu.memory_space<vmem>>, %arg3: memref<1x9x9x8xbf16, #tpu.memory_space<vmem>>, %arg4: memref<1x9x9x8xbf16, #tpu.memory_space<vmem>>, %arg5: memref<1x8x8x8xbf16, #tpu.memory_space<vmem>>) attributes {dimension_semantics = [#tpu.dimension_semantics<parallel>], iteration_bounds = array<i64: 2>, scalar_prefetch = 0 : i64, scratch_operands = 0 : i64, tpu.core_type = #tpu.core_type<tc>, window_params = [{transform_indices = @transform_0, window_bounds = array<i64: 1, 9, 9, 8>}, {transform_indices = @transform_1, window_bounds = array<i64: 1, 9, 9, 8>}, {transform_indices = @transform_2, window_bounds = array<i64: 1, 9, 9, 8>}, {transform_indices = @transform_3, window_bounds = array<i64: 1, 9, 9, 8>}, {transform_indices = @transform_4, window_bounds = array<i64: 1, 8, 8, 8>}]} {
    %c0 = arith.constant 0 : index
    %c0_0 = arith.constant 0 : index
    %c0_1 = arith.constant 0 : index
    %c0_2 = arith.constant 0 : index
    %0 = vector.load %arg1[%c0, %c0_0, %c0_1, %c0_2] : memref<1x9x9x8xbf16, #tpu.memory_space<vmem>>, vector<1x9x9x8xbf16>
    %1 = arith.extf %0 : vector<1x9x9x8xbf16> to vector<1x9x9x8xf32>
    %c0_3 = arith.constant 0 : index
    %c0_4 = arith.constant 0 : index
    %c0_5 = arith.constant 0 : index
    %c0_6 = arith.constant 0 : index
    %2 = vector.load %arg2[%c0_3, %c0_4, %c0_5, %c0_6] : memref<1x9x9x8xbf16, #tpu.memory_space<vmem>>, vector<1x9x9x8xbf16>
    %3 = arith.extf %2 : vector<1x9x9x8xbf16> to vector<1x9x9x8xf32>
    %c0_7 = arith.constant 0 : index
    %c0_8 = arith.constant 0 : index
    %c0_9 = arith.constant 0 : index
    %c0_10 = arith.constant 0 : index
    %4 = vector.load %arg3[%c0_7, %c0_8, %c0_9, %c0_10] : memref<1x9x9x8xbf16, #tpu.memory_space<vmem>>, vector<1x9x9x8xbf16>
    %5 = arith.extf %4 : vector<1x9x9x8xbf16> to vector<1x9x9x8xf32>
    %c0_11 = arith.constant 0 : index
    %c0_12 = arith.constant 0 : index
    %c0_13 = arith.constant 0 : index
    %c0_14 = arith.constant 0 : index
    %6 = vector.load %arg4[%c0_11, %c0_12, %c0_13, %c0_14] : memref<1x9x9x8xbf16, #tpu.memory_space<vmem>>, vector<1x9x9x8xbf16>
    %7 = arith.extf %6 : vector<1x9x9x8xbf16> to vector<1x9x9x8xf32>
    %8 = vector.extract_strided_slice %1 {offsets = [0, 0, 0, 0], sizes = [1, 8, 8, 8], strides = [1, 1, 1, 1]} : vector<1x9x9x8xf32> to vector<1x8x8x8xf32>
    %9 = vector.extract_strided_slice %1 {offsets = [0, 0, 1, 0], sizes = [1, 8, 8, 8], strides = [1, 1, 1, 1]} : vector<1x9x9x8xf32> to vector<1x8x8x8xf32>
    %10 = arith.maximumf %8, %9 : vector<1x8x8x8xf32>
    %11 = vector.extract_strided_slice %1 {offsets = [0, 1, 0, 0], sizes = [1, 8, 8, 8], strides = [1, 1, 1, 1]} : vector<1x9x9x8xf32> to vector<1x8x8x8xf32>
    %12 = arith.maximumf %10, %11 : vector<1x8x8x8xf32>
    %13 = vector.extract_strided_slice %1 {offsets = [0, 1, 1, 0], sizes = [1, 8, 8, 8], strides = [1, 1, 1, 1]} : vector<1x9x9x8xf32> to vector<1x8x8x8xf32>
    %14 = arith.maximumf %12, %13 : vector<1x8x8x8xf32>
    %15 = vector.extract_strided_slice %3 {offsets = [0, 0, 0, 0], sizes = [1, 8, 8, 8], strides = [1, 1, 1, 1]} : vector<1x9x9x8xf32> to vector<1x8x8x8xf32>
    %16 = arith.maximumf %14, %15 : vector<1x8x8x8xf32>
    %17 = vector.extract_strided_slice %3 {offsets = [0, 1, 0, 0], sizes = [1, 8, 8, 8], strides = [1, 1, 1, 1]} : vector<1x9x9x8xf32> to vector<1x8x8x8xf32>
    %18 = arith.maximumf %16, %17 : vector<1x8x8x8xf32>
    %19 = vector.extract_strided_slice %5 {offsets = [0, 0, 0, 0], sizes = [1, 8, 8, 8], strides = [1, 1, 1, 1]} : vector<1x9x9x8xf32> to vector<1x8x8x8xf32>
    %20 = arith.maximumf %18, %19 : vector<1x8x8x8xf32>
    %21 = vector.extract_strided_slice %5 {offsets = [0, 0, 1, 0], sizes = [1, 8, 8, 8], strides = [1, 1, 1, 1]} : vector<1x9x9x8xf32> to vector<1x8x8x8xf32>
    %22 = arith.maximumf %20, %21 : vector<1x8x8x8xf32>
    %23 = vector.extract_strided_slice %7 {offsets = [0, 0, 0, 0], sizes = [1, 8, 8, 8], strides = [1, 1, 1, 1]} : vector<1x9x9x8xf32> to vector<1x8x8x8xf32>
    %24 = arith.maximumf %22, %23 : vector<1x8x8x8xf32>
    %25 = arith.truncf %24 : vector<1x8x8x8xf32> to vector<1x8x8x8xbf16>
    %c0_15 = arith.constant 0 : index
    %c0_16 = arith.constant 0 : index
    %c0_17 = arith.constant 0 : index
    %c0_18 = arith.constant 0 : index
    %26 = vector.load %arg5[%c0_15, %c0_16, %c0_17, %c0_18] : memref<1x8x8x8xbf16, #tpu.memory_space<vmem>>, vector<1x8x8x8xbf16>
    tpu.vector_store %arg5[%c0_15, %c0_16, %c0_17, %c0_18], %25 {strides = array<i32>} : memref<1x8x8x8xbf16, #tpu.memory_space<vmem>>, vector<1x8x8x8xbf16>,
    return
  }
  func.func @transform_0(%arg0: i32) -> (i32, i32, i32, i32) {
    %c0_i32 = arith.constant 0 : i32
    %c0_i32_0 = arith.constant 0 : i32
    %c0_i32_1 = arith.constant 0 : i32
    %c0_i32_2 = arith.constant 0 : i32
    return %arg0, %c0_i32, %c0_i32_0, %c0_i32_1 : i32, i32, i32, i32
  }
  func.func @transform_1(%arg0: i32) -> (i32, i32, i32, i32) {
    %c0_i32 = arith.constant 0 : i32
    %c0_i32_0 = arith.constant 0 : i32
    %c0_i32_1 = arith.constant 0 : i32
    %c0_i32_2 = arith.constant 0 : i32
    return %arg0, %c0_i32, %c0_i32_0, %c0_i32_1 : i32, i32, i32, i32
  }
  func.func @transform_2(%arg0: i32) -> (i32, i32, i32, i32) {
    %c0_i32 = arith.constant 0 : i32
    %c0_i32_0 = arith.constant 0 : i32
    %c0_i32_1 = arith.constant 0 : i32
    %c0_i32_2 = arith.constant 0 : i32
    return %arg0, %c0_i32, %c0_i32_0, %c0_i32_1 : i32, i32, i32, i32
  }
  func.func @transform_3(%arg0: i32) -> (i32, i32, i32, i32) {
    %c0_i32 = arith.constant 0 : i32
    %c0_i32_0 = arith.constant 0 : i32
    %c0_i32_1 = arith.constant 0 : i32
    %c0_i32_2 = arith.constant 0 : i32
    return %arg0, %c0_i32, %c0_i32_0, %c0_i32_1 : i32, i32, i32, i32
  }
  func.func @transform_4(%arg0: i32) -> (i32, i32, i32, i32) {
    %c0_i32 = arith.constant 0 : i32
    %c0_i32_0 = arith.constant 0 : i32
    %c0_i32_1 = arith.constant 0 : i32
    %c0_i32_2 = arith.constant 0 : i32
    return %arg0, %c0_i32, %c0_i32_0, %c0_i32_1 : i32, i32, i32, i32
  }
}

module attributes {stable_mosaic.version = 11 : i64} {
  func.func @_gemm_1k_kernel(%arg0: i32, %arg1: i32, %arg2: memref<64x128xbf16, #tpu.memory_space<vmem>>, %arg3: memref<128x128xbf16, #tpu.memory_space<vmem>>, %arg4: memref<1x128xf32, #tpu.memory_space<vmem>>, %arg5: memref<64x128xbf16, #tpu.memory_space<vmem>>) attributes {dimension_semantics = [#tpu.dimension_semantics<parallel>, #tpu.dimension_semantics<parallel>], iteration_bounds = array<i64: 2, 1>, scalar_prefetch = 0 : i64, scratch_operands = 0 : i64, tpu.core_type = #tpu.core_type<tc>, window_params = [{transform_indices = @transform_0, window_bounds = array<i64: 64, 128>}, {transform_indices = @transform_1, window_bounds = array<i64: 128, 128>}, {transform_indices = @transform_2, window_bounds = array<i64: 1, 128>}, {transform_indices = @transform_3, window_bounds = array<i64: 64, 128>}]} {
    %c0 = arith.constant 0 : index
    %c0_0 = arith.constant 0 : index
    %0 = vector.load %arg2[%c0, %c0_0] : memref<64x128xbf16, #tpu.memory_space<vmem>>, vector<64x128xbf16>
    %c0_1 = arith.constant 0 : index
    %c0_2 = arith.constant 0 : index
    %1 = vector.load %arg3[%c0_1, %c0_2] : memref<128x128xbf16, #tpu.memory_space<vmem>>, vector<128x128xbf16>
    %cst = arith.constant dense<0.000000e+00> : vector<64x128xf32>
    %2 = tpu.matmul %0, %1, %cst {dimension_numbers = #tpu.dot_dimension_numbers<[1], [0], [0], [1], [0, 0, 1, 1], [], []>} : vector<64x128xbf16>, vector<128x128xbf16>, vector<64x128xf32> -> vector<64x128xf32>
    %c0_3 = arith.constant 0 : index
    %c0_4 = arith.constant 0 : index
    %3 = vector.load %arg4[%c0_3, %c0_4] : memref<1x128xf32, #tpu.memory_space<vmem>>, vector<1x128xf32>
    %4 = vector.broadcast %3 : vector<1x128xf32> to vector<64x128xf32>
    %5 = arith.addf %2, %4 : vector<64x128xf32>
    %6 = arith.truncf %5 : vector<64x128xf32> to vector<64x128xbf16>
    %c0_5 = arith.constant 0 : index
    %c0_6 = arith.constant 0 : index
    %7 = vector.load %arg5[%c0_5, %c0_6] : memref<64x128xbf16, #tpu.memory_space<vmem>>, vector<64x128xbf16>
    tpu.vector_store %arg5[%c0_5, %c0_6], %6 {strides = array<i32>} : memref<64x128xbf16, #tpu.memory_space<vmem>>, vector<64x128xbf16>,
    return
  }
  func.func @transform_0(%arg0: i32, %arg1: i32) -> (i32, i32) {
    %c0_i32 = arith.constant 0 : i32
    %c0_i32_0 = arith.constant 0 : i32
    return %arg0, %c0_i32 : i32, i32
  }
  func.func @transform_1(%arg0: i32, %arg1: i32) -> (i32, i32) {
    %c0_i32 = arith.constant 0 : i32
    %c0_i32_0 = arith.constant 0 : i32
    return %c0_i32, %arg1 : i32, i32
  }
  func.func @transform_2(%arg0: i32, %arg1: i32) -> (i32, i32) {
    %c0_i32 = arith.constant 0 : i32
    %c0_i32_0 = arith.constant 0 : i32
    return %c0_i32, %arg1 : i32, i32
  }
  func.func @transform_3(%arg0: i32, %arg1: i32) -> (i32, i32) {
    %c0_i32 = arith.constant 0 : i32
    return %arg0, %arg1 : i32, i32
  }
}

module attributes {stable_mosaic.version = 11 : i64} {
  func.func @_gemm_1k_kernel(%arg0: i32, %arg1: i32, %arg2: memref<64x128xbf16, #tpu.memory_space<vmem>>, %arg3: memref<128x128xbf16, #tpu.memory_space<vmem>>, %arg4: memref<1x128xf32, #tpu.memory_space<vmem>>, %arg5: memref<64x128xbf16, #tpu.memory_space<vmem>>, %arg6: memref<64x128xbf16, #tpu.memory_space<vmem>>) attributes {dimension_semantics = [#tpu.dimension_semantics<parallel>, #tpu.dimension_semantics<parallel>], iteration_bounds = array<i64: 2, 1>, scalar_prefetch = 0 : i64, scratch_operands = 0 : i64, tpu.core_type = #tpu.core_type<tc>, window_params = [{transform_indices = @transform_0, window_bounds = array<i64: 64, 128>}, {transform_indices = @transform_1, window_bounds = array<i64: 128, 128>}, {transform_indices = @transform_2, window_bounds = array<i64: 1, 128>}, {transform_indices = @transform_3, window_bounds = array<i64: 64, 128>}, {transform_indices = @transform_4, window_bounds = array<i64: 64, 128>}]} {
    %c0 = arith.constant 0 : index
    %c0_0 = arith.constant 0 : index
    %0 = vector.load %arg2[%c0, %c0_0] : memref<64x128xbf16, #tpu.memory_space<vmem>>, vector<64x128xbf16>
    %c0_1 = arith.constant 0 : index
    %c0_2 = arith.constant 0 : index
    %1 = vector.load %arg3[%c0_1, %c0_2] : memref<128x128xbf16, #tpu.memory_space<vmem>>, vector<128x128xbf16>
    %cst = arith.constant dense<0.000000e+00> : vector<64x128xf32>
    %2 = tpu.matmul %0, %1, %cst {dimension_numbers = #tpu.dot_dimension_numbers<[1], [0], [0], [1], [0, 0, 1, 1], [], []>} : vector<64x128xbf16>, vector<128x128xbf16>, vector<64x128xf32> -> vector<64x128xf32>
    %c0_3 = arith.constant 0 : index
    %c0_4 = arith.constant 0 : index
    %3 = vector.load %arg4[%c0_3, %c0_4] : memref<1x128xf32, #tpu.memory_space<vmem>>, vector<1x128xf32>
    %4 = vector.broadcast %3 : vector<1x128xf32> to vector<64x128xf32>
    %5 = arith.addf %2, %4 : vector<64x128xf32>
    %c0_5 = arith.constant 0 : index
    %c0_6 = arith.constant 0 : index
    %6 = vector.load %arg5[%c0_5, %c0_6] : memref<64x128xbf16, #tpu.memory_space<vmem>>, vector<64x128xbf16>
    %7 = arith.extf %6 : vector<64x128xbf16> to vector<64x128xf32>
    %8 = arith.addf %5, %7 : vector<64x128xf32>
    %cst_7 = arith.constant 0.000000e+00 : f32
    %9 = vector.broadcast %cst_7 : f32 to vector<64x128xf32>
    %10 = arith.maximumf %8, %9 : vector<64x128xf32>
    %11 = arith.truncf %10 : vector<64x128xf32> to vector<64x128xbf16>
    %c0_8 = arith.constant 0 : index
    %c0_9 = arith.constant 0 : index
    %12 = vector.load %arg6[%c0_8, %c0_9] : memref<64x128xbf16, #tpu.memory_space<vmem>>, vector<64x128xbf16>
    tpu.vector_store %arg6[%c0_8, %c0_9], %11 {strides = array<i32>} : memref<64x128xbf16, #tpu.memory_space<vmem>>, vector<64x128xbf16>,
    return
  }
  func.func @transform_0(%arg0: i32, %arg1: i32) -> (i32, i32) {
    %c0_i32 = arith.constant 0 : i32
    %c0_i32_0 = arith.constant 0 : i32
    return %arg0, %c0_i32 : i32, i32
  }
  func.func @transform_1(%arg0: i32, %arg1: i32) -> (i32, i32) {
    %c0_i32 = arith.constant 0 : i32
    %c0_i32_0 = arith.constant 0 : i32
    return %c0_i32, %arg1 : i32, i32
  }
  func.func @transform_2(%arg0: i32, %arg1: i32) -> (i32, i32) {
    %c0_i32 = arith.constant 0 : i32
    %c0_i32_0 = arith.constant 0 : i32
    return %c0_i32, %arg1 : i32, i32
  }
  func.func @transform_3(%arg0: i32, %arg1: i32) -> (i32, i32) {
    %c0_i32 = arith.constant 0 : i32
    return %arg0, %arg1 : i32, i32
  }
  func.func @transform_4(%arg0: i32, %arg1: i32) -> (i32, i32) {
    %c0_i32 = arith.constant 0 : i32
    return %arg0, %arg1 : i32, i32
  }
}

module attributes {stable_mosaic.version = 11 : i64} {
  func.func @_gemm_1k_kernel(%arg0: i32, %arg1: i32, %arg2: memref<32x256xbf16, #tpu.memory_space<vmem>>, %arg3: memref<256x128xbf16, #tpu.memory_space<vmem>>, %arg4: memref<1x128xf32, #tpu.memory_space<vmem>>, %arg5: memref<32x128xbf16, #tpu.memory_space<vmem>>) attributes {dimension_semantics = [#tpu.dimension_semantics<parallel>, #tpu.dimension_semantics<parallel>], iteration_bounds = array<i64: 1, 1>, scalar_prefetch = 0 : i64, scratch_operands = 0 : i64, tpu.core_type = #tpu.core_type<tc>, window_params = [{transform_indices = @transform_0, window_bounds = array<i64: 32, 256>}, {transform_indices = @transform_1, window_bounds = array<i64: 256, 128>}, {transform_indices = @transform_2, window_bounds = array<i64: 1, 128>}, {transform_indices = @transform_3, window_bounds = array<i64: 32, 128>}]} {
    %c0 = arith.constant 0 : index
    %c0_0 = arith.constant 0 : index
    %0 = vector.load %arg2[%c0, %c0_0] : memref<32x256xbf16, #tpu.memory_space<vmem>>, vector<32x256xbf16>
    %c0_1 = arith.constant 0 : index
    %c0_2 = arith.constant 0 : index
    %1 = vector.load %arg3[%c0_1, %c0_2] : memref<256x128xbf16, #tpu.memory_space<vmem>>, vector<256x128xbf16>
    %cst = arith.constant dense<0.000000e+00> : vector<32x128xf32>
    %2 = tpu.matmul %0, %1, %cst {dimension_numbers = #tpu.dot_dimension_numbers<[1], [0], [0], [1], [0, 0, 1, 1], [], []>} : vector<32x256xbf16>, vector<256x128xbf16>, vector<32x128xf32> -> vector<32x128xf32>
    %c0_3 = arith.constant 0 : index
    %c0_4 = arith.constant 0 : index
    %3 = vector.load %arg4[%c0_3, %c0_4] : memref<1x128xf32, #tpu.memory_space<vmem>>, vector<1x128xf32>
    %4 = vector.broadcast %3 : vector<1x128xf32> to vector<32x128xf32>
    %5 = arith.addf %2, %4 : vector<32x128xf32>
    %cst_5 = arith.constant 0.000000e+00 : f32
    %6 = vector.broadcast %cst_5 : f32 to vector<32x128xf32>
    %7 = arith.maximumf %5, %6 : vector<32x128xf32>
    %8 = arith.truncf %7 : vector<32x128xf32> to vector<32x128xbf16>
    %c0_6 = arith.constant 0 : index
    %c0_7 = arith.constant 0 : index
    %9 = vector.load %arg5[%c0_6, %c0_7] : memref<32x128xbf16, #tpu.memory_space<vmem>>, vector<32x128xbf16>
    tpu.vector_store %arg5[%c0_6, %c0_7], %8 {strides = array<i32>} : memref<32x128xbf16, #tpu.memory_space<vmem>>, vector<32x128xbf16>,
    return
  }
  func.func @transform_0(%arg0: i32, %arg1: i32) -> (i32, i32) {
    %c0_i32 = arith.constant 0 : i32
    %c0_i32_0 = arith.constant 0 : i32
    return %arg0, %c0_i32 : i32, i32
  }
  func.func @transform_1(%arg0: i32, %arg1: i32) -> (i32, i32) {
    %c0_i32 = arith.constant 0 : i32
    %c0_i32_0 = arith.constant 0 : i32
    return %c0_i32, %arg1 : i32, i32
  }
  func.func @transform_2(%arg0: i32, %arg1: i32) -> (i32, i32) {
    %c0_i32 = arith.constant 0 : i32
    %c0_i32_0 = arith.constant 0 : i32
    return %c0_i32, %arg1 : i32, i32
  }
  func.func @transform_3(%arg0: i32, %arg1: i32) -> (i32, i32) {
    %c0_i32 = arith.constant 0 : i32
    return %arg0, %arg1 : i32, i32
  }
}

module attributes {stable_mosaic.version = 11 : i64} {
  func.func @_gemm_1k_kernel(%arg0: i32, %arg1: i32, %arg2: memref<32x128xbf16, #tpu.memory_space<vmem>>, %arg3: memref<128x128xbf16, #tpu.memory_space<vmem>>, %arg4: memref<1x128xf32, #tpu.memory_space<vmem>>, %arg5: memref<32x128xbf16, #tpu.memory_space<vmem>>, %arg6: memref<32x128xbf16, #tpu.memory_space<vmem>>) attributes {dimension_semantics = [#tpu.dimension_semantics<parallel>, #tpu.dimension_semantics<parallel>], iteration_bounds = array<i64: 1, 1>, scalar_prefetch = 0 : i64, scratch_operands = 0 : i64, tpu.core_type = #tpu.core_type<tc>, window_params = [{transform_indices = @transform_0, window_bounds = array<i64: 32, 128>}, {transform_indices = @transform_1, window_bounds = array<i64: 128, 128>}, {transform_indices = @transform_2, window_bounds = array<i64: 1, 128>}, {transform_indices = @transform_3, window_bounds = array<i64: 32, 128>}, {transform_indices = @transform_4, window_bounds = array<i64: 32, 128>}]} {
    %c0 = arith.constant 0 : index
    %c0_0 = arith.constant 0 : index
    %0 = vector.load %arg2[%c0, %c0_0] : memref<32x128xbf16, #tpu.memory_space<vmem>>, vector<32x128xbf16>
    %c0_1 = arith.constant 0 : index
    %c0_2 = arith.constant 0 : index
    %1 = vector.load %arg3[%c0_1, %c0_2] : memref<128x128xbf16, #tpu.memory_space<vmem>>, vector<128x128xbf16>
    %cst = arith.constant dense<0.000000e+00> : vector<32x128xf32>
    %2 = tpu.matmul %0, %1, %cst {dimension_numbers = #tpu.dot_dimension_numbers<[1], [0], [0], [1], [0, 0, 1, 1], [], []>} : vector<32x128xbf16>, vector<128x128xbf16>, vector<32x128xf32> -> vector<32x128xf32>
    %c0_3 = arith.constant 0 : index
    %c0_4 = arith.constant 0 : index
    %3 = vector.load %arg4[%c0_3, %c0_4] : memref<1x128xf32, #tpu.memory_space<vmem>>, vector<1x128xf32>
    %4 = vector.broadcast %3 : vector<1x128xf32> to vector<32x128xf32>
    %5 = arith.addf %2, %4 : vector<32x128xf32>
    %c0_5 = arith.constant 0 : index
    %c0_6 = arith.constant 0 : index
    %6 = vector.load %arg5[%c0_5, %c0_6] : memref<32x128xbf16, #tpu.memory_space<vmem>>, vector<32x128xbf16>
    %7 = arith.extf %6 : vector<32x128xbf16> to vector<32x128xf32>
    %8 = arith.addf %5, %7 : vector<32x128xf32>
    %cst_7 = arith.constant 0.000000e+00 : f32
    %9 = vector.broadcast %cst_7 : f32 to vector<32x128xf32>
    %10 = arith.maximumf %8, %9 : vector<32x128xf32>
    %11 = arith.truncf %10 : vector<32x128xf32> to vector<32x128xbf16>
    %c0_8 = arith.constant 0 : index
    %c0_9 = arith.constant 0 : index
    %12 = vector.load %arg6[%c0_8, %c0_9] : memref<32x128xbf16, #tpu.memory_space<vmem>>, vector<32x128xbf16>
    tpu.vector_store %arg6[%c0_8, %c0_9], %11 {strides = array<i32>} : memref<32x128xbf16, #tpu.memory_space<vmem>>, vector<32x128xbf16>,
    return
  }
  func.func @transform_0(%arg0: i32, %arg1: i32) -> (i32, i32) {
    %c0_i32 = arith.constant 0 : i32
    %c0_i32_0 = arith.constant 0 : i32
    return %arg0, %c0_i32 : i32, i32
  }
  func.func @transform_1(%arg0: i32, %arg1: i32) -> (i32, i32) {
    %c0_i32 = arith.constant 0 : i32
    %c0_i32_0 = arith.constant 0 : i32
    return %c0_i32, %arg1 : i32, i32
  }
  func.func @transform_2(%arg0: i32, %arg1: i32) -> (i32, i32) {
    %c0_i32 = arith.constant 0 : i32
    %c0_i32_0 = arith.constant 0 : i32
    return %c0_i32, %arg1 : i32, i32
  }
  func.func @transform_3(%arg0: i32, %arg1: i32) -> (i32, i32) {
    %c0_i32 = arith.constant 0 : i32
    return %arg0, %arg1 : i32, i32
  }
  func.func @transform_4(%arg0: i32, %arg1: i32) -> (i32, i32) {
    %c0_i32 = arith.constant 0 : i32
    return %arg0, %arg1 : i32, i32
  }
}

module attributes {stable_mosaic.version = 11 : i64} {
  func.func @_gemm_1k_kernel(%arg0: i32, %arg1: i32, %arg2: memref<32x128xbf16, #tpu.memory_space<vmem>>, %arg3: memref<128x128xbf16, #tpu.memory_space<vmem>>, %arg4: memref<1x128xf32, #tpu.memory_space<vmem>>, %arg5: memref<32x128xbf16, #tpu.memory_space<vmem>>) attributes {dimension_semantics = [#tpu.dimension_semantics<parallel>, #tpu.dimension_semantics<parallel>], iteration_bounds = array<i64: 1, 1>, scalar_prefetch = 0 : i64, scratch_operands = 0 : i64, tpu.core_type = #tpu.core_type<tc>, window_params = [{transform_indices = @transform_0, window_bounds = array<i64: 32, 128>}, {transform_indices = @transform_1, window_bounds = array<i64: 128, 128>}, {transform_indices = @transform_2, window_bounds = array<i64: 1, 128>}, {transform_indices = @transform_3, window_bounds = array<i64: 32, 128>}]} {
    %c0 = arith.constant 0 : index
    %c0_0 = arith.constant 0 : index
    %0 = vector.load %arg2[%c0, %c0_0] : memref<32x128xbf16, #tpu.memory_space<vmem>>, vector<32x128xbf16>
    %c0_1 = arith.constant 0 : index
    %c0_2 = arith.constant 0 : index
    %1 = vector.load %arg3[%c0_1, %c0_2] : memref<128x128xbf16, #tpu.memory_space<vmem>>, vector<128x128xbf16>
    %cst = arith.constant dense<0.000000e+00> : vector<32x128xf32>
    %2 = tpu.matmul %0, %1, %cst {dimension_numbers = #tpu.dot_dimension_numbers<[1], [0], [0], [1], [0, 0, 1, 1], [], []>} : vector<32x128xbf16>, vector<128x128xbf16>, vector<32x128xf32> -> vector<32x128xf32>
    %c0_3 = arith.constant 0 : index
    %c0_4 = arith.constant 0 : index
    %3 = vector.load %arg4[%c0_3, %c0_4] : memref<1x128xf32, #tpu.memory_space<vmem>>, vector<1x128xf32>
    %4 = vector.broadcast %3 : vector<1x128xf32> to vector<32x128xf32>
    %5 = arith.addf %2, %4 : vector<32x128xf32>
    %cst_5 = arith.constant 0.000000e+00 : f32
    %6 = vector.broadcast %cst_5 : f32 to vector<32x128xf32>
    %7 = arith.maximumf %5, %6 : vector<32x128xf32>
    %8 = arith.truncf %7 : vector<32x128xf32> to vector<32x128xbf16>
    %c0_6 = arith.constant 0 : index
    %c0_7 = arith.constant 0 : index
    %9 = vector.load %arg5[%c0_6, %c0_7] : memref<32x128xbf16, #tpu.memory_space<vmem>>, vector<32x128xbf16>
    tpu.vector_store %arg5[%c0_6, %c0_7], %8 {strides = array<i32>} : memref<32x128xbf16, #tpu.memory_space<vmem>>, vector<32x128xbf16>,
    return
  }
  func.func @transform_0(%arg0: i32, %arg1: i32) -> (i32, i32) {
    %c0_i32 = arith.constant 0 : i32
    %c0_i32_0 = arith.constant 0 : i32
    return %arg0, %c0_i32 : i32, i32
  }
  func.func @transform_1(%arg0: i32, %arg1: i32) -> (i32, i32) {
    %c0_i32 = arith.constant 0 : i32
    %c0_i32_0 = arith.constant 0 : i32
    return %c0_i32, %arg1 : i32, i32
  }
  func.func @transform_2(%arg0: i32, %arg1: i32) -> (i32, i32) {
    %c0_i32 = arith.constant 0 : i32
    %c0_i32_0 = arith.constant 0 : i32
    return %c0_i32, %arg1 : i32, i32
  }
  func.func @transform_3(%arg0: i32, %arg1: i32) -> (i32, i32) {
    %c0_i32 = arith.constant 0 : i32
    return %arg0, %arg1 : i32, i32
  }
}

module attributes {stable_mosaic.version = 11 : i64} {
  func.func @_gemm_1k_kernel(%arg0: i32, %arg1: i32, %arg2: memref<32x128xbf16, #tpu.memory_space<vmem>>, %arg3: memref<128x128xbf16, #tpu.memory_space<vmem>>, %arg4: memref<1x128xf32, #tpu.memory_space<vmem>>, %arg5: memref<32x128xbf16, #tpu.memory_space<vmem>>) attributes {dimension_semantics = [#tpu.dimension_semantics<parallel>, #tpu.dimension_semantics<parallel>], iteration_bounds = array<i64: 1, 1>, scalar_prefetch = 0 : i64, scratch_operands = 0 : i64, tpu.core_type = #tpu.core_type<tc>, window_params = [{transform_indices = @transform_0, window_bounds = array<i64: 32, 128>}, {transform_indices = @transform_1, window_bounds = array<i64: 128, 128>}, {transform_indices = @transform_2, window_bounds = array<i64: 1, 128>}, {transform_indices = @transform_3, window_bounds = array<i64: 32, 128>}]} {
    %c0 = arith.constant 0 : index
    %c0_0 = arith.constant 0 : index
    %0 = vector.load %arg2[%c0, %c0_0] : memref<32x128xbf16, #tpu.memory_space<vmem>>, vector<32x128xbf16>
    %c0_1 = arith.constant 0 : index
    %c0_2 = arith.constant 0 : index
    %1 = vector.load %arg3[%c0_1, %c0_2] : memref<128x128xbf16, #tpu.memory_space<vmem>>, vector<128x128xbf16>
    %cst = arith.constant dense<0.000000e+00> : vector<32x128xf32>
    %2 = tpu.matmul %0, %1, %cst {dimension_numbers = #tpu.dot_dimension_numbers<[1], [0], [0], [1], [0, 0, 1, 1], [], []>} : vector<32x128xbf16>, vector<128x128xbf16>, vector<32x128xf32> -> vector<32x128xf32>
    %c0_3 = arith.constant 0 : index
    %c0_4 = arith.constant 0 : index
    %3 = vector.load %arg4[%c0_3, %c0_4] : memref<1x128xf32, #tpu.memory_space<vmem>>, vector<1x128xf32>
    %4 = vector.broadcast %3 : vector<1x128xf32> to vector<32x128xf32>
    %5 = arith.addf %2, %4 : vector<32x128xf32>
    %6 = arith.truncf %5 : vector<32x128xf32> to vector<32x128xbf16>
    %c0_5 = arith.constant 0 : index
    %c0_6 = arith.constant 0 : index
    %7 = vector.load %arg5[%c0_5, %c0_6] : memref<32x128xbf16, #tpu.memory_space<vmem>>, vector<32x128xbf16>
    tpu.vector_store %arg5[%c0_5, %c0_6], %6 {strides = array<i32>} : memref<32x128xbf16, #tpu.memory_space<vmem>>, vector<32x128xbf16>,
    return
  }
  func.func @transform_0(%arg0: i32, %arg1: i32) -> (i32, i32) {
    %c0_i32 = arith.constant 0 : i32
    %c0_i32_0 = arith.constant 0 : i32
    return %arg0, %c0_i32 : i32, i32
  }
  func.func @transform_1(%arg0: i32, %arg1: i32) -> (i32, i32) {
    %c0_i32 = arith.constant 0 : i32
    %c0_i32_0 = arith.constant 0 : i32
    return %c0_i32, %arg1 : i32, i32
  }
  func.func @transform_2(%arg0: i32, %arg1: i32) -> (i32, i32) {
    %c0_i32 = arith.constant 0 : i32
    %c0_i32_0 = arith.constant 0 : i32
    return %c0_i32, %arg1 : i32, i32
  }
  func.func @transform_3(%arg0: i32, %arg1: i32) -> (i32, i32) {
    %c0_i32 = arith.constant 0 : i32
    return %arg0, %arg1 : i32, i32
  }
}

module attributes {stable_mosaic.version = 11 : i64} {
  func.func @_gemm_1k_kernel(%arg0: i32, %arg1: i32, %arg2: memref<16x384xbf16, #tpu.memory_space<vmem>>, %arg3: memref<384x128xbf16, #tpu.memory_space<vmem>>, %arg4: memref<1x128xf32, #tpu.memory_space<vmem>>, %arg5: memref<16x128xbf16, #tpu.memory_space<vmem>>) attributes {dimension_semantics = [#tpu.dimension_semantics<parallel>, #tpu.dimension_semantics<parallel>], iteration_bounds = array<i64: 1, 1>, scalar_prefetch = 0 : i64, scratch_operands = 0 : i64, tpu.core_type = #tpu.core_type<tc>, window_params = [{transform_indices = @transform_0, window_bounds = array<i64: 16, 384>}, {transform_indices = @transform_1, window_bounds = array<i64: 384, 128>}, {transform_indices = @transform_2, window_bounds = array<i64: 1, 128>}, {transform_indices = @transform_3, window_bounds = array<i64: 16, 128>}]} {
    %c0 = arith.constant 0 : index
    %c0_0 = arith.constant 0 : index
    %0 = vector.load %arg2[%c0, %c0_0] : memref<16x384xbf16, #tpu.memory_space<vmem>>, vector<16x384xbf16>
    %c0_1 = arith.constant 0 : index
    %c0_2 = arith.constant 0 : index
    %1 = vector.load %arg3[%c0_1, %c0_2] : memref<384x128xbf16, #tpu.memory_space<vmem>>, vector<384x128xbf16>
    %cst = arith.constant dense<0.000000e+00> : vector<16x128xf32>
    %2 = tpu.matmul %0, %1, %cst {dimension_numbers = #tpu.dot_dimension_numbers<[1], [0], [0], [1], [0, 0, 1, 1], [], []>} : vector<16x384xbf16>, vector<384x128xbf16>, vector<16x128xf32> -> vector<16x128xf32>
    %c0_3 = arith.constant 0 : index
    %c0_4 = arith.constant 0 : index
    %3 = vector.load %arg4[%c0_3, %c0_4] : memref<1x128xf32, #tpu.memory_space<vmem>>, vector<1x128xf32>
    %4 = vector.broadcast %3 : vector<1x128xf32> to vector<16x128xf32>
    %5 = arith.addf %2, %4 : vector<16x128xf32>
    %cst_5 = arith.constant 0.000000e+00 : f32
    %6 = vector.broadcast %cst_5 : f32 to vector<16x128xf32>
    %7 = arith.maximumf %5, %6 : vector<16x128xf32>
    %8 = arith.truncf %7 : vector<16x128xf32> to vector<16x128xbf16>
    %c0_6 = arith.constant 0 : index
    %c0_7 = arith.constant 0 : index
    %9 = vector.load %arg5[%c0_6, %c0_7] : memref<16x128xbf16, #tpu.memory_space<vmem>>, vector<16x128xbf16>
    tpu.vector_store %arg5[%c0_6, %c0_7], %8 {strides = array<i32>} : memref<16x128xbf16, #tpu.memory_space<vmem>>, vector<16x128xbf16>,
    return
  }
  func.func @transform_0(%arg0: i32, %arg1: i32) -> (i32, i32) {
    %c0_i32 = arith.constant 0 : i32
    %c0_i32_0 = arith.constant 0 : i32
    return %arg0, %c0_i32 : i32, i32
  }
  func.func @transform_1(%arg0: i32, %arg1: i32) -> (i32, i32) {
    %c0_i32 = arith.constant 0 : i32
    %c0_i32_0 = arith.constant 0 : i32
    return %c0_i32, %arg1 : i32, i32
  }
  func.func @transform_2(%arg0: i32, %arg1: i32) -> (i32, i32) {
    %c0_i32 = arith.constant 0 : i32
    %c0_i32_0 = arith.constant 0 : i32
    return %c0_i32, %arg1 : i32, i32
  }
  func.func @transform_3(%arg0: i32, %arg1: i32) -> (i32, i32) {
    %c0_i32 = arith.constant 0 : i32
    return %arg0, %arg1 : i32, i32
  }
}

module attributes {stable_mosaic.version = 11 : i64} {
  func.func @_gemm_1k_kernel(%arg0: i32, %arg1: i32, %arg2: memref<16x128xbf16, #tpu.memory_space<vmem>>, %arg3: memref<128x128xbf16, #tpu.memory_space<vmem>>, %arg4: memref<1x128xf32, #tpu.memory_space<vmem>>, %arg5: memref<16x128xbf16, #tpu.memory_space<vmem>>) attributes {dimension_semantics = [#tpu.dimension_semantics<parallel>, #tpu.dimension_semantics<parallel>], iteration_bounds = array<i64: 1, 1>, scalar_prefetch = 0 : i64, scratch_operands = 0 : i64, tpu.core_type = #tpu.core_type<tc>, window_params = [{transform_indices = @transform_0, window_bounds = array<i64: 16, 128>}, {transform_indices = @transform_1, window_bounds = array<i64: 128, 128>}, {transform_indices = @transform_2, window_bounds = array<i64: 1, 128>}, {transform_indices = @transform_3, window_bounds = array<i64: 16, 128>}]} {
    %c0 = arith.constant 0 : index
    %c0_0 = arith.constant 0 : index
    %0 = vector.load %arg2[%c0, %c0_0] : memref<16x128xbf16, #tpu.memory_space<vmem>>, vector<16x128xbf16>
    %c0_1 = arith.constant 0 : index
    %c0_2 = arith.constant 0 : index
    %1 = vector.load %arg3[%c0_1, %c0_2] : memref<128x128xbf16, #tpu.memory_space<vmem>>, vector<128x128xbf16>
    %cst = arith.constant dense<0.000000e+00> : vector<16x128xf32>
    %2 = tpu.matmul %0, %1, %cst {dimension_numbers = #tpu.dot_dimension_numbers<[1], [0], [0], [1], [0, 0, 1, 1], [], []>} : vector<16x128xbf16>, vector<128x128xbf16>, vector<16x128xf32> -> vector<16x128xf32>
    %c0_3 = arith.constant 0 : index
    %c0_4 = arith.constant 0 : index
    %3 = vector.load %arg4[%c0_3, %c0_4] : memref<1x128xf32, #tpu.memory_space<vmem>>, vector<1x128xf32>
    %4 = vector.broadcast %3 : vector<1x128xf32> to vector<16x128xf32>
    %5 = arith.addf %2, %4 : vector<16x128xf32>
    %6 = arith.truncf %5 : vector<16x128xf32> to vector<16x128xbf16>
    %c0_5 = arith.constant 0 : index
    %c0_6 = arith.constant 0 : index
    %7 = vector.load %arg5[%c0_5, %c0_6] : memref<16x128xbf16, #tpu.memory_space<vmem>>, vector<16x128xbf16>
    tpu.vector_store %arg5[%c0_5, %c0_6], %6 {strides = array<i32>} : memref<16x128xbf16, #tpu.memory_space<vmem>>, vector<16x128xbf16>,
    return
  }
  func.func @transform_0(%arg0: i32, %arg1: i32) -> (i32, i32) {
    %c0_i32 = arith.constant 0 : i32
    %c0_i32_0 = arith.constant 0 : i32
    return %arg0, %c0_i32 : i32, i32
  }
  func.func @transform_1(%arg0: i32, %arg1: i32) -> (i32, i32) {
    %c0_i32 = arith.constant 0 : i32
    %c0_i32_0 = arith.constant 0 : i32
    return %c0_i32, %arg1 : i32, i32
  }
  func.func @transform_2(%arg0: i32, %arg1: i32) -> (i32, i32) {
    %c0_i32 = arith.constant 0 : i32
    %c0_i32_0 = arith.constant 0 : i32
    return %c0_i32, %arg1 : i32, i32
  }
  func.func @transform_3(%arg0: i32, %arg1: i32) -> (i32, i32) {
    %c0_i32 = arith.constant 0 : i32
    return %arg0, %arg1 : i32, i32
  }
}

module attributes {stable_mosaic.version = 11 : i64} {
  func.func @_gemm_1k_kernel(%arg0: i32, %arg1: i32, %arg2: memref<16x128xbf16, #tpu.memory_space<vmem>>, %arg3: memref<128x128xbf16, #tpu.memory_space<vmem>>, %arg4: memref<1x128xf32, #tpu.memory_space<vmem>>, %arg5: memref<16x128xbf16, #tpu.memory_space<vmem>>, %arg6: memref<16x128xbf16, #tpu.memory_space<vmem>>) attributes {dimension_semantics = [#tpu.dimension_semantics<parallel>, #tpu.dimension_semantics<parallel>], iteration_bounds = array<i64: 1, 1>, scalar_prefetch = 0 : i64, scratch_operands = 0 : i64, tpu.core_type = #tpu.core_type<tc>, window_params = [{transform_indices = @transform_0, window_bounds = array<i64: 16, 128>}, {transform_indices = @transform_1, window_bounds = array<i64: 128, 128>}, {transform_indices = @transform_2, window_bounds = array<i64: 1, 128>}, {transform_indices = @transform_3, window_bounds = array<i64: 16, 128>}, {transform_indices = @transform_4, window_bounds = array<i64: 16, 128>}]} {
    %c0 = arith.constant 0 : index
    %c0_0 = arith.constant 0 : index
    %0 = vector.load %arg2[%c0, %c0_0] : memref<16x128xbf16, #tpu.memory_space<vmem>>, vector<16x128xbf16>
    %c0_1 = arith.constant 0 : index
    %c0_2 = arith.constant 0 : index
    %1 = vector.load %arg3[%c0_1, %c0_2] : memref<128x128xbf16, #tpu.memory_space<vmem>>, vector<128x128xbf16>
    %cst = arith.constant dense<0.000000e+00> : vector<16x128xf32>
    %2 = tpu.matmul %0, %1, %cst {dimension_numbers = #tpu.dot_dimension_numbers<[1], [0], [0], [1], [0, 0, 1, 1], [], []>} : vector<16x128xbf16>, vector<128x128xbf16>, vector<16x128xf32> -> vector<16x128xf32>
    %c0_3 = arith.constant 0 : index
    %c0_4 = arith.constant 0 : index
    %3 = vector.load %arg4[%c0_3, %c0_4] : memref<1x128xf32, #tpu.memory_space<vmem>>, vector<1x128xf32>
    %4 = vector.broadcast %3 : vector<1x128xf32> to vector<16x128xf32>
    %5 = arith.addf %2, %4 : vector<16x128xf32>
    %c0_5 = arith.constant 0 : index
    %c0_6 = arith.constant 0 : index
    %6 = vector.load %arg5[%c0_5, %c0_6] : memref<16x128xbf16, #tpu.memory_space<vmem>>, vector<16x128xbf16>
    %7 = arith.extf %6 : vector<16x128xbf16> to vector<16x128xf32>
    %8 = arith.addf %5, %7 : vector<16x128xf32>
    %cst_7 = arith.constant 0.000000e+00 : f32
    %9 = vector.broadcast %cst_7 : f32 to vector<16x128xf32>
    %10 = arith.maximumf %8, %9 : vector<16x128xf32>
    %11 = arith.truncf %10 : vector<16x128xf32> to vector<16x128xbf16>
    %c0_8 = arith.constant 0 : index
    %c0_9 = arith.constant 0 : index
    %12 = vector.load %arg6[%c0_8, %c0_9] : memref<16x128xbf16, #tpu.memory_space<vmem>>, vector<16x128xbf16>
    tpu.vector_store %arg6[%c0_8, %c0_9], %11 {strides = array<i32>} : memref<16x128xbf16, #tpu.memory_space<vmem>>, vector<16x128xbf16>,
    return
  }
  func.func @transform_0(%arg0: i32, %arg1: i32) -> (i32, i32) {
    %c0_i32 = arith.constant 0 : i32
    %c0_i32_0 = arith.constant 0 : i32
    return %arg0, %c0_i32 : i32, i32
  }
  func.func @transform_1(%arg0: i32, %arg1: i32) -> (i32, i32) {
    %c0_i32 = arith.constant 0 : i32
    %c0_i32_0 = arith.constant 0 : i32
    return %c0_i32, %arg1 : i32, i32
  }
  func.func @transform_2(%arg0: i32, %arg1: i32) -> (i32, i32) {
    %c0_i32 = arith.constant 0 : i32
    %c0_i32_0 = arith.constant 0 : i32
    return %c0_i32, %arg1 : i32, i32
  }
  func.func @transform_3(%arg0: i32, %arg1: i32) -> (i32, i32) {
    %c0_i32 = arith.constant 0 : i32
    return %arg0, %arg1 : i32, i32
  }
  func.func @transform_4(%arg0: i32, %arg1: i32) -> (i32, i32) {
    %c0_i32 = arith.constant 0 : i32
    return %arg0, %arg1 : i32, i32
  }
}

module attributes {stable_mosaic.version = 11 : i64} {
  func.func @_gemm_1k_kernel(%arg0: i32, %arg1: i32, %arg2: memref<16x128xbf16, #tpu.memory_space<vmem>>, %arg3: memref<128x128xbf16, #tpu.memory_space<vmem>>, %arg4: memref<1x128xf32, #tpu.memory_space<vmem>>, %arg5: memref<16x128xbf16, #tpu.memory_space<vmem>>) attributes {dimension_semantics = [#tpu.dimension_semantics<parallel>, #tpu.dimension_semantics<parallel>], iteration_bounds = array<i64: 1, 1>, scalar_prefetch = 0 : i64, scratch_operands = 0 : i64, tpu.core_type = #tpu.core_type<tc>, window_params = [{transform_indices = @transform_0, window_bounds = array<i64: 16, 128>}, {transform_indices = @transform_1, window_bounds = array<i64: 128, 128>}, {transform_indices = @transform_2, window_bounds = array<i64: 1, 128>}, {transform_indices = @transform_3, window_bounds = array<i64: 16, 128>}]} {
    %c0 = arith.constant 0 : index
    %c0_0 = arith.constant 0 : index
    %0 = vector.load %arg2[%c0, %c0_0] : memref<16x128xbf16, #tpu.memory_space<vmem>>, vector<16x128xbf16>
    %c0_1 = arith.constant 0 : index
    %c0_2 = arith.constant 0 : index
    %1 = vector.load %arg3[%c0_1, %c0_2] : memref<128x128xbf16, #tpu.memory_space<vmem>>, vector<128x128xbf16>
    %cst = arith.constant dense<0.000000e+00> : vector<16x128xf32>
    %2 = tpu.matmul %0, %1, %cst {dimension_numbers = #tpu.dot_dimension_numbers<[1], [0], [0], [1], [0, 0, 1, 1], [], []>} : vector<16x128xbf16>, vector<128x128xbf16>, vector<16x128xf32> -> vector<16x128xf32>
    %c0_3 = arith.constant 0 : index
    %c0_4 = arith.constant 0 : index
    %3 = vector.load %arg4[%c0_3, %c0_4] : memref<1x128xf32, #tpu.memory_space<vmem>>, vector<1x128xf32>
    %4 = vector.broadcast %3 : vector<1x128xf32> to vector<16x128xf32>
    %5 = arith.addf %2, %4 : vector<16x128xf32>
    %cst_5 = arith.constant 0.000000e+00 : f32
    %6 = vector.broadcast %cst_5 : f32 to vector<16x128xf32>
    %7 = arith.maximumf %5, %6 : vector<16x128xf32>
    %8 = arith.truncf %7 : vector<16x128xf32> to vector<16x128xbf16>
    %c0_6 = arith.constant 0 : index
    %c0_7 = arith.constant 0 : index
    %9 = vector.load %arg5[%c0_6, %c0_7] : memref<16x128xbf16, #tpu.memory_space<vmem>>, vector<16x128xbf16>
    tpu.vector_store %arg5[%c0_6, %c0_7], %8 {strides = array<i32>} : memref<16x128xbf16, #tpu.memory_space<vmem>>, vector<16x128xbf16>,
    return
  }
  func.func @transform_0(%arg0: i32, %arg1: i32) -> (i32, i32) {
    %c0_i32 = arith.constant 0 : i32
    %c0_i32_0 = arith.constant 0 : i32
    return %arg0, %c0_i32 : i32, i32
  }
  func.func @transform_1(%arg0: i32, %arg1: i32) -> (i32, i32) {
    %c0_i32 = arith.constant 0 : i32
    %c0_i32_0 = arith.constant 0 : i32
    return %c0_i32, %arg1 : i32, i32
  }
  func.func @transform_2(%arg0: i32, %arg1: i32) -> (i32, i32) {
    %c0_i32 = arith.constant 0 : i32
    %c0_i32_0 = arith.constant 0 : i32
    return %c0_i32, %arg1 : i32, i32
  }
  func.func @transform_3(%arg0: i32, %arg1: i32) -> (i32, i32) {
    %c0_i32 = arith.constant 0 : i32
    return %arg0, %arg1 : i32, i32
  }
}

module attributes {stable_mosaic.version = 11 : i64} {
  func.func @_gemm_1k_kernel(%arg0: i32, %arg1: i32, %arg2: memref<16x128xbf16, #tpu.memory_space<vmem>>, %arg3: memref<128x128xbf16, #tpu.memory_space<vmem>>, %arg4: memref<1x128xf32, #tpu.memory_space<vmem>>, %arg5: memref<16x128xbf16, #tpu.memory_space<vmem>>) attributes {dimension_semantics = [#tpu.dimension_semantics<parallel>, #tpu.dimension_semantics<parallel>], iteration_bounds = array<i64: 1, 1>, scalar_prefetch = 0 : i64, scratch_operands = 0 : i64, tpu.core_type = #tpu.core_type<tc>, window_params = [{transform_indices = @transform_0, window_bounds = array<i64: 16, 128>}, {transform_indices = @transform_1, window_bounds = array<i64: 128, 128>}, {transform_indices = @transform_2, window_bounds = array<i64: 1, 128>}, {transform_indices = @transform_3, window_bounds = array<i64: 16, 128>}]} {
    %c0 = arith.constant 0 : index
    %c0_0 = arith.constant 0 : index
    %0 = vector.load %arg2[%c0, %c0_0] : memref<16x128xbf16, #tpu.memory_space<vmem>>, vector<16x128xbf16>
    %c0_1 = arith.constant 0 : index
    %c0_2 = arith.constant 0 : index
    %1 = vector.load %arg3[%c0_1, %c0_2] : memref<128x128xbf16, #tpu.memory_space<vmem>>, vector<128x128xbf16>
    %cst = arith.constant dense<0.000000e+00> : vector<16x128xf32>
    %2 = tpu.matmul %0, %1, %cst {dimension_numbers = #tpu.dot_dimension_numbers<[1], [0], [0], [1], [0, 0, 1, 1], [], []>} : vector<16x128xbf16>, vector<128x128xbf16>, vector<16x128xf32> -> vector<16x128xf32>
    %c0_3 = arith.constant 0 : index
    %c0_4 = arith.constant 0 : index
    %3 = vector.load %arg4[%c0_3, %c0_4] : memref<1x128xf32, #tpu.memory_space<vmem>>, vector<1x128xf32>
    %4 = vector.broadcast %3 : vector<1x128xf32> to vector<16x128xf32>
    %5 = arith.addf %2, %4 : vector<16x128xf32>
    %cst_5 = arith.constant 0.000000e+00 : f32
    %6 = vector.broadcast %cst_5 : f32 to vector<16x128xf32>
    %7 = arith.maximumf %5, %6 : vector<16x128xf32>
    %8 = arith.truncf %7 : vector<16x128xf32> to vector<16x128xbf16>
    %c0_6 = arith.constant 0 : index
    %c0_7 = arith.constant 0 : index
    %9 = vector.load %arg5[%c0_6, %c0_7] : memref<16x128xbf16, #tpu.memory_space<vmem>>, vector<16x128xbf16>
    tpu.vector_store %arg5[%c0_6, %c0_7], %8 {strides = array<i32>} : memref<16x128xbf16, #tpu.memory_space<vmem>>, vector<16x128xbf16>,
    return
  }
  func.func @transform_0(%arg0: i32, %arg1: i32) -> (i32, i32) {
    %c0_i32 = arith.constant 0 : i32
    %c0_i32_0 = arith.constant 0 : i32
    return %arg0, %c0_i32 : i32, i32
  }
  func.func @transform_1(%arg0: i32, %arg1: i32) -> (i32, i32) {
    %c0_i32 = arith.constant 0 : i32
    %c0_i32_0 = arith.constant 0 : i32
    return %c0_i32, %arg1 : i32, i32
  }
  func.func @transform_2(%arg0: i32, %arg1: i32) -> (i32, i32) {
    %c0_i32 = arith.constant 0 : i32
    %c0_i32_0 = arith.constant 0 : i32
    return %c0_i32, %arg1 : i32, i32
  }
  func.func @transform_3(%arg0: i32, %arg1: i32) -> (i32, i32) {
    %c0_i32 = arith.constant 0 : i32
    return %arg0, %arg1 : i32, i32
  }
}

module attributes {stable_mosaic.version = 11 : i64} {
  func.func @_gemm_1k_kernel(%arg0: i32, %arg1: i32, %arg2: memref<16x128xbf16, #tpu.memory_space<vmem>>, %arg3: memref<128x128xbf16, #tpu.memory_space<vmem>>, %arg4: memref<1x128xf32, #tpu.memory_space<vmem>>, %arg5: memref<16x128xbf16, #tpu.memory_space<vmem>>, %arg6: memref<16x128xbf16, #tpu.memory_space<vmem>>) attributes {dimension_semantics = [#tpu.dimension_semantics<parallel>, #tpu.dimension_semantics<parallel>], iteration_bounds = array<i64: 1, 1>, scalar_prefetch = 0 : i64, scratch_operands = 0 : i64, tpu.core_type = #tpu.core_type<tc>, window_params = [{transform_indices = @transform_0, window_bounds = array<i64: 16, 128>}, {transform_indices = @transform_1, window_bounds = array<i64: 128, 128>}, {transform_indices = @transform_2, window_bounds = array<i64: 1, 128>}, {transform_indices = @transform_3, window_bounds = array<i64: 16, 128>}, {transform_indices = @transform_4, window_bounds = array<i64: 16, 128>}]} {
    %c0 = arith.constant 0 : index
    %c0_0 = arith.constant 0 : index
    %0 = vector.load %arg2[%c0, %c0_0] : memref<16x128xbf16, #tpu.memory_space<vmem>>, vector<16x128xbf16>
    %c0_1 = arith.constant 0 : index
    %c0_2 = arith.constant 0 : index
    %1 = vector.load %arg3[%c0_1, %c0_2] : memref<128x128xbf16, #tpu.memory_space<vmem>>, vector<128x128xbf16>
    %cst = arith.constant dense<0.000000e+00> : vector<16x128xf32>
    %2 = tpu.matmul %0, %1, %cst {dimension_numbers = #tpu.dot_dimension_numbers<[1], [0], [0], [1], [0, 0, 1, 1], [], []>} : vector<16x128xbf16>, vector<128x128xbf16>, vector<16x128xf32> -> vector<16x128xf32>
    %c0_3 = arith.constant 0 : index
    %c0_4 = arith.constant 0 : index
    %3 = vector.load %arg4[%c0_3, %c0_4] : memref<1x128xf32, #tpu.memory_space<vmem>>, vector<1x128xf32>
    %4 = vector.broadcast %3 : vector<1x128xf32> to vector<16x128xf32>
    %5 = arith.addf %2, %4 : vector<16x128xf32>
    %c0_5 = arith.constant 0 : index
    %c0_6 = arith.constant 0 : index
    %6 = vector.load %arg5[%c0_5, %c0_6] : memref<16x128xbf16, #tpu.memory_space<vmem>>, vector<16x128xbf16>
    %7 = arith.extf %6 : vector<16x128xbf16> to vector<16x128xf32>
    %8 = arith.addf %5, %7 : vector<16x128xf32>
    %cst_7 = arith.constant 0.000000e+00 : f32
    %9 = vector.broadcast %cst_7 : f32 to vector<16x128xf32>
    %10 = arith.maximumf %8, %9 : vector<16x128xf32>
    %11 = arith.truncf %10 : vector<16x128xf32> to vector<16x128xbf16>
    %c0_8 = arith.constant 0 : index
    %c0_9 = arith.constant 0 : index
    %12 = vector.load %arg6[%c0_8, %c0_9] : memref<16x128xbf16, #tpu.memory_space<vmem>>, vector<16x128xbf16>
    tpu.vector_store %arg6[%c0_8, %c0_9], %11 {strides = array<i32>} : memref<16x128xbf16, #tpu.memory_space<vmem>>, vector<16x128xbf16>,
    return
  }
  func.func @transform_0(%arg0: i32, %arg1: i32) -> (i32, i32) {
    %c0_i32 = arith.constant 0 : i32
    %c0_i32_0 = arith.constant 0 : i32
    return %arg0, %c0_i32 : i32, i32
  }
  func.func @transform_1(%arg0: i32, %arg1: i32) -> (i32, i32) {
    %c0_i32 = arith.constant 0 : i32
    %c0_i32_0 = arith.constant 0 : i32
    return %c0_i32, %arg1 : i32, i32
  }
  func.func @transform_2(%arg0: i32, %arg1: i32) -> (i32, i32) {
    %c0_i32 = arith.constant 0 : i32
    %c0_i32_0 = arith.constant 0 : i32
    return %c0_i32, %arg1 : i32, i32
  }
  func.func @transform_3(%arg0: i32, %arg1: i32) -> (i32, i32) {
    %c0_i32 = arith.constant 0 : i32
    return %arg0, %arg1 : i32, i32
  }
  func.func @transform_4(%arg0: i32, %arg1: i32) -> (i32, i32) {
    %c0_i32 = arith.constant 0 : i32
    return %arg0, %arg1 : i32, i32
  }
}

module attributes {stable_mosaic.version = 11 : i64} {
  func.func @_gemm_1k_kernel(%arg0: i32, %arg1: i32, %arg2: memref<16x640xbf16, #tpu.memory_space<vmem>>, %arg3: memref<640x128xbf16, #tpu.memory_space<vmem>>, %arg4: memref<1x128xf32, #tpu.memory_space<vmem>>, %arg5: memref<16x128xbf16, #tpu.memory_space<vmem>>) attributes {dimension_semantics = [#tpu.dimension_semantics<parallel>, #tpu.dimension_semantics<parallel>], iteration_bounds = array<i64: 1, 1>, scalar_prefetch = 0 : i64, scratch_operands = 0 : i64, tpu.core_type = #tpu.core_type<tc>, window_params = [{transform_indices = @transform_0, window_bounds = array<i64: 16, 640>}, {transform_indices = @transform_1, window_bounds = array<i64: 640, 128>}, {transform_indices = @transform_2, window_bounds = array<i64: 1, 128>}, {transform_indices = @transform_3, window_bounds = array<i64: 16, 128>}]} {
    %c0 = arith.constant 0 : index
    %c0_0 = arith.constant 0 : index
    %0 = vector.load %arg2[%c0, %c0_0] : memref<16x640xbf16, #tpu.memory_space<vmem>>, vector<16x640xbf16>
    %c0_1 = arith.constant 0 : index
    %c0_2 = arith.constant 0 : index
    %1 = vector.load %arg3[%c0_1, %c0_2] : memref<640x128xbf16, #tpu.memory_space<vmem>>, vector<640x128xbf16>
    %cst = arith.constant dense<0.000000e+00> : vector<16x128xf32>
    %2 = tpu.matmul %0, %1, %cst {dimension_numbers = #tpu.dot_dimension_numbers<[1], [0], [0], [1], [0, 0, 1, 1], [], []>} : vector<16x640xbf16>, vector<640x128xbf16>, vector<16x128xf32> -> vector<16x128xf32>
    %c0_3 = arith.constant 0 : index
    %c0_4 = arith.constant 0 : index
    %3 = vector.load %arg4[%c0_3, %c0_4] : memref<1x128xf32, #tpu.memory_space<vmem>>, vector<1x128xf32>
    %4 = vector.broadcast %3 : vector<1x128xf32> to vector<16x128xf32>
    %5 = arith.addf %2, %4 : vector<16x128xf32>
    %cst_5 = arith.constant 0.000000e+00 : f32
    %6 = vector.broadcast %cst_5 : f32 to vector<16x128xf32>
    %7 = arith.maximumf %5, %6 : vector<16x128xf32>
    %8 = arith.truncf %7 : vector<16x128xf32> to vector<16x128xbf16>
    %c0_6 = arith.constant 0 : index
    %c0_7 = arith.constant 0 : index
    %9 = vector.load %arg5[%c0_6, %c0_7] : memref<16x128xbf16, #tpu.memory_space<vmem>>, vector<16x128xbf16>
    tpu.vector_store %arg5[%c0_6, %c0_7], %8 {strides = array<i32>} : memref<16x128xbf16, #tpu.memory_space<vmem>>, vector<16x128xbf16>,
    return
  }
  func.func @transform_0(%arg0: i32, %arg1: i32) -> (i32, i32) {
    %c0_i32 = arith.constant 0 : i32
    %c0_i32_0 = arith.constant 0 : i32
    return %arg0, %c0_i32 : i32, i32
  }
  func.func @transform_1(%arg0: i32, %arg1: i32) -> (i32, i32) {
    %c0_i32 = arith.constant 0 : i32
    %c0_i32_0 = arith.constant 0 : i32
    return %c0_i32, %arg1 : i32, i32
  }
  func.func @transform_2(%arg0: i32, %arg1: i32) -> (i32, i32) {
    %c0_i32 = arith.constant 0 : i32
    %c0_i32_0 = arith.constant 0 : i32
    return %c0_i32, %arg1 : i32, i32
  }
  func.func @transform_3(%arg0: i32, %arg1: i32) -> (i32, i32) {
    %c0_i32 = arith.constant 0 : i32
    return %arg0, %arg1 : i32, i32
  }
}

module attributes {stable_mosaic.version = 11 : i64} {
  func.func @_gemm_1k_kernel(%arg0: i32, %arg1: i32, %arg2: memref<16x128xbf16, #tpu.memory_space<vmem>>, %arg3: memref<128x256xbf16, #tpu.memory_space<vmem>>, %arg4: memref<1x256xf32, #tpu.memory_space<vmem>>, %arg5: memref<16x256xbf16, #tpu.memory_space<vmem>>) attributes {dimension_semantics = [#tpu.dimension_semantics<parallel>, #tpu.dimension_semantics<parallel>], iteration_bounds = array<i64: 1, 1>, scalar_prefetch = 0 : i64, scratch_operands = 0 : i64, tpu.core_type = #tpu.core_type<tc>, window_params = [{transform_indices = @transform_0, window_bounds = array<i64: 16, 128>}, {transform_indices = @transform_1, window_bounds = array<i64: 128, 256>}, {transform_indices = @transform_2, window_bounds = array<i64: 1, 256>}, {transform_indices = @transform_3, window_bounds = array<i64: 16, 256>}]} {
    %c0 = arith.constant 0 : index
    %c0_0 = arith.constant 0 : index
    %0 = vector.load %arg2[%c0, %c0_0] : memref<16x128xbf16, #tpu.memory_space<vmem>>, vector<16x128xbf16>
    %c0_1 = arith.constant 0 : index
    %c0_2 = arith.constant 0 : index
    %1 = vector.load %arg3[%c0_1, %c0_2] : memref<128x256xbf16, #tpu.memory_space<vmem>>, vector<128x256xbf16>
    %cst = arith.constant dense<0.000000e+00> : vector<16x256xf32>
    %2 = tpu.matmul %0, %1, %cst {dimension_numbers = #tpu.dot_dimension_numbers<[1], [0], [0], [1], [0, 0, 1, 1], [], []>} : vector<16x128xbf16>, vector<128x256xbf16>, vector<16x256xf32> -> vector<16x256xf32>
    %c0_3 = arith.constant 0 : index
    %c0_4 = arith.constant 0 : index
    %3 = vector.load %arg4[%c0_3, %c0_4] : memref<1x256xf32, #tpu.memory_space<vmem>>, vector<1x256xf32>
    %4 = vector.broadcast %3 : vector<1x256xf32> to vector<16x256xf32>
    %5 = arith.addf %2, %4 : vector<16x256xf32>
    %6 = arith.truncf %5 : vector<16x256xf32> to vector<16x256xbf16>
    %c0_5 = arith.constant 0 : index
    %c0_6 = arith.constant 0 : index
    %7 = vector.load %arg5[%c0_5, %c0_6] : memref<16x256xbf16, #tpu.memory_space<vmem>>, vector<16x256xbf16>
    tpu.vector_store %arg5[%c0_5, %c0_6], %6 {strides = array<i32>} : memref<16x256xbf16, #tpu.memory_space<vmem>>, vector<16x256xbf16>,
    return
  }
  func.func @transform_0(%arg0: i32, %arg1: i32) -> (i32, i32) {
    %c0_i32 = arith.constant 0 : i32
    %c0_i32_0 = arith.constant 0 : i32
    return %arg0, %c0_i32 : i32, i32
  }
  func.func @transform_1(%arg0: i32, %arg1: i32) -> (i32, i32) {
    %c0_i32 = arith.constant 0 : i32
    %c0_i32_0 = arith.constant 0 : i32
    return %c0_i32, %arg1 : i32, i32
  }
  func.func @transform_2(%arg0: i32, %arg1: i32) -> (i32, i32) {
    %c0_i32 = arith.constant 0 : i32
    %c0_i32_0 = arith.constant 0 : i32
    return %c0_i32, %arg1 : i32, i32
  }
  func.func @transform_3(%arg0: i32, %arg1: i32) -> (i32, i32) {
    %c0_i32 = arith.constant 0 : i32
    return %arg0, %arg1 : i32, i32
  }
}

module attributes {stable_mosaic.version = 11 : i64} {
  func.func @_gemm_1k_kernel(%arg0: i32, %arg1: i32, %arg2: memref<16x128xbf16, #tpu.memory_space<vmem>>, %arg3: memref<128x256xbf16, #tpu.memory_space<vmem>>, %arg4: memref<1x256xf32, #tpu.memory_space<vmem>>, %arg5: memref<16x256xbf16, #tpu.memory_space<vmem>>, %arg6: memref<16x256xbf16, #tpu.memory_space<vmem>>) attributes {dimension_semantics = [#tpu.dimension_semantics<parallel>, #tpu.dimension_semantics<parallel>], iteration_bounds = array<i64: 1, 1>, scalar_prefetch = 0 : i64, scratch_operands = 0 : i64, tpu.core_type = #tpu.core_type<tc>, window_params = [{transform_indices = @transform_0, window_bounds = array<i64: 16, 128>}, {transform_indices = @transform_1, window_bounds = array<i64: 128, 256>}, {transform_indices = @transform_2, window_bounds = array<i64: 1, 256>}, {transform_indices = @transform_3, window_bounds = array<i64: 16, 256>}, {transform_indices = @transform_4, window_bounds = array<i64: 16, 256>}]} {
    %c0 = arith.constant 0 : index
    %c0_0 = arith.constant 0 : index
    %0 = vector.load %arg2[%c0, %c0_0] : memref<16x128xbf16, #tpu.memory_space<vmem>>, vector<16x128xbf16>
    %c0_1 = arith.constant 0 : index
    %c0_2 = arith.constant 0 : index
    %1 = vector.load %arg3[%c0_1, %c0_2] : memref<128x256xbf16, #tpu.memory_space<vmem>>, vector<128x256xbf16>
    %cst = arith.constant dense<0.000000e+00> : vector<16x256xf32>
    %2 = tpu.matmul %0, %1, %cst {dimension_numbers = #tpu.dot_dimension_numbers<[1], [0], [0], [1], [0, 0, 1, 1], [], []>} : vector<16x128xbf16>, vector<128x256xbf16>, vector<16x256xf32> -> vector<16x256xf32>
    %c0_3 = arith.constant 0 : index
    %c0_4 = arith.constant 0 : index
    %3 = vector.load %arg4[%c0_3, %c0_4] : memref<1x256xf32, #tpu.memory_space<vmem>>, vector<1x256xf32>
    %4 = vector.broadcast %3 : vector<1x256xf32> to vector<16x256xf32>
    %5 = arith.addf %2, %4 : vector<16x256xf32>
    %c0_5 = arith.constant 0 : index
    %c0_6 = arith.constant 0 : index
    %6 = vector.load %arg5[%c0_5, %c0_6] : memref<16x256xbf16, #tpu.memory_space<vmem>>, vector<16x256xbf16>
    %7 = arith.extf %6 : vector<16x256xbf16> to vector<16x256xf32>
    %8 = arith.addf %5, %7 : vector<16x256xf32>
    %cst_7 = arith.constant 0.000000e+00 : f32
    %9 = vector.broadcast %cst_7 : f32 to vector<16x256xf32>
    %10 = arith.maximumf %8, %9 : vector<16x256xf32>
    %11 = arith.truncf %10 : vector<16x256xf32> to vector<16x256xbf16>
    %c0_8 = arith.constant 0 : index
    %c0_9 = arith.constant 0 : index
    %12 = vector.load %arg6[%c0_8, %c0_9] : memref<16x256xbf16, #tpu.memory_space<vmem>>, vector<16x256xbf16>
    tpu.vector_store %arg6[%c0_8, %c0_9], %11 {strides = array<i32>} : memref<16x256xbf16, #tpu.memory_space<vmem>>, vector<16x256xbf16>,
    return
  }
  func.func @transform_0(%arg0: i32, %arg1: i32) -> (i32, i32) {
    %c0_i32 = arith.constant 0 : i32
    %c0_i32_0 = arith.constant 0 : i32
    return %arg0, %c0_i32 : i32, i32
  }
  func.func @transform_1(%arg0: i32, %arg1: i32) -> (i32, i32) {
    %c0_i32 = arith.constant 0 : i32
    %c0_i32_0 = arith.constant 0 : i32
    return %c0_i32, %arg1 : i32, i32
  }
  func.func @transform_2(%arg0: i32, %arg1: i32) -> (i32, i32) {
    %c0_i32 = arith.constant 0 : i32
    %c0_i32_0 = arith.constant 0 : i32
    return %c0_i32, %arg1 : i32, i32
  }
  func.func @transform_3(%arg0: i32, %arg1: i32) -> (i32, i32) {
    %c0_i32 = arith.constant 0 : i32
    return %arg0, %arg1 : i32, i32
  }
  func.func @transform_4(%arg0: i32, %arg1: i32) -> (i32, i32) {
    %c0_i32 = arith.constant 0 : i32
    return %arg0, %arg1 : i32, i32
  }
}

module attributes {stable_mosaic.version = 11 : i64} {
  func.func @_gemm_1k_kernel(%arg0: i32, %arg1: i32, %arg2: memref<16x256xbf16, #tpu.memory_space<vmem>>, %arg3: memref<256x128xbf16, #tpu.memory_space<vmem>>, %arg4: memref<1x128xf32, #tpu.memory_space<vmem>>, %arg5: memref<16x128xbf16, #tpu.memory_space<vmem>>) attributes {dimension_semantics = [#tpu.dimension_semantics<parallel>, #tpu.dimension_semantics<parallel>], iteration_bounds = array<i64: 1, 1>, scalar_prefetch = 0 : i64, scratch_operands = 0 : i64, tpu.core_type = #tpu.core_type<tc>, window_params = [{transform_indices = @transform_0, window_bounds = array<i64: 16, 256>}, {transform_indices = @transform_1, window_bounds = array<i64: 256, 128>}, {transform_indices = @transform_2, window_bounds = array<i64: 1, 128>}, {transform_indices = @transform_3, window_bounds = array<i64: 16, 128>}]} {
    %c0 = arith.constant 0 : index
    %c0_0 = arith.constant 0 : index
    %0 = vector.load %arg2[%c0, %c0_0] : memref<16x256xbf16, #tpu.memory_space<vmem>>, vector<16x256xbf16>
    %c0_1 = arith.constant 0 : index
    %c0_2 = arith.constant 0 : index
    %1 = vector.load %arg3[%c0_1, %c0_2] : memref<256x128xbf16, #tpu.memory_space<vmem>>, vector<256x128xbf16>
    %cst = arith.constant dense<0.000000e+00> : vector<16x128xf32>
    %2 = tpu.matmul %0, %1, %cst {dimension_numbers = #tpu.dot_dimension_numbers<[1], [0], [0], [1], [0, 0, 1, 1], [], []>} : vector<16x256xbf16>, vector<256x128xbf16>, vector<16x128xf32> -> vector<16x128xf32>
    %c0_3 = arith.constant 0 : index
    %c0_4 = arith.constant 0 : index
    %3 = vector.load %arg4[%c0_3, %c0_4] : memref<1x128xf32, #tpu.memory_space<vmem>>, vector<1x128xf32>
    %4 = vector.broadcast %3 : vector<1x128xf32> to vector<16x128xf32>
    %5 = arith.addf %2, %4 : vector<16x128xf32>
    %cst_5 = arith.constant 0.000000e+00 : f32
    %6 = vector.broadcast %cst_5 : f32 to vector<16x128xf32>
    %7 = arith.maximumf %5, %6 : vector<16x128xf32>
    %8 = arith.truncf %7 : vector<16x128xf32> to vector<16x128xbf16>
    %c0_6 = arith.constant 0 : index
    %c0_7 = arith.constant 0 : index
    %9 = vector.load %arg5[%c0_6, %c0_7] : memref<16x128xbf16, #tpu.memory_space<vmem>>, vector<16x128xbf16>
    tpu.vector_store %arg5[%c0_6, %c0_7], %8 {strides = array<i32>} : memref<16x128xbf16, #tpu.memory_space<vmem>>, vector<16x128xbf16>,
    return
  }
  func.func @transform_0(%arg0: i32, %arg1: i32) -> (i32, i32) {
    %c0_i32 = arith.constant 0 : i32
    %c0_i32_0 = arith.constant 0 : i32
    return %arg0, %c0_i32 : i32, i32
  }
  func.func @transform_1(%arg0: i32, %arg1: i32) -> (i32, i32) {
    %c0_i32 = arith.constant 0 : i32
    %c0_i32_0 = arith.constant 0 : i32
    return %c0_i32, %arg1 : i32, i32
  }
  func.func @transform_2(%arg0: i32, %arg1: i32) -> (i32, i32) {
    %c0_i32 = arith.constant 0 : i32
    %c0_i32_0 = arith.constant 0 : i32
    return %c0_i32, %arg1 : i32, i32
  }
  func.func @transform_3(%arg0: i32, %arg1: i32) -> (i32, i32) {
    %c0_i32 = arith.constant 0 : i32
    return %arg0, %arg1 : i32, i32
  }
}

module attributes {stable_mosaic.version = 11 : i64} {
  func.func @_gemm_1k_kernel(%arg0: i32, %arg1: i32, %arg2: memref<16x128xbf16, #tpu.memory_space<vmem>>, %arg3: memref<128x256xbf16, #tpu.memory_space<vmem>>, %arg4: memref<1x256xf32, #tpu.memory_space<vmem>>, %arg5: memref<16x256xbf16, #tpu.memory_space<vmem>>, %arg6: memref<16x256xbf16, #tpu.memory_space<vmem>>) attributes {dimension_semantics = [#tpu.dimension_semantics<parallel>, #tpu.dimension_semantics<parallel>], iteration_bounds = array<i64: 1, 1>, scalar_prefetch = 0 : i64, scratch_operands = 0 : i64, tpu.core_type = #tpu.core_type<tc>, window_params = [{transform_indices = @transform_0, window_bounds = array<i64: 16, 128>}, {transform_indices = @transform_1, window_bounds = array<i64: 128, 256>}, {transform_indices = @transform_2, window_bounds = array<i64: 1, 256>}, {transform_indices = @transform_3, window_bounds = array<i64: 16, 256>}, {transform_indices = @transform_4, window_bounds = array<i64: 16, 256>}]} {
    %c0 = arith.constant 0 : index
    %c0_0 = arith.constant 0 : index
    %0 = vector.load %arg2[%c0, %c0_0] : memref<16x128xbf16, #tpu.memory_space<vmem>>, vector<16x128xbf16>
    %c0_1 = arith.constant 0 : index
    %c0_2 = arith.constant 0 : index
    %1 = vector.load %arg3[%c0_1, %c0_2] : memref<128x256xbf16, #tpu.memory_space<vmem>>, vector<128x256xbf16>
    %cst = arith.constant dense<0.000000e+00> : vector<16x256xf32>
    %2 = tpu.matmul %0, %1, %cst {dimension_numbers = #tpu.dot_dimension_numbers<[1], [0], [0], [1], [0, 0, 1, 1], [], []>} : vector<16x128xbf16>, vector<128x256xbf16>, vector<16x256xf32> -> vector<16x256xf32>
    %c0_3 = arith.constant 0 : index
    %c0_4 = arith.constant 0 : index
    %3 = vector.load %arg4[%c0_3, %c0_4] : memref<1x256xf32, #tpu.memory_space<vmem>>, vector<1x256xf32>
    %4 = vector.broadcast %3 : vector<1x256xf32> to vector<16x256xf32>
    %5 = arith.addf %2, %4 : vector<16x256xf32>
    %c0_5 = arith.constant 0 : index
    %c0_6 = arith.constant 0 : index
    %6 = vector.load %arg5[%c0_5, %c0_6] : memref<16x256xbf16, #tpu.memory_space<vmem>>, vector<16x256xbf16>
    %7 = arith.extf %6 : vector<16x256xbf16> to vector<16x256xf32>
    %8 = arith.addf %5, %7 : vector<16x256xf32>
    %cst_7 = arith.constant 0.000000e+00 : f32
    %9 = vector.broadcast %cst_7 : f32 to vector<16x256xf32>
    %10 = arith.maximumf %8, %9 : vector<16x256xf32>
    %11 = arith.truncf %10 : vector<16x256xf32> to vector<16x256xbf16>
    %c0_8 = arith.constant 0 : index
    %c0_9 = arith.constant 0 : index
    %12 = vector.load %arg6[%c0_8, %c0_9] : memref<16x256xbf16, #tpu.memory_space<vmem>>, vector<16x256xbf16>
    tpu.vector_store %arg6[%c0_8, %c0_9], %11 {strides = array<i32>} : memref<16x256xbf16, #tpu.memory_space<vmem>>, vector<16x256xbf16>,
    return
  }
  func.func @transform_0(%arg0: i32, %arg1: i32) -> (i32, i32) {
    %c0_i32 = arith.constant 0 : i32
    %c0_i32_0 = arith.constant 0 : i32
    return %arg0, %c0_i32 : i32, i32
  }
  func.func @transform_1(%arg0: i32, %arg1: i32) -> (i32, i32) {
    %c0_i32 = arith.constant 0 : i32
    %c0_i32_0 = arith.constant 0 : i32
    return %c0_i32, %arg1 : i32, i32
  }
  func.func @transform_2(%arg0: i32, %arg1: i32) -> (i32, i32) {
    %c0_i32 = arith.constant 0 : i32
    %c0_i32_0 = arith.constant 0 : i32
    return %c0_i32, %arg1 : i32, i32
  }
  func.func @transform_3(%arg0: i32, %arg1: i32) -> (i32, i32) {
    %c0_i32 = arith.constant 0 : i32
    return %arg0, %arg1 : i32, i32
  }
  func.func @transform_4(%arg0: i32, %arg1: i32) -> (i32, i32) {
    %c0_i32 = arith.constant 0 : i32
    return %arg0, %arg1 : i32, i32
  }
}

module attributes {stable_mosaic.version = 11 : i64} {
  func.func @_gemm_1k_kernel(%arg0: i32, %arg1: i32, %arg2: memref<16x256xbf16, #tpu.memory_space<vmem>>, %arg3: memref<256x128xbf16, #tpu.memory_space<vmem>>, %arg4: memref<1x128xf32, #tpu.memory_space<vmem>>, %arg5: memref<16x128xbf16, #tpu.memory_space<vmem>>) attributes {dimension_semantics = [#tpu.dimension_semantics<parallel>, #tpu.dimension_semantics<parallel>], iteration_bounds = array<i64: 1, 1>, scalar_prefetch = 0 : i64, scratch_operands = 0 : i64, tpu.core_type = #tpu.core_type<tc>, window_params = [{transform_indices = @transform_0, window_bounds = array<i64: 16, 256>}, {transform_indices = @transform_1, window_bounds = array<i64: 256, 128>}, {transform_indices = @transform_2, window_bounds = array<i64: 1, 128>}, {transform_indices = @transform_3, window_bounds = array<i64: 16, 128>}]} {
    %c0 = arith.constant 0 : index
    %c0_0 = arith.constant 0 : index
    %0 = vector.load %arg2[%c0, %c0_0] : memref<16x256xbf16, #tpu.memory_space<vmem>>, vector<16x256xbf16>
    %c0_1 = arith.constant 0 : index
    %c0_2 = arith.constant 0 : index
    %1 = vector.load %arg3[%c0_1, %c0_2] : memref<256x128xbf16, #tpu.memory_space<vmem>>, vector<256x128xbf16>
    %cst = arith.constant dense<0.000000e+00> : vector<16x128xf32>
    %2 = tpu.matmul %0, %1, %cst {dimension_numbers = #tpu.dot_dimension_numbers<[1], [0], [0], [1], [0, 0, 1, 1], [], []>} : vector<16x256xbf16>, vector<256x128xbf16>, vector<16x128xf32> -> vector<16x128xf32>
    %c0_3 = arith.constant 0 : index
    %c0_4 = arith.constant 0 : index
    %3 = vector.load %arg4[%c0_3, %c0_4] : memref<1x128xf32, #tpu.memory_space<vmem>>, vector<1x128xf32>
    %4 = vector.broadcast %3 : vector<1x128xf32> to vector<16x128xf32>
    %5 = arith.addf %2, %4 : vector<16x128xf32>
    %cst_5 = arith.constant 0.000000e+00 : f32
    %6 = vector.broadcast %cst_5 : f32 to vector<16x128xf32>
    %7 = arith.maximumf %5, %6 : vector<16x128xf32>
    %8 = arith.truncf %7 : vector<16x128xf32> to vector<16x128xbf16>
    %c0_6 = arith.constant 0 : index
    %c0_7 = arith.constant 0 : index
    %9 = vector.load %arg5[%c0_6, %c0_7] : memref<16x128xbf16, #tpu.memory_space<vmem>>, vector<16x128xbf16>
    tpu.vector_store %arg5[%c0_6, %c0_7], %8 {strides = array<i32>} : memref<16x128xbf16, #tpu.memory_space<vmem>>, vector<16x128xbf16>,
    return
  }
  func.func @transform_0(%arg0: i32, %arg1: i32) -> (i32, i32) {
    %c0_i32 = arith.constant 0 : i32
    %c0_i32_0 = arith.constant 0 : i32
    return %arg0, %c0_i32 : i32, i32
  }
  func.func @transform_1(%arg0: i32, %arg1: i32) -> (i32, i32) {
    %c0_i32 = arith.constant 0 : i32
    %c0_i32_0 = arith.constant 0 : i32
    return %c0_i32, %arg1 : i32, i32
  }
  func.func @transform_2(%arg0: i32, %arg1: i32) -> (i32, i32) {
    %c0_i32 = arith.constant 0 : i32
    %c0_i32_0 = arith.constant 0 : i32
    return %c0_i32, %arg1 : i32, i32
  }
  func.func @transform_3(%arg0: i32, %arg1: i32) -> (i32, i32) {
    %c0_i32 = arith.constant 0 : i32
    return %arg0, %arg1 : i32, i32
  }
}

module attributes {stable_mosaic.version = 11 : i64} {
  func.func @_head_kernel(%arg0: memref<8x1x256xbf16, #tpu.memory_space<vmem>>, %arg1: memref<256x128xbf16, #tpu.memory_space<vmem>>, %arg2: memref<1x128xf32, #tpu.memory_space<vmem>>, %arg3: memref<8x128xf32, #tpu.memory_space<vmem>>) attributes {dimension_semantics = [], scalar_prefetch = 0 : i64, scratch_operands = 0 : i64, tpu.core_type = #tpu.core_type<tc>} {
    %c0 = arith.constant 0 : index
    %c0_0 = arith.constant 0 : index
    %c0_1 = arith.constant 0 : index
    %0 = vector.load %arg0[%c0, %c0_0, %c0_1] : memref<8x1x256xbf16, #tpu.memory_space<vmem>>, vector<8x1x256xbf16>
    %1 = arith.extf %0 : vector<8x1x256xbf16> to vector<8x1x256xf32>
    %cst = arith.constant dense<0.000000e+00> : vector<8x256xf32>
    %2 = vector.multi_reduction <add>, %1, %cst [1] : vector<8x1x256xf32> to vector<8x256xf32>
    %cst_2 = arith.constant 1.000000e+00 : f32
    %3 = vector.broadcast %cst_2 : f32 to vector<8x256xf32>
    %4 = arith.divf %2, %3 : vector<8x256xf32>
    %5 = arith.truncf %4 : vector<8x256xf32> to vector<8x256xbf16>
    %c0_3 = arith.constant 0 : index
    %c0_4 = arith.constant 0 : index
    %6 = vector.load %arg1[%c0_3, %c0_4] : memref<256x128xbf16, #tpu.memory_space<vmem>>, vector<256x128xbf16>
    %cst_5 = arith.constant dense<0.000000e+00> : vector<8x128xf32>
    %7 = tpu.matmul %5, %6, %cst_5 {dimension_numbers = #tpu.dot_dimension_numbers<[1], [0], [0], [1], [0, 0, 1, 1], [], []>} : vector<8x256xbf16>, vector<256x128xbf16>, vector<8x128xf32> -> vector<8x128xf32>
    %c0_6 = arith.constant 0 : index
    %c0_7 = arith.constant 0 : index
    %8 = vector.load %arg2[%c0_6, %c0_7] : memref<1x128xf32, #tpu.memory_space<vmem>>, vector<1x128xf32>
    %9 = vector.broadcast %8 : vector<1x128xf32> to vector<8x128xf32>
    %10 = arith.addf %7, %9 : vector<8x128xf32>
    %c0_8 = arith.constant 0 : index
    %c0_9 = arith.constant 0 : index
    %11 = vector.load %arg3[%c0_8, %c0_9] : memref<8x128xf32, #tpu.memory_space<vmem>>, vector<8x128xf32>
    tpu.vector_store %arg3[%c0_8, %c0_9], %10 {strides = array<i32>} : memref<8x128xf32, #tpu.memory_space<vmem>>, vector<8x128xf32>,
    return
  }
}

</mosaic_0001>

<bundles_post_ra>
// kernel: resnet50_forward.58
= control target key start
LH: loop header
LB: loop body
LE: loop exit
PB: predicated region body
PF: predicated region fallthrough
CT: control target
= control target key end

     0   :  { %s669_s12 = smov 0   ;;  %s671_s13 = smov 0   ;;  %s739_s0 = inlined_call_operand.vmem [shape: bf16[128,128], index: 0, kind: input, shape index: {}]   ;;  %s740_s1 = inlined_call_operand.vmem [shape: bf16[128,128], index: 1, kind: input, shape index: {}]   ;;  %s741_s2 = inlined_call_operand.vmem [shape: f32[1,128], index: 2, kind: input, shape index: {}]   ;;  %s742_s3 = inlined_call_operand.vmem [shape: bf16[128,128], index: 3, kind: output, shape index: {}]  }
   0x1   :  { %s673_s14 = smov 0  }
   0x2 LB: > { %s25_s15 = sadd.s32 1, %s643_s13  ;;  %p486_p0 = scmp.ge.s32.totalorder %s647_s14, 1  ;;  %s647_s14 = sphi %s673_s14, %s13_s14   ;;  %s643_s13 = sphi %s671_s13, %s744_s13   ;;  %s639_s12 = sphi %s669_s12, %s743_s12  }
   0x3   : > { %p27_p1 = scmp.ge.s32.totalorder %s25_s15, 2  ;;  %p169_p2 = scmp.lt.s32.totalorder %s647_s14, 3 }
   0x5   : > { %s746_s15 = smov (%p27_p1, %s25_s15), 0  ;;  %p170_p3 = pnand %p486_p0, %p169_p2 }
   0x6   : > { %s487_s24 = sshll.u32 (!%p170_p3), %s639_s12, 3 }
   0x7   : > { %173 = sbr.rel (%p170_p3) target bundleno = 193 (0xc1), region = 32  ;;  %p204_p4 = scmp.lt.s32.totalorder (!%p170_p3), %s487_s24, 15 }
   0xc   : > { %v552_v0 = vld [vmem:[%s740_s1 + $0x38] sm:$0xff]  ;;  %v551_v1 = vld [vmem:[%s740_s1 + $0x30] sm:$0xff]  ;;  %v550_v2 = vld [vmem:[%s740_s1 + $0x28] sm:$0xff]  ;;  %s748_s24 = smov (!%p204_p4, %s487_s24), 15 }
   0xd   : > { %325 = vmatpush.bf16.msra.mxu0 %v552_v0  ;;  %576 = vmatpush.bf16.msra.mxu1 %v552_v0  ;;  %v549_v3 = vld [vmem:[%s740_s1 + $0x20] sm:$0xff]  ;;  %v548_v4 = vld [vmem:[%s740_s1 + $0x18] sm:$0xff]  ;;  %v547_v5 = vld [vmem:[%s740_s1 + $0x10] sm:$0xff]  ;;  %s488_s4 = sshll.u32 %s748_s24, 2 }
   0xe   : > { %577 = vmatpush.bf16.msra.mxu2 %v552_v0  ;;  %578 = vmatpush.bf16.msra.mxu3 %v552_v0  ;;  %v546_v6 = vld [vmem:[%s740_s1 + $0x8] sm:$0xff]  ;;  %v545_v7 = vld [vmem:[%s740_s1] sm:$0xff]  ;;  %s207_s9 = scalar_lea.vmem %s739_s0, %s488_s4  ;;  %s223_s17 = scalar_lea.vmem %s742_s3, %s488_s4 }
   0xf   : > { %v541_v8 = vld [vmem:[%s207_s9] sm:$0xff]  ;;  %v542_v9 = vld [vmem:[%s207_s9 + $0x8] sm:$0xff]  ;;  %v543_v10 = vld [vmem:[%s207_s9 + $0x10] sm:$0xff] }
  0x10   : > { %v544_v11 = vld [vmem:[%s207_s9 + $0x18] sm:$0xff]  ;;  %v624_v14 = vld [vmem:[%s741_s2] ss:$0 sm:$0xff] }
  0x11   : > { %326 = vmatpush.bf16.msra.mxu0 %v551_v1  ;;  %579 = vmatpush.bf16.msra.mxu1 %v551_v1 }
  0x12   : > { %580 = vmatpush.bf16.msra.mxu2 %v551_v1  ;;  %581 = vmatpush.bf16.msra.mxu3 %v551_v1 }
  0x15   : > { %327 = vmatpush.bf16.msra.mxu0 %v550_v2  ;;  %582 = vmatpush.bf16.msra.mxu1 %v550_v2 }
  0x16   : > { %583 = vmatpush.bf16.msra.mxu2 %v550_v2  ;;  %584 = vmatpush.bf16.msra.mxu3 %v550_v2 }
  0x19   : > { %328 = vmatpush.bf16.msra.mxu0 %v549_v3  ;;  %585 = vmatpush.bf16.msra.mxu1 %v549_v3 }
  0x1a   : > { %586 = vmatpush.bf16.msra.mxu2 %v549_v3  ;;  %587 = vmatpush.bf16.msra.mxu3 %v549_v3 }
  0x1d   : > { %329 = vmatpush.bf16.msra.mxu0 %v548_v4  ;;  %588 = vmatpush.bf16.msra.mxu1 %v548_v4 }
  0x1e   : > { %589 = vmatpush.bf16.msra.mxu2 %v548_v4  ;;  %590 = vmatpush.bf16.msra.mxu3 %v548_v4 }
  0x21   : > { %330 = vmatpush.bf16.msra.mxu0 %v547_v5  ;;  %591 = vmatpush.bf16.msra.mxu1 %v547_v5 }
  0x22   : > { %592 = vmatpush.bf16.msra.mxu2 %v547_v5  ;;  %593 = vmatpush.bf16.msra.mxu3 %v547_v5 }
  0x25   : > { %331 = vmatpush.bf16.msra.mxu0 %v546_v6  ;;  %594 = vmatpush.bf16.msra.mxu1 %v546_v6 }
  0x26   : > { %595 = vmatpush.bf16.msra.mxu2 %v546_v6  ;;  %596 = vmatpush.bf16.msra.mxu3 %v546_v6 }
  0x29   : > { %332 = vmatpush.bf16.msra.mxu0 %v545_v7  ;;  %597 = vmatpush.bf16.msra.mxu1 %v545_v7 }
  0x2a   : > { %598 = vmatpush.bf16.msra.mxu2 %v545_v7  ;;  %599 = vmatpush.bf16.msra.mxu3 %v545_v7 }
  0x2c   : > { %333 = vmatmul.bf16.vlgmr.msra.gmra.mxu0 %v541_v8  ;;  %338 = vmatmul.bf16.vlgmr.msra.gmra.mxu1 %v542_v9 }
  0x2d   : > { %343 = vmatmul.bf16.vlgmr.msra.gmra.mxu2 %v543_v10  ;;  %348 = vmatmul.bf16.vlgmr.msra.gmra.mxu3 %v544_v11 }
  0xa9   : > { %v334_v12 = vpop.f32.mrf.mxu0  ;;  %v339_v13 = vpop.f32.mrf.mxu1 }
  0xaa   : > { %v335_v15 = vadd.f32 %v624_v14, %v334_v12  ;;  %v340_v16 = vadd.f32 %v624_v14, %v339_v13 }
  0xac   : > { %v354_v23 = vmax.f32 %v335_v15, 0.0  ;;  %v356_v24 = vmax.f32 %v340_v16, 0.0 }
  0xb0   : > { %v344_v17 = vpop.f32.mrf.mxu2  ;;  %v349_v18 = vpop.f32.mrf.mxu3 }
  0xb1   : > { %v336_v19 = vpop.f32.mrf.mxu0  ;;  %v341_v20 = vpop.f32.mrf.mxu1  ;;  %v345_v29 = vadd.f32 %v624_v14, %v344_v17  ;;  %v350_v30 = vadd.f32 %v624_v14, %v349_v18 }
  0xb2   : > { %v337_v21 = vadd.f32 %v624_v14, %v336_v19  ;;  %v342_v22 = vadd.f32 %v624_v14, %v341_v20 }
  0xb3   : > { %v358_v35 = vmax.f32 %v345_v29, 0.0  ;;  %v360_v36 = vmax.f32 %v350_v30, 0.0 }
  0xb4   : > { %v355_v25 = vmax.f32 %v337_v21, 0.0  ;;  %v357_v26 = vmax.f32 %v342_v22, 0.0 }
  0xb6   : > { %v556_v27 = vpack.c.bf16 %v355_v25, %v354_v23  ;;  %v561_v28 = vpack.c.bf16 %v357_v26, %v356_v24 }
  0xb8   : > { %557 = vst [vmem:[%s223_s17] sm:$0xff] %v556_v27   ;;  %v346_v31 = vpop.f32.mrf.mxu2  ;;  %v351_v32 = vpop.f32.mrf.mxu3 }
  0xb9   : > { %573 = vst [vmem:[%s223_s17 + $0x8] sm:$0xff] %v561_v28   ;;  %v347_v33 = vadd.f32 %v624_v14, %v346_v31  ;;  %v352_v34 = vadd.f32 %v624_v14, %v351_v32 }
  0xbb   : > { %v359_v37 = vmax.f32 %v347_v33, 0.0  ;;  %v361_v38 = vmax.f32 %v352_v34, 0.0 }
  0xbd   : > { %v566_v39 = vpack.c.bf16 %v359_v37, %v358_v35  ;;  %v571_v40 = vpack.c.bf16 %v361_v38, %v360_v36 }
  0xbf   : > { %574 = vst [vmem:[%s223_s17 + $0x10] sm:$0xff] %v566_v39  }
  0xc0   : > { %575 = vst [vmem:[%s223_s17 + $0x18] sm:$0xff] %v571_v40  }
  0xc1 PF: > { %s13_s14 = sadd.s32 1, %s647_s14   ;;  %s743_s12 = smov %s643_s13 }
  0xc2   : > { %p10_p5 = scmp.ge.s32.totalorder %s13_s14, 4   ;;  %s744_s13 = smov %s746_s15 }
  0xc4   :  { %12 = sbr.rel (!%p10_p5) target bundleno = 2 (0x2), region = 68 }

// kernel: resnet50_forward.55
= control target key start
LH: loop header
LB: loop body
LE: loop exit
PB: predicated region body
PF: predicated region fallthrough
CT: control target
= control target key end

     0   :  { %s1363_s12 = smov 0   ;;  %s1365_s13 = smov 0   ;;  %s1572_s0 = inlined_call_operand.vmem [shape: bf16[512,256], index: 0, kind: input, shape index: {}]   ;;  %s1573_s1 = inlined_call_operand.vmem [shape: bf16[256,128], index: 1, kind: input, shape index: {}]   ;;  %s1574_s2 = inlined_call_operand.vmem [shape: f32[1,128], index: 2, kind: input, shape index: {}]   ;;  %s1575_s3 = inlined_call_operand.vmem [shape: bf16[512,128], index: 3, kind: output, shape index: {}]  }
   0x1   :  { %s1367_s14 = smov 0  }
   0x2 LB: > { %s25_s15 = sadd.s32 1, %s1337_s13  ;;  %p934_p0 = scmp.ge.s32.totalorder %s1341_s14, 1  ;;  %s1341_s14 = sphi %s1367_s14, %s13_s14   ;;  %s1337_s13 = sphi %s1365_s13, %s1577_s13   ;;  %s1333_s12 = sphi %s1363_s12, %s1576_s12  }
   0x3   : > { %p27_p1 = scmp.ge.s32.totalorder %s25_s15, 2  ;;  %p170_p2 = scmp.lt.s32.totalorder %s1341_s14, 3 }
   0x5   : > { %s1579_s15 = smov (%p27_p1, %s25_s15), 0  ;;  %p171_p3 = pnand %p934_p0, %p170_p2 }
   0x6   : > { %s935_s28 = sshll.u32 (!%p171_p3), %s1333_s12, 5 }
   0x7   : > { %174 = sbr.rel (%p171_p3) target bundleno = 305 (0x131), region = 32  ;;  %p206_p4 = scmp.lt.s32.totalorder (!%p171_p3), %s935_s28, 63 }
   0xc   : > { %v1174_v0 = vld [vmem:[%s1573_s1 + $0x38] sm:$0xff]  ;;  %v1173_v2 = vld [vmem:[%s1573_s1 + $0x30] sm:$0xff]  ;;  %v1172_v4 = vld [vmem:[%s1573_s1 + $0x28] sm:$0xff]  ;;  %s1581_s28 = smov (!%p206_p4, %s935_s28), 63 }
   0xd   : > { %v1182_v1 = vld [vmem:[%s1573_s1 + $0x78] sm:$0xff]  ;;  %552 = vmatpush.bf16.msra.mxu0 %v1174_v0  ;;  %1278 = vmatpush.bf16.msra.mxu2 %v1174_v0  ;;  %v1181_v3 = vld [vmem:[%s1573_s1 + $0x70] sm:$0xff]  ;;  %v1180_v5 = vld [vmem:[%s1573_s1 + $0x68] sm:$0xff]  ;;  %s1134_s17 = sshll.u32 %s1581_s28, 3  ;;  %s939_s5 = sshll.u32 %s1581_s28, 2 }
   0xe   : > { %641 = vmatpush.bf16.msra.mxu1 %v1182_v1  ;;  %1286 = vmatpush.bf16.msra.mxu3 %v1182_v1  ;;  %v1171_v6 = vld [vmem:[%s1573_s1 + $0x20] sm:$0xff]  ;;  %v1170_v8 = vld [vmem:[%s1573_s1 + $0x18] sm:$0xff]  ;;  %v1169_v10 = vld [vmem:[%s1573_s1 + $0x10] sm:$0xff]  ;;  %s1429_s22 = scalar_lea.vmem %s1572_s0, %s1134_s17  ;;  %s1516_s8 = scalar_lea.vmem %s1575_s3, %s939_s5 }
   0xf   : > { %v1179_v7 = vld [vmem:[%s1573_s1 + $0x60] sm:$0xff]  ;;  %v1178_v9 = vld [vmem:[%s1573_s1 + $0x58] sm:$0xff]  ;;  %v1177_v11 = vld [vmem:[%s1573_s1 + $0x50] sm:$0xff] }
  0x10   : > { %v1168_v12 = vld [vmem:[%s1573_s1 + $0x8] sm:$0xff]  ;;  %v1167_v14 = vld [vmem:[%s1573_s1] sm:$0xff]  ;;  %v950_v28 = vld [vmem:[%s1429_s22 + $0x10] sm:$0xf] }
  0x11   : > { %553 = vmatpush.bf16.msra.mxu0 %v1173_v2  ;;  %1279 = vmatpush.bf16.msra.mxu2 %v1173_v2  ;;  %v1176_v13 = vld [vmem:[%s1573_s1 + $0x48] sm:$0xff]  ;;  %v1175_v15 = vld [vmem:[%s1573_s1 + $0x40] sm:$0xff]  ;;  %v1138_v29 = vld [vmem:[%s1429_s22 + $0x14] sm:$0xf0] }
  0x12   : > { %642 = vmatpush.bf16.msra.mxu1 %v1181_v3  ;;  %1287 = vmatpush.bf16.msra.mxu3 %v1181_v3  ;;  %v942_v16 = vld [vmem:[%s1429_s22] sm:$0xf]  ;;  %v1136_v17 = vld [vmem:[%s1429_s22 + $0x4] sm:$0xf0]  ;;  %v1135_v20 = vld [vmem:[%s1429_s22 + $0x4] sm:$0xf]  ;;  %v951_v36 = vor.u32 %v1138_v29, %v950_v28 }
  0x13   : > { %v1006_v18 = vld [vmem:[%s1429_s22 + $0x80] sm:$0xf]  ;;  %v1152_v19 = vld [vmem:[%s1429_s22 + $0x84] sm:$0xf0]  ;;  %v944_v21 = vld [vmem:[%s1429_s22 + $0x8] sm:$0xf0]  ;;  %v943_v24 = vor.u32 %v1136_v17, %v942_v16 }
  0x14   : > { %v1151_v22 = vld [vmem:[%s1429_s22 + $0x84] sm:$0xf]  ;;  %v1008_v23 = vld [vmem:[%s1429_s22 + $0x88] sm:$0xf0]  ;;  %v1007_v25 = vor.u32 %v1152_v19, %v1006_v18  ;;  %v947_v26 = vor.u32 %v1135_v20, %v944_v21  ;;  %v1014_v30 = vld [vmem:[%s1429_s22 + $0x90] sm:$0xf] }
  0x15   : > { %554 = vmatpush.bf16.msra.mxu0 %v1172_v4  ;;  %1280 = vmatpush.bf16.msra.mxu2 %v1172_v4  ;;  %v1011_v27 = vor.u32 %v1151_v22, %v1008_v23  ;;  %v1154_v31 = vld [vmem:[%s1429_s22 + $0x94] sm:$0xf0]  ;;  %v1137_v32 = vld [vmem:[%s1429_s22 + $0x14] sm:$0xf]  ;;  %v952_v33 = vld [vmem:[%s1429_s22 + $0x18] sm:$0xf0] }
  0x16   : > { %643 = vmatpush.bf16.msra.mxu1 %v1180_v5  ;;  %1288 = vmatpush.bf16.msra.mxu3 %v1180_v5  ;;  %v1153_v34 = vld [vmem:[%s1429_s22 + $0x94] sm:$0xf]  ;;  %v1016_v35 = vld [vmem:[%s1429_s22 + $0x98] sm:$0xf0]  ;;  %v1015_v37 = vor.u32 %v1154_v31, %v1014_v30  ;;  %v955_v38 = vor.u32 %v1137_v32, %v952_v33  ;;  %v958_v40 = vld [vmem:[%s1429_s22 + $0x20] sm:$0xf] }
  0x17   : > { %v1019_v39 = vor.u32 %v1153_v34, %v1016_v35  ;;  %v1140_v41 = vld [vmem:[%s1429_s22 + $0x24] sm:$0xf0]  ;;  %v1022_v42 = vld [vmem:[%s1429_s22 + $0xa0] sm:$0xf]  ;;  %v1139_v44 = vld [vmem:[%s1429_s22 + $0x24] sm:$0xf] }
  0x18   : > { %v1156_v43 = vld [vmem:[%s1429_s22 + $0xa4] sm:$0xf0]  ;;  %v960_v45 = vld [vmem:[%s1429_s22 + $0x28] sm:$0xf0]  ;;  %v1155_v46 = vld [vmem:[%s1429_s22 + $0xa4] sm:$0xf]  ;;  %v959_v48 = vor.u32 %v1140_v41, %v958_v40 }
  0x19   : > { %555 = vmatpush.bf16.msra.mxu0 %v1171_v6  ;;  %1281 = vmatpush.bf16.msra.mxu2 %v1171_v6  ;;  %v1024_v47 = vld [vmem:[%s1429_s22 + $0xa8] sm:$0xf0]  ;;  %v1023_v49 = vor.u32 %v1156_v43, %v1022_v42  ;;  %v963_v50 = vor.u32 %v1139_v44, %v960_v45  ;;  %v966_v52 = vld [vmem:[%s1429_s22 + $0x30] sm:$0xf]  ;;  %v1142_v53 = vld [vmem:[%s1429_s22 + $0x34] sm:$0xf0] }
  0x1a   : > { %644 = vmatpush.bf16.msra.mxu1 %v1179_v7  ;;  %1289 = vmatpush.bf16.msra.mxu3 %v1179_v7  ;;  %v1027_v51 = vor.u32 %v1155_v46, %v1024_v47  ;;  %v1030_v54 = vld [vmem:[%s1429_s22 + $0xb0] sm:$0xf]  ;;  %v1158_v55 = vld [vmem:[%s1429_s22 + $0xb4] sm:$0xf0]  ;;  %v1141_v56 = vld [vmem:[%s1429_s22 + $0x34] sm:$0xf]  ;;  %v967_v60 = vor.u32 %v1142_v53, %v966_v52 }
  0x1b   : > { %v968_v57 = vld [vmem:[%s1429_s22 + $0x38] sm:$0xf0]  ;;  %v1157_v58 = vld [vmem:[%s1429_s22 + $0xb4] sm:$0xf]  ;;  %v1031_v61 = vor.u32 %v1158_v55, %v1030_v54  ;;  %v974_v0 = vld [vmem:[%s1429_s22 + $0x40] sm:$0xf] }
  0x1c   : > { %v1032_v59 = vld [vmem:[%s1429_s22 + $0xb8] sm:$0xf0]  ;;  %v971_v62 = vor.u32 %v1141_v56, %v968_v57  ;;  %v1144_v1 = vld [vmem:[%s1429_s22 + $0x44] sm:$0xf0]  ;;  %v1038_v2 = vld [vmem:[%s1429_s22 + $0xc0] sm:$0xf] }
  0x1d   : > { %556 = vmatpush.bf16.msra.mxu0 %v1170_v8  ;;  %1282 = vmatpush.bf16.msra.mxu2 %v1170_v8  ;;  %v1035_v63 = vor.u32 %v1157_v58, %v1032_v59  ;;  %v1160_v3 = vld [vmem:[%s1429_s22 + $0xc4] sm:$0xf0]  ;;  %v1143_v4 = vld [vmem:[%s1429_s22 + $0x44] sm:$0xf]  ;;  %v976_v5 = vld [vmem:[%s1429_s22 + $0x48] sm:$0xf0]  ;;  %v975_v8 = vor.u32 %v1144_v1, %v974_v0 }
  0x1e   : > { %645 = vmatpush.bf16.msra.mxu1 %v1178_v9  ;;  %1290 = vmatpush.bf16.msra.mxu3 %v1178_v9  ;;  %v1159_v6 = vld [vmem:[%s1429_s22 + $0xc4] sm:$0xf]  ;;  %v1040_v7 = vld [vmem:[%s1429_s22 + $0xc8] sm:$0xf0]  ;;  %v1039_v9 = vor.u32 %v1160_v3, %v1038_v2  ;;  %v1145_v16 = vld [vmem:[%s1429_s22 + $0x54] sm:$0xf] }
  0x1f   : > { %v984_v17 = vld [vmem:[%s1429_s22 + $0x58] sm:$0xf0]  ;;  %v1161_v18 = vld [vmem:[%s1429_s22 + $0xd4] sm:$0xf]  ;;  %v1147_v28 = vld [vmem:[%s1429_s22 + $0x64] sm:$0xf] }
  0x20   : > { %v1048_v19 = vld [vmem:[%s1429_s22 + $0xd8] sm:$0xf0]  ;;  %v987_v22 = vor.u32 %v1145_v16, %v984_v17  ;;  %v992_v29 = vld [vmem:[%s1429_s22 + $0x68] sm:$0xf0]  ;;  %v1163_v30 = vld [vmem:[%s1429_s22 + $0xe4] sm:$0xf] }
  0x21   : > { %557 = vmatpush.bf16.msra.mxu0 %v1169_v10  ;;  %1283 = vmatpush.bf16.msra.mxu2 %v1169_v10  ;;  %v979_v10 = vor.u32 %v1143_v4, %v976_v5  ;;  %v1051_v23 = vor.u32 %v1161_v18, %v1048_v19  ;;  %v1056_v31 = vld [vmem:[%s1429_s22 + $0xe8] sm:$0xf0]  ;;  %v995_v34 = vor.u32 %v1147_v28, %v992_v29  ;;  %v1149_v40 = vld [vmem:[%s1429_s22 + $0x74] sm:$0xf]  ;;  %v1000_v41 = vld [vmem:[%s1429_s22 + $0x78] sm:$0xf0] }
  0x22   : > { %646 = vmatpush.bf16.msra.mxu1 %v1177_v11  ;;  %1291 = vmatpush.bf16.msra.mxu3 %v1177_v11  ;;  %v1043_v11 = vor.u32 %v1159_v6, %v1040_v7  ;;  %v1059_v35 = vor.u32 %v1163_v30, %v1056_v31  ;;  %v1165_v42 = vld [vmem:[%s1429_s22 + $0xf4] sm:$0xf]  ;;  %v1064_v43 = vld [vmem:[%s1429_s22 + $0xf8] sm:$0xf0]  ;;  %v1003_v46 = vor.u32 %v1149_v40, %v1000_v41 }
  0x23   : > { %v1067_v47 = vor.u32 %v1165_v42, %v1064_v43 }
  0x25   : > { %558 = vmatpush.bf16.msra.mxu0 %v1168_v12  ;;  %1284 = vmatpush.bf16.msra.mxu2 %v1168_v12  ;;  %v982_v12 = vld [vmem:[%s1429_s22 + $0x50] sm:$0xf] }
  0x26   : > { %647 = vmatpush.bf16.msra.mxu1 %v1176_v13  ;;  %1292 = vmatpush.bf16.msra.mxu3 %v1176_v13  ;;  %v1146_v13 = vld [vmem:[%s1429_s22 + $0x54] sm:$0xf0] }
  0x27   : > { %v983_v20 = vor.u32 %v1146_v13, %v982_v12 }
  0x29   : > { %559 = vmatpush.bf16.msra.mxu0 %v1167_v14  ;;  %1285 = vmatpush.bf16.msra.mxu2 %v1167_v14  ;;  %v1046_v14 = vld [vmem:[%s1429_s22 + $0xd0] sm:$0xf] }
  0x2a   : > { %648 = vmatpush.bf16.msra.mxu1 %v1175_v15  ;;  %1293 = vmatpush.bf16.msra.mxu3 %v1175_v15  ;;  %v1162_v15 = vld [vmem:[%s1429_s22 + $0xd4] sm:$0xf0] }
  0x2b   : > { %v1047_v21 = vor.u32 %v1162_v15, %v1046_v14 }
  0x2c   : > { %560 = vmatmul.bf16.vlgmr.msra.gmra.mxu0 %v943_v24  ;;  %600 = vmatmul.bf16.vlgmr.msra.gmra.mxu2 %v1007_v25  ;;  %v990_v24 = vld [vmem:[%s1429_s22 + $0x60] sm:$0xf]  ;;  %v1148_v25 = vld [vmem:[%s1429_s22 + $0x64] sm:$0xf0] }
  0x2d   : > { %649 = vmatmul.bf16.vlgmr.msra.gmra.mxu1 %v947_v26  ;;  %689 = vmatmul.bf16.vlgmr.msra.gmra.mxu3 %v1011_v27  ;;  %v1054_v26 = vld [vmem:[%s1429_s22 + $0xe0] sm:$0xf]  ;;  %v1164_v27 = vld [vmem:[%s1429_s22 + $0xe4] sm:$0xf0]  ;;  %v991_v32 = vor.u32 %v1148_v25, %v990_v24 }
  0x2e   : > { %v1055_v33 = vor.u32 %v1164_v27, %v1054_v26 }
  0x3c   : > { %565 = vmatmul.bf16.gmra.mxu0 %v951_v36  ;;  %605 = vmatmul.bf16.gmra.mxu2 %v1015_v37  ;;  %v998_v36 = vld [vmem:[%s1429_s22 + $0x70] sm:$0xf]  ;;  %v1150_v37 = vld [vmem:[%s1429_s22 + $0x74] sm:$0xf0] }
  0x3d   : > { %654 = vmatmul.bf16.gmra.mxu1 %v955_v38  ;;  %694 = vmatmul.bf16.gmra.mxu3 %v1019_v39  ;;  %v1062_v38 = vld [vmem:[%s1429_s22 + $0xf0] sm:$0xf]  ;;  %v1166_v39 = vld [vmem:[%s1429_s22 + $0xf4] sm:$0xf0]  ;;  %v999_v44 = vor.u32 %v1150_v37, %v998_v36 }
  0x3e   : > { %v1063_v45 = vor.u32 %v1166_v39, %v1062_v38 }
  0x4c   : > { %570 = vmatmul.bf16.gmra.mxu0 %v959_v48  ;;  %610 = vmatmul.bf16.gmra.mxu2 %v1023_v49  ;;  %v1507_v49 = vld [vmem:[%s1574_s2] ss:$0 sm:$0xff] }
  0x4d   : > { %659 = vmatmul.bf16.gmra.mxu1 %v963_v50  ;;  %699 = vmatmul.bf16.gmra.mxu3 %v1027_v51 }
  0x5c   : > { %575 = vmatmul.bf16.gmra.mxu0 %v967_v60  ;;  %615 = vmatmul.bf16.gmra.mxu2 %v1031_v61 }
  0x5d   : > { %664 = vmatmul.bf16.gmra.mxu1 %v971_v62  ;;  %704 = vmatmul.bf16.gmra.mxu3 %v1035_v63 }
  0x6c   : > { %580 = vmatmul.bf16.gmra.mxu0 %v975_v8  ;;  %620 = vmatmul.bf16.gmra.mxu2 %v1039_v9 }
  0x6d   : > { %669 = vmatmul.bf16.gmra.mxu1 %v979_v10  ;;  %709 = vmatmul.bf16.gmra.mxu3 %v1043_v11 }
  0x7c   : > { %585 = vmatmul.bf16.gmra.mxu0 %v983_v20  ;;  %625 = vmatmul.bf16.gmra.mxu2 %v1047_v21 }
  0x7d   : > { %674 = vmatmul.bf16.gmra.mxu1 %v987_v22  ;;  %714 = vmatmul.bf16.gmra.mxu3 %v1051_v23 }
  0x8c   : > { %590 = vmatmul.bf16.gmra.mxu0 %v991_v32  ;;  %630 = vmatmul.bf16.gmra.mxu2 %v1055_v33 }
  0x8d   : > { %679 = vmatmul.bf16.gmra.mxu1 %v995_v34  ;;  %719 = vmatmul.bf16.gmra.mxu3 %v1059_v35 }
  0x9c   : > { %595 = vmatmul.bf16.gmra.mxu0 %v999_v44  ;;  %635 = vmatmul.bf16.gmra.mxu2 %v1063_v45 }
  0x9d   : > { %684 = vmatmul.bf16.gmra.mxu1 %v1003_v46  ;;  %724 = vmatmul.bf16.gmra.mxu3 %v1067_v47 }
  0xa9   : > { %v561_v48 = vpop.f32.mrf.mxu0 }
  0xaa   : > { %v650_v50 = vpop.f32.mrf.mxu1  ;;  %v562_v51 = vadd.f32 %v1507_v49, %v561_v48 }
  0xac   : > { %v651_v55 = vadd.f32 %v650_v50, %v562_v51 }
  0xae   : > { %v730_v60 = vmax.f32 %v651_v55, 0.0 }
  0xaf   : > { %v601_v52 = vpop.f32.mrf.mxu2 }
  0xb0   : > { %v690_v53 = vpop.f32.mrf.mxu3  ;;  %v602_v58 = vadd.f32 %v1507_v49, %v601_v52 }
  0xb1   : > { %v563_v54 = vpop.f32.mrf.mxu0 }
  0xb2   : > { %v564_v56 = vadd.f32 %v1507_v49, %v563_v54  ;;  %v652_v57 = vpop.f32.mrf.mxu1  ;;  %v691_v63 = vadd.f32 %v690_v53, %v602_v58 }
  0xb4   : > { %v653_v59 = vadd.f32 %v652_v57, %v564_v56  ;;  %v746_v6 = vmax.f32 %v691_v63, 0.0 }
  0xb6   : > { %v731_v61 = vmax.f32 %v653_v59, 0.0 }
  0xb7   : > { %v603_v62 = vpop.f32.mrf.mxu2 }
  0xb8   : > { %v1186_v0 = vpack.c.bf16 %v731_v61, %v730_v60  ;;  %v604_v1 = vadd.f32 %v1507_v49, %v603_v62  ;;  %v692_v2 = vpop.f32.mrf.mxu3 }
  0xb9   : > { %v566_v3 = vpop.f32.mrf.mxu0 }
  0xba   : > { %1187 = vst [vmem:[%s1516_s8] sm:$0xff] %v1186_v0   ;;  %v693_v4 = vadd.f32 %v692_v2, %v604_v1  ;;  %v655_v5 = vpop.f32.mrf.mxu1  ;;  %v567_v9 = vadd.f32 %v1507_v49, %v566_v3 }
  0xbc   : > { %v747_v7 = vmax.f32 %v693_v4, 0.0  ;;  %v656_v13 = vadd.f32 %v655_v5, %v567_v9 }
  0xbe   : > { %v1226_v8 = vpack.c.bf16 %v747_v7, %v746_v6  ;;  %v732_v18 = vmax.f32 %v656_v13, 0.0 }
  0xbf   : > { %v606_v10 = vpop.f32.mrf.mxu2 }
  0xc0   : > { %1270 = vst [vmem:[%s1516_s8 + $0x40] sm:$0xff] %v1226_v8   ;;  %v695_v11 = vpop.f32.mrf.mxu3  ;;  %v607_v16 = vadd.f32 %v1507_v49, %v606_v10 }
  0xc1   : > { %v568_v12 = vpop.f32.mrf.mxu0 }
  0xc2   : > { %v569_v14 = vadd.f32 %v1507_v49, %v568_v12  ;;  %v657_v15 = vpop.f32.mrf.mxu1  ;;  %v696_v21 = vadd.f32 %v695_v11, %v607_v16 }
  0xc4   : > { %v658_v17 = vadd.f32 %v657_v15, %v569_v14  ;;  %v748_v28 = vmax.f32 %v696_v21, 0.0 }
  0xc6   : > { %v733_v19 = vmax.f32 %v658_v17, 0.0 }
  0xc7   : > { %v608_v20 = vpop.f32.mrf.mxu2 }
  0xc8   : > { %v1191_v22 = vpack.c.bf16 %v733_v19, %v732_v18  ;;  %v609_v23 = vadd.f32 %v1507_v49, %v608_v20  ;;  %v697_v24 = vpop.f32.mrf.mxu3 }
  0xc9   : > { %v571_v25 = vpop.f32.mrf.mxu0 }
  0xca   : > { %1263 = vst [vmem:[%s1516_s8 + $0x8] sm:$0xff] %v1191_v22   ;;  %v698_v26 = vadd.f32 %v697_v24, %v609_v23  ;;  %v660_v27 = vpop.f32.mrf.mxu1  ;;  %v572_v31 = vadd.f32 %v1507_v49, %v571_v25 }
  0xcc   : > { %v749_v29 = vmax.f32 %v698_v26, 0.0  ;;  %v661_v35 = vadd.f32 %v660_v27, %v572_v31 }
  0xce   : > { %v1231_v30 = vpack.c.bf16 %v749_v29, %v748_v28  ;;  %v734_v40 = vmax.f32 %v661_v35, 0.0 }
  0xcf   : > { %v611_v32 = vpop.f32.mrf.mxu2 }
  0xd0   : > { %1271 = vst [vmem:[%s1516_s8 + $0x48] sm:$0xff] %v1231_v30   ;;  %v700_v33 = vpop.f32.mrf.mxu3  ;;  %v612_v38 = vadd.f32 %v1507_v49, %v611_v32 }
  0xd1   : > { %v573_v34 = vpop.f32.mrf.mxu0 }
  0xd2   : > { %v574_v36 = vadd.f32 %v1507_v49, %v573_v34  ;;  %v662_v37 = vpop.f32.mrf.mxu1  ;;  %v701_v43 = vadd.f32 %v700_v33, %v612_v38 }
  0xd4   : > { %v663_v39 = vadd.f32 %v662_v37, %v574_v36  ;;  %v750_v51 = vmax.f32 %v701_v43, 0.0 }
  0xd6   : > { %v735_v41 = vmax.f32 %v663_v39, 0.0 }
  0xd7   : > { %v613_v42 = vpop.f32.mrf.mxu2 }
  0xd8   : > { %v1196_v44 = vpack.c.bf16 %v735_v41, %v734_v40  ;;  %v614_v45 = vadd.f32 %v1507_v49, %v613_v42  ;;  %v702_v46 = vpop.f32.mrf.mxu3 }
  0xd9   : > { %v576_v47 = vpop.f32.mrf.mxu0 }
  0xda   : > { %1264 = vst [vmem:[%s1516_s8 + $0x10] sm:$0xff] %v1196_v44   ;;  %v703_v48 = vadd.f32 %v702_v46, %v614_v45  ;;  %v665_v50 = vpop.f32.mrf.mxu1  ;;  %v577_v54 = vadd.f32 %v1507_v49, %v576_v47 }
  0xdc   : > { %v751_v52 = vmax.f32 %v703_v48, 0.0  ;;  %v666_v58 = vadd.f32 %v665_v50, %v577_v54 }
  0xde   : > { %v1236_v53 = vpack.c.bf16 %v751_v52, %v750_v51  ;;  %v736_v63 = vmax.f32 %v666_v58, 0.0 }
  0xdf   : > { %v616_v55 = vpop.f32.mrf.mxu2 }
  0xe0   : > { %1272 = vst [vmem:[%s1516_s8 + $0x50] sm:$0xff] %v1236_v53   ;;  %v705_v56 = vpop.f32.mrf.mxu3  ;;  %v617_v61 = vadd.f32 %v1507_v49, %v616_v55 }
  0xe1   : > { %v578_v57 = vpop.f32.mrf.mxu0 }
  0xe2   : > { %v579_v59 = vadd.f32 %v1507_v49, %v578_v57  ;;  %v667_v60 = vpop.f32.mrf.mxu1  ;;  %v706_v2 = vadd.f32 %v705_v56, %v617_v61 }
  0xe4   : > { %v668_v62 = vadd.f32 %v667_v60, %v579_v59  ;;  %v752_v9 = vmax.f32 %v706_v2, 0.0 }
  0xe6   : > { %v737_v0 = vmax.f32 %v668_v62, 0.0 }
  0xe7   : > { %v618_v1 = vpop.f32.mrf.mxu2 }
  0xe8   : > { %v1201_v3 = vpack.c.bf16 %v737_v0, %v736_v63  ;;  %v619_v4 = vadd.f32 %v1507_v49, %v618_v1  ;;  %v707_v5 = vpop.f32.mrf.mxu3 }
  0xe9   : > { %v581_v6 = vpop.f32.mrf.mxu0 }
  0xea   : > { %1265 = vst [vmem:[%s1516_s8 + $0x18] sm:$0xff] %v1201_v3   ;;  %v708_v7 = vadd.f32 %v707_v5, %v619_v4  ;;  %v670_v8 = vpop.f32.mrf.mxu1  ;;  %v582_v12 = vadd.f32 %v1507_v49, %v581_v6 }
  0xec   : > { %v753_v10 = vmax.f32 %v708_v7, 0.0  ;;  %v671_v16 = vadd.f32 %v670_v8, %v582_v12 }
  0xee   : > { %v1241_v11 = vpack.c.bf16 %v753_v10, %v752_v9  ;;  %v738_v21 = vmax.f32 %v671_v16, 0.0 }
  0xef   : > { %v621_v13 = vpop.f32.mrf.mxu2 }
  0xf0   : > { %1273 = vst [vmem:[%s1516_s8 + $0x58] sm:$0xff] %v1241_v11   ;;  %v710_v14 = vpop.f32.mrf.mxu3  ;;  %v622_v19 = vadd.f32 %v1507_v49, %v621_v13 }
  0xf1   : > { %v583_v15 = vpop.f32.mrf.mxu0 }
  0xf2   : > { %v584_v17 = vadd.f32 %v1507_v49, %v583_v15  ;;  %v672_v18 = vpop.f32.mrf.mxu1  ;;  %v711_v24 = vadd.f32 %v710_v14, %v622_v19 }
  0xf4   : > { %v673_v20 = vadd.f32 %v672_v18, %v584_v17  ;;  %v754_v31 = vmax.f32 %v711_v24, 0.0 }
  0xf6   : > { %v739_v22 = vmax.f32 %v673_v20, 0.0 }
  0xf7   : > { %v623_v23 = vpop.f32.mrf.mxu2 }
  0xf8   : > { %v1206_v25 = vpack.c.bf16 %v739_v22, %v738_v21  ;;  %v624_v26 = vadd.f32 %v1507_v49, %v623_v23  ;;  %v712_v27 = vpop.f32.mrf.mxu3 }
  0xf9   : > { %v586_v28 = vpop.f32.mrf.mxu0 }
  0xfa   : > { %1266 = vst [vmem:[%s1516_s8 + $0x20] sm:$0xff] %v1206_v25   ;;  %v713_v29 = vadd.f32 %v712_v27, %v624_v26  ;;  %v675_v30 = vpop.f32.mrf.mxu1  ;;  %v587_v34 = vadd.f32 %v1507_v49, %v586_v28 }
  0xfc   : > { %v755_v32 = vmax.f32 %v713_v29, 0.0  ;;  %v676_v38 = vadd.f32 %v675_v30, %v587_v34 }
  0xfe   : > { %v1246_v33 = vpack.c.bf16 %v755_v32, %v754_v31  ;;  %v740_v43 = vmax.f32 %v676_v38, 0.0 }
  0xff   : > { %v626_v35 = vpop.f32.mrf.mxu2 }
 0x100   : > { %1274 = vst [vmem:[%s1516_s8 + $0x60] sm:$0xff] %v1246_v33   ;;  %v715_v36 = vpop.f32.mrf.mxu3  ;;  %v627_v41 = vadd.f32 %v1507_v49, %v626_v35 }
 0x101   : > { %v588_v37 = vpop.f32.mrf.mxu0 }
 0x102   : > { %v589_v39 = vadd.f32 %v1507_v49, %v588_v37  ;;  %v677_v40 = vpop.f32.mrf.mxu1  ;;  %v716_v46 = vadd.f32 %v715_v36, %v627_v41 }
 0x104   : > { %v678_v42 = vadd.f32 %v677_v40, %v589_v39  ;;  %v756_v54 = vmax.f32 %v716_v46, 0.0 }
 0x106   : > { %v741_v44 = vmax.f32 %v678_v42, 0.0 }
 0x107   : > { %v628_v45 = vpop.f32.mrf.mxu2 }
 0x108   : > { %v1211_v47 = vpack.c.bf16 %v741_v44, %v740_v43  ;;  %v629_v48 = vadd.f32 %v1507_v49, %v628_v45  ;;  %v717_v50 = vpop.f32.mrf.mxu3 }
 0x109   : > { %v591_v51 = vpop.f32.mrf.mxu0 }
 0x10a   : > { %1267 = vst [vmem:[%s1516_s8 + $0x28] sm:$0xff] %v1211_v47   ;;  %v718_v52 = vadd.f32 %v717_v50, %v629_v48  ;;  %v680_v53 = vpop.f32.mrf.mxu1  ;;  %v592_v57 = vadd.f32 %v1507_v49, %v591_v51 }
 0x10c   : > { %v757_v55 = vmax.f32 %v718_v52, 0.0  ;;  %v681_v61 = vadd.f32 %v680_v53, %v592_v57 }
 0x10e   : > { %v1251_v56 = vpack.c.bf16 %v757_v55, %v756_v54  ;;  %v742_v2 = vmax.f32 %v681_v61, 0.0 }
 0x10f   : > { %v631_v58 = vpop.f32.mrf.mxu2 }
 0x110   : > { %1275 = vst [vmem:[%s1516_s8 + $0x68] sm:$0xff] %v1251_v56   ;;  %v720_v59 = vpop.f32.mrf.mxu3  ;;  %v632_v0 = vadd.f32 %v1507_v49, %v631_v58 }
 0x111   : > { %v593_v60 = vpop.f32.mrf.mxu0 }
 0x112   : > { %v594_v62 = vadd.f32 %v1507_v49, %v593_v60  ;;  %v682_v63 = vpop.f32.mrf.mxu1  ;;  %v721_v5 = vadd.f32 %v720_v59, %v632_v0 }
 0x114   : > { %v683_v1 = vadd.f32 %v682_v63, %v594_v62  ;;  %v758_v12 = vmax.f32 %v721_v5, 0.0 }
 0x116   : > { %v743_v3 = vmax.f32 %v683_v1, 0.0 }
 0x117   : > { %v633_v4 = vpop.f32.mrf.mxu2 }
 0x118   : > { %v1216_v6 = vpack.c.bf16 %v743_v3, %v742_v2  ;;  %v634_v7 = vadd.f32 %v1507_v49, %v633_v4  ;;  %v722_v8 = vpop.f32.mrf.mxu3 }
 0x119   : > { %v596_v9 = vpop.f32.mrf.mxu0 }
 0x11a   : > { %1268 = vst [vmem:[%s1516_s8 + $0x30] sm:$0xff] %v1216_v6   ;;  %v723_v10 = vadd.f32 %v722_v8, %v634_v7  ;;  %v685_v11 = vpop.f32.mrf.mxu1  ;;  %v597_v15 = vadd.f32 %v1507_v49, %v596_v9 }
 0x11c   : > { %v759_v13 = vmax.f32 %v723_v10, 0.0  ;;  %v686_v19 = vadd.f32 %v685_v11, %v597_v15 }
 0x11e   : > { %v1256_v14 = vpack.c.bf16 %v759_v13, %v758_v12  ;;  %v744_v24 = vmax.f32 %v686_v19, 0.0 }
 0x11f   : > { %v636_v16 = vpop.f32.mrf.mxu2 }
 0x120   : > { %1276 = vst [vmem:[%s1516_s8 + $0x70] sm:$0xff] %v1256_v14   ;;  %v725_v17 = vpop.f32.mrf.mxu3  ;;  %v637_v22 = vadd.f32 %v1507_v49, %v636_v16 }
 0x121   : > { %v598_v18 = vpop.f32.mrf.mxu0 }
 0x122   : > { %v599_v20 = vadd.f32 %v1507_v49, %v598_v18  ;;  %v687_v21 = vpop.f32.mrf.mxu1  ;;  %v726_v27 = vadd.f32 %v725_v17, %v637_v22 }
 0x124   : > { %v688_v23 = vadd.f32 %v687_v21, %v599_v20  ;;  %v760_v32 = vmax.f32 %v726_v27, 0.0 }
 0x126   : > { %v745_v25 = vmax.f32 %v688_v23, 0.0 }
 0x127   : > { %v638_v26 = vpop.f32.mrf.mxu2 }
 0x128   : > { %v1221_v28 = vpack.c.bf16 %v745_v25, %v744_v24  ;;  %v639_v29 = vadd.f32 %v1507_v49, %v638_v26  ;;  %v727_v30 = vpop.f32.mrf.mxu3 }
 0x12a   : > { %1269 = vst [vmem:[%s1516_s8 + $0x38] sm:$0xff] %v1221_v28   ;;  %v728_v31 = vadd.f32 %v727_v30, %v639_v29 }
 0x12c   : > { %v761_v33 = vmax.f32 %v728_v31, 0.0 }
 0x12e   : > { %v1261_v34 = vpack.c.bf16 %v761_v33, %v760_v32 }
 0x130   : > { %1277 = vst [vmem:[%s1516_s8 + $0x78] sm:$0xff] %v1261_v34  }
 0x131 PF: > { %s13_s14 = sadd.s32 1, %s1341_s14   ;;  %s1576_s12 = smov %s1337_s13 }
 0x132   : > { %p10_p5 = scmp.ge.s32.totalorder %s13_s14, 4   ;;  %s1577_s13 = smov %s1579_s15 }
 0x134   :  { %12 = sbr.rel (!%p10_p5) target bundleno = 2 (0x2), region = 68 }

// kernel: resnet50_forward.56
= control target key start
LH: loop header
LB: loop body
LE: loop exit
PB: predicated region body
PF: predicated region fallthrough
CT: control target
= control target key end

     0   :  { %s691_s15 = smov 0   ;;  %s855_s0 = inlined_call_operand.vmem [shape: bf16[2,9,9,8], index: 0, kind: input, shape index: {}]   ;;  %s856_s1 = inlined_call_operand.vmem [shape: bf16[2,9,9,8], index: 1, kind: input, shape index: {}]   ;;  %s857_s2 = inlined_call_operand.vmem [shape: bf16[2,9,9,8], index: 2, kind: input, shape index: {}]   ;;  %s858_s3 = inlined_call_operand.vmem [shape: bf16[2,9,9,8], index: 3, kind: input, shape index: {}]   ;;  %s859_s4 = inlined_call_operand.vmem [shape: bf16[2,8,8,8], index: 4, kind: output, shape index: {}]  }
   0x1 LB: > { %s635_s16 = sadd.s32 4294967295, %s664_s15   ;;  %p639_p0 = scmp.ge.s32.totalorder %s664_s15, 1  ;;  %s664_s15 = sphi %s691_s15, %s14_s15  }
   0x2   : > { %p192_p1 = scmp.lt.s32.totalorder %s664_s15, 3 }
   0x4   : > { %p193_p2 = pnand %p639_p0, %p192_p1 }
   0x5   : > { %p233_p3 = scmp.lt.s32.totalorder (!%p193_p2), %s635_s16, 1 }
   0x6   : > { %196 = sbr.rel (%p193_p2) target bundleno = 72 (0x48), region = 36 }
   0xb   : > { %s861_s16 = smov (!%p233_p3, %s635_s16), 1  ;;  %vm376_vm0 = vcmask 1046528   ;;  %vm535_vm1 = vcmask 60416  }
   0xc   : > { %s649_s17 = smul.u32 72, %s861_s16  ;;  %s648_s30 = sshll.u32 %s861_s16, 5 }
   0xd   : > { %s799_s7 = scalar_lea.vmem %s859_s4, %s648_s30 }
   0xe   : > { %s705_s20 = scalar_lea.vmem %s855_s0, %s649_s17  ;;  %s710_s23 = scalar_lea.vmem %s856_s1, %s649_s17 }
   0xf   : > { %s715_s26 = scalar_lea.vmem %s857_s2, %s649_s17  ;;  %s720_s29 = scalar_lea.vmem %s858_s3, %s649_s17  ;;  %v258_v0 = vld [vmem:[%s705_s20] sm:$0xf]  ;;  %v259_v1 = vld [vmem:[%s705_s20 + $0x4] sm:$0x1]  ;;  %v260_v2 = vld [vmem:[%s705_s20 + $0x8] sm:$0xf] }
  0x10   : > { %v261_v3 = vld [vmem:[%s705_s20 + $0xc] sm:$0x1]  ;;  %v276_v4 = vunpack.c.l.bf16 %v258_v0  ;;  %v277_v5 = vunpack.c.l.bf16 %v259_v1  ;;  %v278_v6 = vunpack.c.l.bf16 %v260_v2  ;;  %v294_v7 = vld [vmem:[%s710_s23] sm:$0xf]  ;;  %v728_v8 = vld [vmem:[%s710_s23 + $0x8] sm:$0xf] }
  0x11   : > { %v279_v9 = vunpack.c.l.bf16 %v261_v3  ;;  %v731_v10 = vld [vmem:[%s715_s26] sm:$0xf]  ;;  %v313_v11 = vld [vmem:[%s715_s26 + $0x4] sm:$0x1]  ;;  %v262_v16 = vld [vmem:[%s705_s20 + $0x10] sm:$0xf]  ;;  %v303_v23 = vunpack.c.l.bf16 %v294_v7  ;;  %v304_v24 = vunpack.c.l.bf16 %v728_v8 }
  0x12   : > { %v735_v12 = vld [vmem:[%s720_s29] sm:$0xf]  ;;  %v328_v13 = vunpack.c.l.bf16 %v731_v10  ;;  %v329_v14 = vunpack.c.l.bf16 %v313_v11  ;;  %v377_v15 = vrot.slane %v276_v4, 1  ;;  %v263_v17 = vld [vmem:[%s705_s20 + $0x14] sm:$0x1]  ;;  %v378_v18 = vrot.slane %v277_v5, 1 }
  0x13   : > { %v380_v19 = vrot.slane %v278_v6, 1  ;;  %v381_v20 = vrot.slane %v279_v9, 1  ;;  %v280_v21 = vunpack.c.l.bf16 %v262_v16  ;;  %v741_v22 = vld [vmem:[%s710_s23 + $0x10] sm:$0xf]  ;;  %v281_v25 = vunpack.c.l.bf16 %v263_v17  ;;  %v314_v26 = vld [vmem:[%s715_s26 + $0x8] sm:$0xf] }
  0x14   : > { %v315_v27 = vld [vmem:[%s715_s26 + $0xc] sm:$0x1]  ;;  %v379_v28 = vsel %vm376_vm0, %v377_v15, %v378_v18  ;;  %v479_v30 = vrot.slane %v328_v13, 1  ;;  %v480_v31 = vrot.slane %v329_v14, 1  ;;  %v264_v32 = vld [vmem:[%s705_s20 + $0x18] sm:$0xf]  ;;  %v352_v34 = vunpack.c.l.bf16 %v735_v12 }
  0x15   : > { %v382_v29 = vsel %vm376_vm0, %v380_v19, %v381_v20  ;;  %v265_v33 = vld [vmem:[%s705_s20 + $0x1c] sm:$0x1]  ;;  %v409_v35 = vmax.f32 %v276_v4, %v379_v28  ;;  %v305_v37 = vunpack.c.l.bf16 %v741_v22  ;;  %v755_v38 = vld [vmem:[%s720_s29 + $0x8] sm:$0xf]  ;;  %v758_v39 = vld [vmem:[%s715_s26 + $0x10] sm:$0xf]  ;;  %v330_v40 = vunpack.c.l.bf16 %v314_v26 }
  0x16   : > { %v410_v36 = vmax.f32 %v278_v6, %v382_v29  ;;  %v331_v41 = vunpack.c.l.bf16 %v315_v27  ;;  %v383_v42 = vrot.slane %v280_v21, 1  ;;  %v384_v43 = vrot.slane %v281_v25, 1  ;;  %v317_v44 = vld [vmem:[%s715_s26 + $0x14] sm:$0x1]  ;;  %v266_v57 = vld [vmem:[%s705_s20 + $0x20] sm:$0xf] }
  0x17   : > { %v417_v45 = vmax.f32 %v409_v35, %v278_v6  ;;  %v282_v47 = vunpack.c.l.bf16 %v264_v32  ;;  %v283_v48 = vunpack.c.l.bf16 %v265_v33  ;;  %v481_v49 = vsel %vm376_vm0, %v479_v30, %v480_v31  ;;  %v267_v58 = vld [vmem:[%s705_s20 + $0x24] sm:$0x1]  ;;  %v768_v61 = vld [vmem:[%s710_s23 + $0x18] sm:$0xf]  ;;  %v319_v5 = vld [vmem:[%s715_s26 + $0x1c] sm:$0x1] }
  0x18   : > { %v418_v46 = vmax.f32 %v410_v36, %v280_v21  ;;  %v353_v50 = vunpack.c.l.bf16 %v755_v38  ;;  %v385_v51 = vsel %vm376_vm0, %v383_v42, %v384_v43  ;;  %v332_v52 = vunpack.c.l.bf16 %v758_v39  ;;  %v771_v4 = vld [vmem:[%s715_s26 + $0x18] sm:$0xf]  ;;  %v346_v15 = vld [vmem:[%s720_s29 + $0x10] sm:$0xf]  ;;  %v268_v22 = vld [vmem:[%s705_s20 + $0x28] sm:$0xf] }
  0x19   : > { %v431_v53 = vmax.f32 %v417_v45, %v382_v29  ;;  %v411_v54 = vmax.f32 %v280_v21, %v385_v51  ;;  %v333_v56 = vunpack.c.l.bf16 %v317_v44  ;;  %v482_v59 = vrot.slane %v330_v40, 1  ;;  %v269_v27 = vld [vmem:[%s705_s20 + $0x2c] sm:$0x1]  ;;  %v298_v36 = vld [vmem:[%s710_s23 + $0x20] sm:$0xf] }
  0x1a   : > { %v432_v55 = vmax.f32 %v418_v46, %v385_v51  ;;  %v483_v60 = vrot.slane %v331_v41, 1  ;;  %v386_v62 = vrot.slane %v282_v47, 1  ;;  %v387_v63 = vrot.slane %v283_v48, 1  ;;  %v787_v10 = vld [vmem:[%s715_s26 + $0x20] sm:$0xf] }
  0x1b   : > { %v439_v0 = vmax.f32 %v431_v53, %v303_v23  ;;  %v419_v2 = vmax.f32 %v411_v54, %v282_v47  ;;  %v485_v3 = vrot.slane %v332_v52, 1  ;;  %v486_v7 = vrot.slane %v333_v56, 1  ;;  %v347_v45 = vld [vmem:[%s720_s29 + $0x18] sm:$0xf]  ;;  %v270_v53 = vld [vmem:[%s705_s20 + $0x30] sm:$0xf] }
  0x1c   : > { %v440_v1 = vmax.f32 %v432_v55, %v304_v24  ;;  %v388_v6 = vsel %vm376_vm0, %v386_v62, %v387_v63  ;;  %v284_v8 = vunpack.c.l.bf16 %v266_v57  ;;  %v285_v9 = vunpack.c.l.bf16 %v267_v58  ;;  %v271_v12 = vld [vmem:[%s705_s20 + $0x34] sm:$0x1]  ;;  %v299_v62 = vld [vmem:[%s710_s23 + $0x28] sm:$0xf] }
  0x1d   : > { %v447_v11 = vmax.f32 %v439_v0, %v304_v24  ;;  %v412_v16 = vmax.f32 %v282_v47, %v388_v6  ;;  %v433_v17 = vmax.f32 %v419_v2, %v388_v6  ;;  %v484_v18 = vsel %vm376_vm0, %v482_v59, %v483_v60  ;;  %v805_v59 = vld [vmem:[%s715_s26 + $0x28] sm:$0xf] }
  0x1e   : > { %v448_v14 = vmax.f32 %v440_v1, %v305_v37  ;;  %v306_v19 = vunpack.c.l.bf16 %v768_v61  ;;  %v334_v20 = vunpack.c.l.bf16 %v771_v4  ;;  %v335_v21 = vunpack.c.l.bf16 %v319_v5  ;;  %v323_v1 = vld [vmem:[%s715_s26 + $0x2c] sm:$0x1] }
  0x1f   : > { %v455_v23 = vmax.f32 %v447_v11, %v328_v13  ;;  %v441_v24 = vmax.f32 %v433_v17, %v305_v37  ;;  %v389_v26 = vrot.slane %v284_v8, 1  ;;  %v354_v28 = vunpack.c.l.bf16 %v346_v15  ;;  %v321_v13 = vld [vmem:[%s715_s26 + $0x24] sm:$0x1]  ;;  %v273_v17 = vld [vmem:[%s705_s20 + $0x3c] sm:$0x1] }
  0x20   : > { %v456_v25 = vmax.f32 %v448_v14, %v330_v40  ;;  %v487_v29 = vsel %vm376_vm0, %v485_v3, %v486_v7  ;;  %v390_v30 = vrot.slane %v285_v9, 1  ;;  %v420_v31 = vmax.f32 %v412_v16, %v284_v8  ;;  %v348_v3 = vld [vmem:[%s720_s29 + $0x20] sm:$0xf]  ;;  %v300_v14 = vld [vmem:[%s710_s23 + $0x30] sm:$0xf] }
  0x21   : > { %v511_v32 = vmax.f32 %v455_v23, %v481_v49  ;;  %v449_v35 = vmax.f32 %v441_v24, %v306_v19  ;;  %v286_v38 = vunpack.c.l.bf16 %v268_v22  ;;  %v488_v39 = vrot.slane %v334_v20, 1  ;;  %v272_v16 = vld [vmem:[%s705_s20 + $0x38] sm:$0xf] }
  0x22   : > { %v512_v33 = vmax.f32 %v456_v25, %v484_v18  ;;  %v391_v37 = vsel %vm376_vm0, %v389_v26, %v390_v30  ;;  %v489_v40 = vrot.slane %v335_v21, 1  ;;  %v287_v41 = vunpack.c.l.bf16 %v269_v27 }
  0x23   : > { %v519_v42 = vmax.f32 %v511_v32, %v352_v34  ;;  %v457_v44 = vmax.f32 %v449_v35, %v332_v52  ;;  %v413_v46 = vmax.f32 %v284_v8, %v391_v37  ;;  %v307_v47 = vunpack.c.l.bf16 %v298_v36  ;;  %v325_v32 = vld [vmem:[%s715_s26 + $0x34] sm:$0x1] }
  0x24   : > { %v520_v43 = vmax.f32 %v512_v33, %v353_v50  ;;  %v434_v48 = vmax.f32 %v420_v31, %v391_v37  ;;  %v336_v49 = vunpack.c.l.bf16 %v787_v10  ;;  %v337_v51 = vunpack.c.l.bf16 %v321_v13  ;;  %v324_v31 = vld [vmem:[%s715_s26 + $0x30] sm:$0xf]  ;;  %v274_v37 = vld [vmem:[%s705_s20 + $0x40] sm:$0xf] }
  0x25   : > { %v527_v34 = vpack.c.bf16 %v519_v42, %v519_v42  ;;  %v513_v52 = vmax.f32 %v457_v44, %v487_v29  ;;  %v392_v54 = vrot.slane %v286_v38, 1  ;;  %v355_v55 = vunpack.c.l.bf16 %v347_v45  ;;  %v275_v44 = vld [vmem:[%s705_s20 + $0x44] sm:$0x1] }
  0x26   : > { %v528_v50 = vpack.c.bf16 %v520_v43, %v520_v43  ;;  %v442_v56 = vmax.f32 %v434_v48, %v306_v19  ;;  %v393_v57 = vrot.slane %v287_v41, 1  ;;  %v421_v58 = vmax.f32 %v413_v46, %v286_v38 }
  0x27   : > { %536 = vst.msk [vmem:[%s799_s7] sm:$0xf] %vm535_vm1, %v527_v34  ;;  %v521_v60 = vmax.f32 %v513_v52, %v354_v28  ;;  %v490_v61 = vsel %vm376_vm0, %v488_v39, %v489_v40  ;;  %v288_v63 = vunpack.c.l.bf16 %v270_v53  ;;  %v289_v0 = vunpack.c.l.bf16 %v271_v12  ;;  %v349_v40 = vld [vmem:[%s720_s29 + $0x28] sm:$0xf]  ;;  %v301_v53 = vld [vmem:[%s710_s23 + $0x38] sm:$0xf] }
  0x28   : > { %537 = vst.msk [vmem:[%s799_s7 + $0x4] sm:$0xf] %vm535_vm1, %v528_v50  ;;  %v450_v2 = vmax.f32 %v442_v56, %v307_v47  ;;  %v394_v5 = vsel %vm376_vm0, %v392_v54, %v393_v57  ;;  %v491_v6 = vrot.slane %v336_v49, 1  ;;  %v492_v7 = vrot.slane %v337_v51, 1 }
  0x29   : > { %v529_v8 = vpack.c.bf16 %v521_v60, %v521_v60  ;;  %v414_v9 = vmax.f32 %v286_v38, %v394_v5  ;;  %v435_v11 = vmax.f32 %v421_v58, %v394_v5  ;;  %v338_v15 = vunpack.c.l.bf16 %v805_v59  ;;  %v326_v58 = vld [vmem:[%s715_s26 + $0x38] sm:$0xf]  ;;  %v327_v59 = vld [vmem:[%s715_s26 + $0x3c] sm:$0x1] }
  0x2a   : > { %v458_v18 = vmax.f32 %v450_v2, %v334_v20  ;;  %v308_v19 = vunpack.c.l.bf16 %v299_v62  ;;  %v339_v21 = vunpack.c.l.bf16 %v323_v1  ;;  %v395_v22 = vrot.slane %v288_v63, 1 }
  0x2b   : > { %538 = vst.msk [vmem:[%s799_s7 + $0x8] sm:$0xf] %vm535_vm1, %v529_v8  ;;  %v356_v23 = vunpack.c.l.bf16 %v348_v3  ;;  %v443_v25 = vmax.f32 %v435_v11, %v307_v47  ;;  %v396_v24 = vrot.slane %v289_v0, 1  ;;  %v422_v26 = vmax.f32 %v414_v9, %v288_v63 }
  0x2c   : > { %v514_v27 = vmax.f32 %v458_v18, %v490_v61  ;;  %v309_v28 = vunpack.c.l.bf16 %v300_v14  ;;  %v290_v29 = vunpack.c.l.bf16 %v272_v16  ;;  %v291_v30 = vunpack.c.l.bf16 %v273_v17 }
  0x2d   : > { %v451_v4 = vmax.f32 %v443_v25, %v308_v19  ;;  %v493_v20 = vsel %vm376_vm0, %v491_v6, %v492_v7  ;;  %v397_v33 = vsel %vm376_vm0, %v395_v22, %v396_v24  ;;  %v494_v35 = vrot.slane %v338_v15, 1  ;;  %v350_v6 = vld [vmem:[%s720_s29 + $0x30] sm:$0xf]  ;;  %v302_v7 = vld [vmem:[%s710_s23 + $0x40] sm:$0xf] }
  0x2e   : > { %v522_v36 = vmax.f32 %v514_v27, %v355_v55  ;;  %v415_v38 = vmax.f32 %v288_v63, %v397_v33  ;;  %v436_v10 = vmax.f32 %v422_v26, %v397_v33  ;;  %v495_v13 = vrot.slane %v339_v21, 1 }
  0x2f   : > { %v459_v39 = vmax.f32 %v451_v4, %v336_v49  ;;  %v340_v41 = vunpack.c.l.bf16 %v324_v31  ;;  %v341_v42 = vunpack.c.l.bf16 %v325_v32  ;;  %v398_v43 = vrot.slane %v290_v29, 1 }
  0x30   : > { %v530_v45 = vpack.c.bf16 %v522_v36, %v522_v36  ;;  %v444_v46 = vmax.f32 %v436_v10, %v308_v19  ;;  %v399_v47 = vrot.slane %v291_v30, 1  ;;  %v423_v48 = vmax.f32 %v415_v38, %v290_v29 }
  0x31   : > { %v515_v51 = vmax.f32 %v459_v39, %v493_v20  ;;  %v292_v12 = vunpack.c.l.bf16 %v274_v37  ;;  %v357_v34 = vunpack.c.l.bf16 %v349_v40  ;;  %v293_v52 = vunpack.c.l.bf16 %v275_v44 }
  0x32   : > { %539 = vst.msk [vmem:[%s799_s7 + $0xc] sm:$0xf] %vm535_vm1, %v530_v45  ;;  %v452_v50 = vmax.f32 %v444_v46, %v309_v28  ;;  %v400_v49 = vsel %vm376_vm0, %v398_v43, %v399_v47  ;;  %v496_v55 = vsel %vm376_vm0, %v494_v35, %v495_v13  ;;  %v310_v61 = vunpack.c.l.bf16 %v301_v53 }
  0x33   : > { %v523_v54 = vmax.f32 %v515_v51, %v356_v23  ;;  %v416_v56 = vmax.f32 %v290_v29, %v400_v49  ;;  %v437_v57 = vmax.f32 %v423_v48, %v400_v49  ;;  %v497_v62 = vrot.slane %v340_v41, 1 }
  0x34   : > { %v460_v60 = vmax.f32 %v452_v50, %v338_v15  ;;  %v498_v63 = vrot.slane %v341_v42, 1  ;;  %v427_v3 = vrot.slane %v292_v12, 1  ;;  %v342_v8 = vunpack.c.l.bf16 %v326_v58 }
  0x35   : > { %v531_v0 = vpack.c.bf16 %v523_v54, %v523_v54  ;;  %v445_v1 = vmax.f32 %v437_v57, %v309_v28  ;;  %v424_v2 = vmax.f32 %v416_v56, %v292_v12  ;;  %v343_v9 = vunpack.c.l.bf16 %v327_v59  ;;  %v351_v28 = vld [vmem:[%s720_s29 + $0x38] sm:$0xf] }
  0x36   : > { %v516_v5 = vmax.f32 %v460_v60, %v496_v55  ;;  %v428_v11 = vrot.slane %v293_v52, 1  ;;  %v499_v15 = vsel %vm376_vm0, %v497_v62, %v498_v63  ;;  %v358_v18 = vunpack.c.l.bf16 %v350_v6 }
  0x37   : > { %540 = vst.msk [vmem:[%s799_s7 + $0x10] sm:$0xf] %vm535_vm1, %v531_v0  ;;  %v453_v14 = vmax.f32 %v445_v1, %v310_v61  ;;  %v311_v21 = vunpack.c.l.bf16 %v302_v7  ;;  %v500_v25 = vrot.slane %v342_v8, 1  ;;  %v501_v24 = vrot.slane %v343_v9, 1 }
  0x38   : > { %v524_v16 = vmax.f32 %v516_v5, %v357_v34  ;;  %v429_v17 = vsel %vm376_vm0, %v427_v3, %v428_v11  ;;  %v359_v4 = vunpack.c.l.bf16 %v351_v28 }
  0x39   : > { %v461_v19 = vmax.f32 %v453_v14, %v340_v41  ;;  %v438_v22 = vmax.f32 %v424_v2, %v429_v17  ;;  %v502_v31 = vsel %vm376_vm0, %v500_v25, %v501_v24 }
  0x3a   : > { %v532_v23 = vpack.c.bf16 %v524_v16, %v524_v16 }
  0x3b   : > { %v517_v26 = vmax.f32 %v461_v19, %v499_v15  ;;  %v446_v27 = vmax.f32 %v438_v22, %v310_v61 }
  0x3c   : > { %541 = vst.msk [vmem:[%s799_s7 + $0x14] sm:$0xf] %vm535_vm1, %v532_v23 }
  0x3d   : > { %v525_v29 = vmax.f32 %v517_v26, %v358_v18  ;;  %v454_v30 = vmax.f32 %v446_v27, %v311_v21 }
  0x3f   : > { %v533_v32 = vpack.c.bf16 %v525_v29, %v525_v29  ;;  %v462_v20 = vmax.f32 %v454_v30, %v342_v8 }
  0x41   : > { %542 = vst.msk [vmem:[%s799_s7 + $0x18] sm:$0xf] %vm535_vm1, %v533_v32  ;;  %v518_v33 = vmax.f32 %v462_v20, %v502_v31 }
  0x43   : > { %v526_v35 = vmax.f32 %v518_v33, %v359_v4 }
  0x45   : > { %v534_v36 = vpack.c.bf16 %v526_v35, %v526_v35 }
  0x47   : > { %543 = vst.msk [vmem:[%s799_s7 + $0x1c] sm:$0xf] %vm535_vm1, %v534_v36 }
  0x48 PF: > { %s14_s15 = sadd.s32 1, %s664_s15  }
  0x49   : > { %p11_p4 = scmp.ge.s32.totalorder %s14_s15, 4  }
  0x4b   :  { %13 = sbr.rel (!%p11_p4) target bundleno = 1 (0x1), region = 75 }

// kernel: resnet50_forward.57
= control target key start
LH: loop header
LB: loop body
LE: loop exit
PB: predicated region body
PF: predicated region fallthrough
CT: control target
= control target key end

     0   :  { %s661_s12 = smov 0   ;;  %s663_s13 = smov 0   ;;  %s731_s0 = inlined_call_operand.vmem [shape: bf16[128,128], index: 0, kind: input, shape index: {}]   ;;  %s732_s1 = inlined_call_operand.vmem [shape: bf16[128,128], index: 1, kind: input, shape index: {}]   ;;  %s733_s2 = inlined_call_operand.vmem [shape: f32[1,128], index: 2, kind: input, shape index: {}]   ;;  %s734_s3 = inlined_call_operand.vmem [shape: bf16[128,128], index: 3, kind: output, shape index: {}]  }
   0x1   :  { %s665_s14 = smov 0  }
   0x2 LB: > { %s25_s15 = sadd.s32 1, %s635_s13  ;;  %p478_p0 = scmp.ge.s32.totalorder %s639_s14, 1  ;;  %s639_s14 = sphi %s665_s14, %s13_s14   ;;  %s635_s13 = sphi %s663_s13, %s736_s13   ;;  %s631_s12 = sphi %s661_s12, %s735_s12  }
   0x3   : > { %p27_p1 = scmp.ge.s32.totalorder %s25_s15, 2  ;;  %p169_p2 = scmp.lt.s32.totalorder %s639_s14, 3 }
   0x5   : > { %s738_s15 = smov (%p27_p1, %s25_s15), 0  ;;  %p170_p3 = pnand %p478_p0, %p169_p2 }
   0x6   : > { %s479_s24 = sshll.u32 (!%p170_p3), %s631_s12, 3 }
   0x7   : > { %173 = sbr.rel (%p170_p3) target bundleno = 191 (0xbf), region = 32  ;;  %p204_p4 = scmp.lt.s32.totalorder (!%p170_p3), %s479_s24, 15 }
   0xc   : > { %v544_v0 = vld [vmem:[%s732_s1 + $0x38] sm:$0xff]  ;;  %v543_v1 = vld [vmem:[%s732_s1 + $0x30] sm:$0xff]  ;;  %v542_v2 = vld [vmem:[%s732_s1 + $0x28] sm:$0xff]  ;;  %s740_s24 = smov (!%p204_p4, %s479_s24), 15 }
   0xd   : > { %325 = vmatpush.bf16.msra.mxu0 %v544_v0  ;;  %568 = vmatpush.bf16.msra.mxu1 %v544_v0  ;;  %v541_v3 = vld [vmem:[%s732_s1 + $0x20] sm:$0xff]  ;;  %v540_v4 = vld [vmem:[%s732_s1 + $0x18] sm:$0xff]  ;;  %v539_v5 = vld [vmem:[%s732_s1 + $0x10] sm:$0xff]  ;;  %s480_s4 = sshll.u32 %s740_s24, 2 }
   0xe   : > { %569 = vmatpush.bf16.msra.mxu2 %v544_v0  ;;  %570 = vmatpush.bf16.msra.mxu3 %v544_v0  ;;  %v538_v6 = vld [vmem:[%s732_s1 + $0x8] sm:$0xff]  ;;  %v537_v7 = vld [vmem:[%s732_s1] sm:$0xff]  ;;  %s207_s9 = scalar_lea.vmem %s731_s0, %s480_s4  ;;  %s223_s17 = scalar_lea.vmem %s734_s3, %s480_s4 }
   0xf   : > { %v533_v8 = vld [vmem:[%s207_s9] sm:$0xff]  ;;  %v534_v9 = vld [vmem:[%s207_s9 + $0x8] sm:$0xff]  ;;  %v535_v10 = vld [vmem:[%s207_s9 + $0x10] sm:$0xff] }
  0x10   : > { %v536_v11 = vld [vmem:[%s207_s9 + $0x18] sm:$0xff]  ;;  %v616_v14 = vld [vmem:[%s733_s2] ss:$0 sm:$0xff] }
  0x11   : > { %326 = vmatpush.bf16.msra.mxu0 %v543_v1  ;;  %571 = vmatpush.bf16.msra.mxu1 %v543_v1 }
  0x12   : > { %572 = vmatpush.bf16.msra.mxu2 %v543_v1  ;;  %573 = vmatpush.bf16.msra.mxu3 %v543_v1 }
  0x15   : > { %327 = vmatpush.bf16.msra.mxu0 %v542_v2  ;;  %574 = vmatpush.bf16.msra.mxu1 %v542_v2 }
  0x16   : > { %575 = vmatpush.bf16.msra.mxu2 %v542_v2  ;;  %576 = vmatpush.bf16.msra.mxu3 %v542_v2 }
  0x19   : > { %328 = vmatpush.bf16.msra.mxu0 %v541_v3  ;;  %577 = vmatpush.bf16.msra.mxu1 %v541_v3 }
  0x1a   : > { %578 = vmatpush.bf16.msra.mxu2 %v541_v3  ;;  %579 = vmatpush.bf16.msra.mxu3 %v541_v3 }
  0x1d   : > { %329 = vmatpush.bf16.msra.mxu0 %v540_v4  ;;  %580 = vmatpush.bf16.msra.mxu1 %v540_v4 }
  0x1e   : > { %581 = vmatpush.bf16.msra.mxu2 %v540_v4  ;;  %582 = vmatpush.bf16.msra.mxu3 %v540_v4 }
  0x21   : > { %330 = vmatpush.bf16.msra.mxu0 %v539_v5  ;;  %583 = vmatpush.bf16.msra.mxu1 %v539_v5 }
  0x22   : > { %584 = vmatpush.bf16.msra.mxu2 %v539_v5  ;;  %585 = vmatpush.bf16.msra.mxu3 %v539_v5 }
  0x25   : > { %331 = vmatpush.bf16.msra.mxu0 %v538_v6  ;;  %586 = vmatpush.bf16.msra.mxu1 %v538_v6 }
  0x26   : > { %587 = vmatpush.bf16.msra.mxu2 %v538_v6  ;;  %588 = vmatpush.bf16.msra.mxu3 %v538_v6 }
  0x29   : > { %332 = vmatpush.bf16.msra.mxu0 %v537_v7  ;;  %589 = vmatpush.bf16.msra.mxu1 %v537_v7 }
  0x2a   : > { %590 = vmatpush.bf16.msra.mxu2 %v537_v7  ;;  %591 = vmatpush.bf16.msra.mxu3 %v537_v7 }
  0x2c   : > { %333 = vmatmul.bf16.vlgmr.msra.gmra.mxu0 %v533_v8  ;;  %338 = vmatmul.bf16.vlgmr.msra.gmra.mxu1 %v534_v9 }
  0x2d   : > { %343 = vmatmul.bf16.vlgmr.msra.gmra.mxu2 %v535_v10  ;;  %348 = vmatmul.bf16.vlgmr.msra.gmra.mxu3 %v536_v11 }
  0xa9   : > { %v334_v12 = vpop.f32.mrf.mxu0  ;;  %v339_v13 = vpop.f32.mrf.mxu1 }
  0xaa   : > { %v335_v19 = vadd.f32 %v616_v14, %v334_v12  ;;  %v340_v20 = vadd.f32 %v616_v14, %v339_v13 }
  0xb0   : > { %v344_v15 = vpop.f32.mrf.mxu2  ;;  %v349_v16 = vpop.f32.mrf.mxu3 }
  0xb1   : > { %v336_v17 = vpop.f32.mrf.mxu0  ;;  %v341_v18 = vpop.f32.mrf.mxu1  ;;  %v345_v27 = vadd.f32 %v616_v14, %v344_v15  ;;  %v350_v28 = vadd.f32 %v616_v14, %v349_v16 }
  0xb2   : > { %v337_v21 = vadd.f32 %v616_v14, %v336_v17  ;;  %v342_v22 = vadd.f32 %v616_v14, %v341_v18 }
  0xb4   : > { %v548_v23 = vpack.c.bf16 %v337_v21, %v335_v19  ;;  %v553_v24 = vpack.c.bf16 %v342_v22, %v340_v20 }
  0xb6   : > { %549 = vst [vmem:[%s223_s17] sm:$0xff] %v548_v23  }
  0xb7   : > { %565 = vst [vmem:[%s223_s17 + $0x8] sm:$0xff] %v553_v24  }
  0xb8   : > { %v346_v25 = vpop.f32.mrf.mxu2  ;;  %v351_v26 = vpop.f32.mrf.mxu3 }
  0xb9   : > { %v347_v29 = vadd.f32 %v616_v14, %v346_v25  ;;  %v352_v30 = vadd.f32 %v616_v14, %v351_v26 }
  0xbb   : > { %v558_v31 = vpack.c.bf16 %v347_v29, %v345_v27  ;;  %v563_v32 = vpack.c.bf16 %v352_v30, %v350_v28 }
  0xbd   : > { %566 = vst [vmem:[%s223_s17 + $0x10] sm:$0xff] %v558_v31  }
  0xbe   : > { %567 = vst [vmem:[%s223_s17 + $0x18] sm:$0xff] %v563_v32  }
  0xbf PF: > { %s13_s14 = sadd.s32 1, %s639_s14   ;;  %s735_s12 = smov %s635_s13 }
  0xc0   : > { %p10_p5 = scmp.ge.s32.totalorder %s13_s14, 4   ;;  %s736_s13 = smov %s738_s15 }
  0xc2   :  { %12 = sbr.rel (!%p10_p5) target bundleno = 2 (0x2), region = 68 }

// kernel: resnet50_forward.60
= control target key start
LH: loop header
LB: loop body
LE: loop exit
PB: predicated region body
PF: predicated region fallthrough
CT: control target
= control target key end

     0   :  { %s794_s15 = smov 0   ;;  %s796_s16 = smov 0   ;;  %s865_s0 = inlined_call_operand.vmem [shape: bf16[128,128], index: 0, kind: input, shape index: {}]   ;;  %s866_s1 = inlined_call_operand.vmem [shape: bf16[128,128], index: 1, kind: input, shape index: {}]   ;;  %s867_s2 = inlined_call_operand.vmem [shape: f32[1,128], index: 2, kind: input, shape index: {}]   ;;  %s868_s3 = inlined_call_operand.vmem [shape: bf16[128,128], index: 3, kind: input, shape index: {}]   ;;  %s869_s4 = inlined_call_operand.vmem [shape: bf16[128,128], index: 4, kind: output, shape index: {}]  }
   0x1   :  { %s798_s17 = smov 0  }
   0x2 LB: > { %s26_s18 = sadd.s32 1, %s763_s16  ;;  %p585_p0 = scmp.ge.s32.totalorder %s767_s17, 1  ;;  %s767_s17 = sphi %s798_s17, %s14_s17   ;;  %s763_s16 = sphi %s796_s16, %s871_s16   ;;  %s759_s15 = sphi %s794_s15, %s870_s15  }
   0x3   : > { %p28_p1 = scmp.ge.s32.totalorder %s26_s18, 2  ;;  %p210_p2 = scmp.lt.s32.totalorder %s767_s17, 3 }
   0x5   : > { %s873_s18 = smov (%p28_p1, %s26_s18), 0  ;;  %p211_p3 = pnand %p585_p0, %p210_p2 }
   0x6   : > { %s586_s27 = sshll.u32 (!%p211_p3), %s759_s15, 3 }
   0x7   : > { %214 = sbr.rel (%p211_p3) target bundleno = 195 (0xc3), region = 36  ;;  %p255_p4 = scmp.lt.s32.totalorder (!%p211_p3), %s586_s27, 15 }
   0xc   : > { %v653_v0 = vld [vmem:[%s866_s1 + $0x38] sm:$0xff]  ;;  %v652_v1 = vld [vmem:[%s866_s1 + $0x30] sm:$0xff]  ;;  %v651_v2 = vld [vmem:[%s866_s1 + $0x28] sm:$0xff]  ;;  %s875_s27 = smov (!%p255_p4, %s586_s27), 15 }
   0xd   : > { %385 = vmatpush.bf16.msra.mxu0 %v653_v0  ;;  %696 = vmatpush.bf16.msra.mxu1 %v653_v0  ;;  %v650_v3 = vld [vmem:[%s866_s1 + $0x20] sm:$0xff]  ;;  %v649_v4 = vld [vmem:[%s866_s1 + $0x18] sm:$0xff]  ;;  %v648_v5 = vld [vmem:[%s866_s1 + $0x10] sm:$0xff]  ;;  %s836_s8 = sshll.u32 %s875_s27, 2 }
   0xe   : > { %697 = vmatpush.bf16.msra.mxu2 %v653_v0  ;;  %698 = vmatpush.bf16.msra.mxu3 %v653_v0  ;;  %v647_v6 = vld [vmem:[%s866_s1 + $0x8] sm:$0xff]  ;;  %v646_v7 = vld [vmem:[%s866_s1] sm:$0xff]  ;;  %s258_s13 = scalar_lea.vmem %s865_s0, %s836_s8  ;;  %s274_s19 = scalar_lea.vmem %s868_s3, %s836_s8 }
   0xf   : > { %v642_v8 = vld [vmem:[%s258_s13] sm:$0xff]  ;;  %v643_v9 = vld [vmem:[%s258_s13 + $0x8] sm:$0xff]  ;;  %v644_v10 = vld [vmem:[%s258_s13 + $0x10] sm:$0xff]  ;;  %s283_s24 = scalar_lea.vmem %s869_s4, %s836_s8 }
  0x10   : > { %v645_v11 = vld [vmem:[%s258_s13 + $0x18] sm:$0xff]  ;;  %v744_v14 = vld [vmem:[%s867_s2] ss:$0 sm:$0xff]  ;;  %v690_v16 = vld [vmem:[%s274_s19 + $0x8] sm:$0xff]  }
  0x11   : > { %386 = vmatpush.bf16.msra.mxu0 %v652_v1  ;;  %699 = vmatpush.bf16.msra.mxu1 %v652_v1  ;;  %v655_v15 = vld [vmem:[%s274_s19] sm:$0xff]   ;;  %v660_v20 = vunpack.c.l.bf16 %v690_v16  ;;  %v661_v24 = vunpack.c.h.bf16 %v690_v16  ;;  %v691_v29 = vld [vmem:[%s274_s19 + $0x10] sm:$0xff]   ;;  %v692_v30 = vld [vmem:[%s274_s19 + $0x18] sm:$0xff]  }
  0x12   : > { %700 = vmatpush.bf16.msra.mxu2 %v652_v1  ;;  %701 = vmatpush.bf16.msra.mxu3 %v652_v1  ;;  %v656_v18 = vunpack.c.l.bf16 %v655_v15  ;;  %v657_v23 = vunpack.c.h.bf16 %v655_v15  ;;  %v664_v36 = vunpack.c.l.bf16 %v691_v29  ;;  %v668_v38 = vunpack.c.l.bf16 %v692_v30 }
  0x13   : > { %v665_v43 = vunpack.c.h.bf16 %v691_v29  ;;  %v669_v44 = vunpack.c.h.bf16 %v692_v30 }
  0x15   : > { %387 = vmatpush.bf16.msra.mxu0 %v651_v2  ;;  %702 = vmatpush.bf16.msra.mxu1 %v651_v2 }
  0x16   : > { %703 = vmatpush.bf16.msra.mxu2 %v651_v2  ;;  %704 = vmatpush.bf16.msra.mxu3 %v651_v2 }
  0x19   : > { %388 = vmatpush.bf16.msra.mxu0 %v650_v3  ;;  %705 = vmatpush.bf16.msra.mxu1 %v650_v3 }
  0x1a   : > { %706 = vmatpush.bf16.msra.mxu2 %v650_v3  ;;  %707 = vmatpush.bf16.msra.mxu3 %v650_v3 }
  0x1d   : > { %389 = vmatpush.bf16.msra.mxu0 %v649_v4  ;;  %708 = vmatpush.bf16.msra.mxu1 %v649_v4 }
  0x1e   : > { %709 = vmatpush.bf16.msra.mxu2 %v649_v4  ;;  %710 = vmatpush.bf16.msra.mxu3 %v649_v4 }
  0x21   : > { %390 = vmatpush.bf16.msra.mxu0 %v648_v5  ;;  %711 = vmatpush.bf16.msra.mxu1 %v648_v5 }
  0x22   : > { %712 = vmatpush.bf16.msra.mxu2 %v648_v5  ;;  %713 = vmatpush.bf16.msra.mxu3 %v648_v5 }
  0x25   : > { %391 = vmatpush.bf16.msra.mxu0 %v647_v6  ;;  %714 = vmatpush.bf16.msra.mxu1 %v647_v6 }
  0x26   : > { %715 = vmatpush.bf16.msra.mxu2 %v647_v6  ;;  %716 = vmatpush.bf16.msra.mxu3 %v647_v6 }
  0x29   : > { %392 = vmatpush.bf16.msra.mxu0 %v646_v7  ;;  %717 = vmatpush.bf16.msra.mxu1 %v646_v7 }
  0x2a   : > { %718 = vmatpush.bf16.msra.mxu2 %v646_v7  ;;  %719 = vmatpush.bf16.msra.mxu3 %v646_v7 }
  0x2c   : > { %393 = vmatmul.bf16.vlgmr.msra.gmra.mxu0 %v642_v8  ;;  %398 = vmatmul.bf16.vlgmr.msra.gmra.mxu1 %v643_v9 }
  0x2d   : > { %403 = vmatmul.bf16.vlgmr.msra.gmra.mxu2 %v644_v10  ;;  %408 = vmatmul.bf16.vlgmr.msra.gmra.mxu3 %v645_v11 }
  0xa9   : > { %v394_v12 = vpop.f32.mrf.mxu0  ;;  %v399_v13 = vpop.f32.mrf.mxu1 }
  0xaa   : > { %v395_v17 = vadd.f32 %v744_v14, %v394_v12  ;;  %v400_v19 = vadd.f32 %v744_v14, %v399_v13 }
  0xac   : > { %v430_v27 = vadd.f32 %v656_v18, %v395_v17  ;;  %v432_v28 = vadd.f32 %v660_v20, %v400_v19 }
  0xae   : > { %v438_v39 = vmax.f32 %v430_v27, 0.0  ;;  %v440_v40 = vmax.f32 %v432_v28, 0.0 }
  0xb0   : > { %v404_v21 = vpop.f32.mrf.mxu2  ;;  %v409_v22 = vpop.f32.mrf.mxu3 }
  0xb1   : > { %v396_v25 = vpop.f32.mrf.mxu0  ;;  %v401_v26 = vpop.f32.mrf.mxu1  ;;  %v405_v35 = vadd.f32 %v744_v14, %v404_v21  ;;  %v410_v37 = vadd.f32 %v744_v14, %v409_v22 }
  0xb2   : > { %v397_v31 = vadd.f32 %v744_v14, %v396_v25  ;;  %v402_v32 = vadd.f32 %v744_v14, %v401_v26 }
  0xb3   : > { %v434_v49 = vadd.f32 %v664_v36, %v405_v35  ;;  %v436_v50 = vadd.f32 %v668_v38, %v410_v37 }
  0xb4   : > { %v431_v33 = vadd.f32 %v657_v23, %v397_v31  ;;  %v433_v34 = vadd.f32 %v661_v24, %v402_v32 }
  0xb5   : > { %v442_v55 = vmax.f32 %v434_v49, 0.0  ;;  %v444_v56 = vmax.f32 %v436_v50, 0.0 }
  0xb6   : > { %v439_v41 = vmax.f32 %v431_v33, 0.0  ;;  %v441_v42 = vmax.f32 %v433_v34, 0.0 }
  0xb8   : > { %v673_v45 = vpack.c.bf16 %v439_v41, %v438_v39  ;;  %v678_v46 = vpack.c.bf16 %v441_v42, %v440_v40  ;;  %v406_v47 = vpop.f32.mrf.mxu2  ;;  %v411_v48 = vpop.f32.mrf.mxu3 }
  0xb9   : > { %v407_v51 = vadd.f32 %v744_v14, %v406_v47  ;;  %v412_v52 = vadd.f32 %v744_v14, %v411_v48 }
  0xba   : > { %674 = vst [vmem:[%s283_s24] sm:$0xff] %v673_v45  }
  0xbb   : > { %693 = vst [vmem:[%s283_s24 + $0x8] sm:$0xff] %v678_v46   ;;  %v435_v53 = vadd.f32 %v665_v43, %v407_v51  ;;  %v437_v54 = vadd.f32 %v669_v44, %v412_v52 }
  0xbd   : > { %v443_v57 = vmax.f32 %v435_v53, 0.0  ;;  %v445_v58 = vmax.f32 %v437_v54, 0.0 }
  0xbf   : > { %v683_v59 = vpack.c.bf16 %v443_v57, %v442_v55  ;;  %v688_v60 = vpack.c.bf16 %v445_v58, %v444_v56 }
  0xc1   : > { %694 = vst [vmem:[%s283_s24 + $0x10] sm:$0xff] %v683_v59  }
  0xc2   : > { %695 = vst [vmem:[%s283_s24 + $0x18] sm:$0xff] %v688_v60  }
  0xc3 PF: > { %s14_s17 = sadd.s32 1, %s767_s17   ;;  %s870_s15 = smov %s763_s16 }
  0xc4   : > { %p11_p5 = scmp.ge.s32.totalorder %s14_s17, 4   ;;  %s871_s16 = smov %s873_s18 }
  0xc6   :  { %13 = sbr.rel (!%p11_p5) target bundleno = 2 (0x2), region = 75 }

// kernel: resnet50_forward.69
= control target key start
LH: loop header
LB: loop body
LE: loop exit
PB: predicated region body
PF: predicated region fallthrough
CT: control target
= control target key end

     0   :  { %s453_s1 = inlined_call_operand.vmem [shape: bf16[256,128], index: 1, kind: input, shape index: {}]   ;;  %s454_s2 = inlined_call_operand.vmem [shape: f32[1,128], index: 2, kind: input, shape index: {}]   ;;  %s455_s0 = inlined_call_operand.vmem [shape: bf16[32,256], index: 0, kind: input, shape index: {}]   ;;  %s456_s3 = inlined_call_operand.vmem [shape: bf16[32,128], index: 3, kind: output, shape index: {}]  }
   0x1   :  { %v315_v0 = vld [vmem:[%s453_s1 + $0x38] sm:$0xff]  ;;  %v314_v2 = vld [vmem:[%s453_s1 + $0x30] sm:$0xff]  ;;  %v313_v4 = vld [vmem:[%s453_s1 + $0x28] sm:$0xff] }
   0x2   :  { %v323_v1 = vld [vmem:[%s453_s1 + $0x78] sm:$0xff]  ;;  %170 = vmatpush.bf16.msra.mxu0 %v315_v0  ;;  %335 = vmatpush.bf16.msra.mxu2 %v315_v0  ;;  %v322_v3 = vld [vmem:[%s453_s1 + $0x70] sm:$0xff]  ;;  %v321_v5 = vld [vmem:[%s453_s1 + $0x68] sm:$0xff] }
   0x3   :  { %189 = vmatpush.bf16.msra.mxu1 %v323_v1  ;;  %343 = vmatpush.bf16.msra.mxu3 %v323_v1  ;;  %v312_v6 = vld [vmem:[%s453_s1 + $0x20] sm:$0xff]  ;;  %v311_v8 = vld [vmem:[%s453_s1 + $0x18] sm:$0xff]  ;;  %v310_v10 = vld [vmem:[%s453_s1 + $0x10] sm:$0xff] }
   0x4   :  { %v320_v7 = vld [vmem:[%s453_s1 + $0x60] sm:$0xff]  ;;  %v319_v9 = vld [vmem:[%s453_s1 + $0x58] sm:$0xff]  ;;  %v318_v11 = vld [vmem:[%s453_s1 + $0x50] sm:$0xff] }
   0x5   :  { %v309_v12 = vld [vmem:[%s453_s1 + $0x8] sm:$0xff]  ;;  %v308_v14 = vld [vmem:[%s453_s1] sm:$0xff]  ;;  %v234_v18 = vld [vmem:[%s455_s0 + $0x10] sm:$0xf] }
   0x6   :  { %171 = vmatpush.bf16.msra.mxu0 %v314_v2  ;;  %336 = vmatpush.bf16.msra.mxu2 %v314_v2  ;;  %v317_v13 = vld [vmem:[%s453_s1 + $0x48] sm:$0xff]  ;;  %v316_v15 = vld [vmem:[%s453_s1 + $0x40] sm:$0xff]  ;;  %v307_v19 = vld [vmem:[%s455_s0 + $0x14] sm:$0xf0] }
   0x7   :  { %190 = vmatpush.bf16.msra.mxu1 %v322_v3  ;;  %344 = vmatpush.bf16.msra.mxu3 %v322_v3  ;;  %v226_v16 = vld [vmem:[%s455_s0] sm:$0xf]  ;;  %v305_v17 = vld [vmem:[%s455_s0 + $0x4] sm:$0xf0]  ;;  %v304_v20 = vld [vmem:[%s455_s0 + $0x4] sm:$0xf]  ;;  %v235_v25 = vor.u32 %v307_v19, %v234_v18 }
   0x8   :  { %v228_v21 = vld [vmem:[%s455_s0 + $0x8] sm:$0xf0]  ;;  %v306_v22 = vld [vmem:[%s455_s0 + $0x14] sm:$0xf]  ;;  %v236_v23 = vld [vmem:[%s455_s0 + $0x18] sm:$0xf0]  ;;  %v227_v24 = vor.u32 %v305_v17, %v226_v16 }
   0x9   :  { %v231_v26 = vor.u32 %v304_v20, %v228_v21  ;;  %v239_v27 = vor.u32 %v306_v22, %v236_v23  ;;  %v351_v29 = vld [vmem:[%s454_s2] ss:$0 sm:$0xff] }
   0xa   :  { %172 = vmatpush.bf16.msra.mxu0 %v313_v4  ;;  %337 = vmatpush.bf16.msra.mxu2 %v313_v4 }
   0xb   :  { %191 = vmatpush.bf16.msra.mxu1 %v321_v5  ;;  %345 = vmatpush.bf16.msra.mxu3 %v321_v5 }
   0xe   :  { %173 = vmatpush.bf16.msra.mxu0 %v312_v6  ;;  %338 = vmatpush.bf16.msra.mxu2 %v312_v6 }
   0xf   :  { %192 = vmatpush.bf16.msra.mxu1 %v320_v7  ;;  %346 = vmatpush.bf16.msra.mxu3 %v320_v7 }
  0x12   :  { %174 = vmatpush.bf16.msra.mxu0 %v311_v8  ;;  %339 = vmatpush.bf16.msra.mxu2 %v311_v8 }
  0x13   :  { %193 = vmatpush.bf16.msra.mxu1 %v319_v9  ;;  %347 = vmatpush.bf16.msra.mxu3 %v319_v9 }
  0x16   :  { %175 = vmatpush.bf16.msra.mxu0 %v310_v10  ;;  %340 = vmatpush.bf16.msra.mxu2 %v310_v10 }
  0x17   :  { %194 = vmatpush.bf16.msra.mxu1 %v318_v11  ;;  %348 = vmatpush.bf16.msra.mxu3 %v318_v11 }
  0x1a   :  { %176 = vmatpush.bf16.msra.mxu0 %v309_v12  ;;  %341 = vmatpush.bf16.msra.mxu2 %v309_v12 }
  0x1b   :  { %195 = vmatpush.bf16.msra.mxu1 %v317_v13  ;;  %349 = vmatpush.bf16.msra.mxu3 %v317_v13 }
  0x1e   :  { %177 = vmatpush.bf16.msra.mxu0 %v308_v14  ;;  %342 = vmatpush.bf16.msra.mxu2 %v308_v14 }
  0x1f   :  { %196 = vmatpush.bf16.msra.mxu1 %v316_v15  ;;  %350 = vmatpush.bf16.msra.mxu3 %v316_v15 }
  0x21   :  { %178 = vmatmul.bf16.vlgmr.msra.gmra.mxu0 %v227_v24  ;;  %183 = vmatmul.bf16.vlgmr.msra.gmra.mxu2 %v235_v25 }
  0x22   :  { %197 = vmatmul.bf16.vlgmr.msra.gmra.mxu1 %v231_v26  ;;  %202 = vmatmul.bf16.vlgmr.msra.gmra.mxu3 %v239_v27 }
  0x9e   :  { %v179_v28 = vpop.f32.mrf.mxu0 }
  0x9f   :  { %v198_v30 = vpop.f32.mrf.mxu1  ;;  %v180_v31 = vadd.f32 %v351_v29, %v179_v28 }
  0xa1   :  { %v199_v35 = vadd.f32 %v198_v30, %v180_v31 }
  0xa3   :  { %v208_v40 = vmax.f32 %v199_v35, 0.0 }
  0xa4   :  { %v184_v32 = vpop.f32.mrf.mxu2 }
  0xa5   :  { %v203_v33 = vpop.f32.mrf.mxu3  ;;  %v185_v38 = vadd.f32 %v351_v29, %v184_v32 }
  0xa6   :  { %v181_v34 = vpop.f32.mrf.mxu0 }
  0xa7   :  { %v182_v36 = vadd.f32 %v351_v29, %v181_v34  ;;  %v200_v37 = vpop.f32.mrf.mxu1  ;;  %v204_v43 = vadd.f32 %v203_v33, %v185_v38 }
  0xa9   :  { %v201_v39 = vadd.f32 %v200_v37, %v182_v36  ;;  %v210_v48 = vmax.f32 %v204_v43, 0.0 }
  0xab   :  { %v209_v41 = vmax.f32 %v201_v39, 0.0 }
  0xac   :  { %v186_v42 = vpop.f32.mrf.mxu2 }
  0xad   :  { %v327_v44 = vpack.c.bf16 %v209_v41, %v208_v40  ;;  %v187_v45 = vadd.f32 %v351_v29, %v186_v42  ;;  %v205_v46 = vpop.f32.mrf.mxu3 }
  0xaf   :  { %328 = vst [vmem:[%s456_s3] sm:$0xff] %v327_v44   ;;  %v206_v47 = vadd.f32 %v205_v46, %v187_v45 }
  0xb1   :  { %v211_v49 = vmax.f32 %v206_v47, 0.0 }
  0xb3   :  { %v332_v50 = vpack.c.bf16 %v211_v49, %v210_v48 }
  0xb5   :  { %334 = vst [vmem:[%s456_s3 + $0x8] sm:$0xff] %v332_v50  }

// kernel: resnet50_forward.70
= control target key start
LH: loop header
LB: loop body
LE: loop exit
PB: predicated region body
PF: predicated region fallthrough
CT: control target
= control target key end

     0   :  { %s297_s1 = inlined_call_operand.vmem [shape: bf16[128,128], index: 1, kind: input, shape index: {}]   ;;  %s298_s2 = inlined_call_operand.vmem [shape: f32[1,128], index: 2, kind: input, shape index: {}]   ;;  %s299_s0 = inlined_call_operand.vmem [shape: bf16[32,128], index: 0, kind: input, shape index: {}]   ;;  %s300_s3 = inlined_call_operand.vmem [shape: bf16[32,128], index: 3, kind: input, shape index: {}]   ;;  %s301_s4 = inlined_call_operand.vmem [shape: bf16[32,128], index: 4, kind: output, shape index: {}]  }
   0x1   :  { %v197_v0 = vld [vmem:[%s297_s1 + $0x38] sm:$0xff]  ;;  %v196_v1 = vld [vmem:[%s297_s1 + $0x30] sm:$0xff]  ;;  %v195_v2 = vld [vmem:[%s297_s1 + $0x28] sm:$0xff] }
   0x2   :  { %101 = vmatpush.bf16.msra.mxu0 %v197_v0  ;;  %218 = vmatpush.bf16.msra.mxu1 %v197_v0  ;;  %v194_v3 = vld [vmem:[%s297_s1 + $0x20] sm:$0xff]  ;;  %v193_v4 = vld [vmem:[%s297_s1 + $0x18] sm:$0xff]  ;;  %v192_v5 = vld [vmem:[%s297_s1 + $0x10] sm:$0xff] }
   0x3   :  { %v191_v6 = vld [vmem:[%s297_s1 + $0x8] sm:$0xff]  ;;  %v190_v7 = vld [vmem:[%s297_s1] sm:$0xff] }
   0x4   :  { %v188_v8 = vld [vmem:[%s299_s0] sm:$0xff]  ;;  %v189_v9 = vld [vmem:[%s299_s0 + $0x8] sm:$0xff] }
   0x5   :  { %v226_v12 = vld [vmem:[%s298_s2] ss:$0 sm:$0xff]  ;;  %v216_v14 = vld [vmem:[%s300_s3 + $0x8] sm:$0xff]  }
   0x6   :  { %102 = vmatpush.bf16.msra.mxu0 %v196_v1  ;;  %219 = vmatpush.bf16.msra.mxu1 %v196_v1  ;;  %v199_v13 = vld [vmem:[%s300_s3] sm:$0xff]   ;;  %v204_v18 = vunpack.c.l.bf16 %v216_v14  ;;  %v205_v20 = vunpack.c.h.bf16 %v216_v14 }
   0x7   :  { %v200_v16 = vunpack.c.l.bf16 %v199_v13  ;;  %v201_v19 = vunpack.c.h.bf16 %v199_v13 }
   0xa   :  { %103 = vmatpush.bf16.msra.mxu0 %v195_v2  ;;  %220 = vmatpush.bf16.msra.mxu1 %v195_v2 }
   0xe   :  { %104 = vmatpush.bf16.msra.mxu0 %v194_v3  ;;  %221 = vmatpush.bf16.msra.mxu1 %v194_v3 }
  0x12   :  { %105 = vmatpush.bf16.msra.mxu0 %v193_v4  ;;  %222 = vmatpush.bf16.msra.mxu1 %v193_v4 }
  0x16   :  { %106 = vmatpush.bf16.msra.mxu0 %v192_v5  ;;  %223 = vmatpush.bf16.msra.mxu1 %v192_v5 }
  0x1a   :  { %107 = vmatpush.bf16.msra.mxu0 %v191_v6  ;;  %224 = vmatpush.bf16.msra.mxu1 %v191_v6 }
  0x1e   :  { %108 = vmatpush.bf16.msra.mxu0 %v190_v7  ;;  %225 = vmatpush.bf16.msra.mxu1 %v190_v7 }
  0x21   :  { %109 = vmatmul.bf16.vlgmr.msra.gmra.mxu0 %v188_v8  ;;  %114 = vmatmul.bf16.vlgmr.msra.gmra.mxu1 %v189_v9 }
  0x9e   :  { %v110_v10 = vpop.f32.mrf.mxu0  ;;  %v115_v11 = vpop.f32.mrf.mxu1 }
  0x9f   :  { %v111_v15 = vadd.f32 %v226_v12, %v110_v10  ;;  %v116_v17 = vadd.f32 %v226_v12, %v115_v11 }
  0xa1   :  { %v128_v23 = vadd.f32 %v200_v16, %v111_v15  ;;  %v130_v24 = vadd.f32 %v204_v18, %v116_v17 }
  0xa3   :  { %v132_v29 = vmax.f32 %v128_v23, 0.0  ;;  %v134_v30 = vmax.f32 %v130_v24, 0.0 }
  0xa6   :  { %v112_v21 = vpop.f32.mrf.mxu0  ;;  %v117_v22 = vpop.f32.mrf.mxu1 }
  0xa7   :  { %v113_v25 = vadd.f32 %v226_v12, %v112_v21  ;;  %v118_v26 = vadd.f32 %v226_v12, %v117_v22 }
  0xa9   :  { %v129_v27 = vadd.f32 %v201_v19, %v113_v25  ;;  %v131_v28 = vadd.f32 %v205_v20, %v118_v26 }
  0xab   :  { %v133_v31 = vmax.f32 %v129_v27, 0.0  ;;  %v135_v32 = vmax.f32 %v131_v28, 0.0 }
  0xad   :  { %v209_v33 = vpack.c.bf16 %v133_v31, %v132_v29  ;;  %v214_v34 = vpack.c.bf16 %v135_v32, %v134_v30 }
  0xaf   :  { %210 = vst [vmem:[%s301_s4] sm:$0xff] %v209_v33  }
  0xb0   :  { %217 = vst [vmem:[%s301_s4 + $0x8] sm:$0xff] %v214_v34  }

// kernel: resnet50_forward.71
= control target key start
LH: loop header
LB: loop body
LE: loop exit
PB: predicated region body
PF: predicated region fallthrough
CT: control target
= control target key end

     0   :  { %s262_s1 = inlined_call_operand.vmem [shape: bf16[128,128], index: 1, kind: input, shape index: {}]   ;;  %s263_s2 = inlined_call_operand.vmem [shape: f32[1,128], index: 2, kind: input, shape index: {}]   ;;  %s264_s0 = inlined_call_operand.vmem [shape: bf16[32,128], index: 0, kind: input, shape index: {}]   ;;  %s265_s3 = inlined_call_operand.vmem [shape: bf16[32,128], index: 3, kind: output, shape index: {}]  }
   0x1   :  { %v182_v0 = vld [vmem:[%s262_s1 + $0x38] sm:$0xff]  ;;  %v181_v1 = vld [vmem:[%s262_s1 + $0x30] sm:$0xff]  ;;  %v180_v2 = vld [vmem:[%s262_s1 + $0x28] sm:$0xff] }
   0x2   :  { %98 = vmatpush.bf16.msra.mxu0 %v182_v0  ;;  %194 = vmatpush.bf16.msra.mxu1 %v182_v0  ;;  %v179_v3 = vld [vmem:[%s262_s1 + $0x20] sm:$0xff]  ;;  %v178_v4 = vld [vmem:[%s262_s1 + $0x18] sm:$0xff]  ;;  %v177_v5 = vld [vmem:[%s262_s1 + $0x10] sm:$0xff] }
   0x3   :  { %v176_v6 = vld [vmem:[%s262_s1 + $0x8] sm:$0xff]  ;;  %v175_v7 = vld [vmem:[%s262_s1] sm:$0xff] }
   0x4   :  { %v173_v8 = vld [vmem:[%s264_s0] sm:$0xff]  ;;  %v174_v9 = vld [vmem:[%s264_s0 + $0x8] sm:$0xff] }
   0x5   :  { %v202_v12 = vld [vmem:[%s263_s2] ss:$0 sm:$0xff] }
   0x6   :  { %99 = vmatpush.bf16.msra.mxu0 %v181_v1  ;;  %195 = vmatpush.bf16.msra.mxu1 %v181_v1 }
   0xa   :  { %100 = vmatpush.bf16.msra.mxu0 %v180_v2  ;;  %196 = vmatpush.bf16.msra.mxu1 %v180_v2 }
   0xe   :  { %101 = vmatpush.bf16.msra.mxu0 %v179_v3  ;;  %197 = vmatpush.bf16.msra.mxu1 %v179_v3 }
  0x12   :  { %102 = vmatpush.bf16.msra.mxu0 %v178_v4  ;;  %198 = vmatpush.bf16.msra.mxu1 %v178_v4 }
  0x16   :  { %103 = vmatpush.bf16.msra.mxu0 %v177_v5  ;;  %199 = vmatpush.bf16.msra.mxu1 %v177_v5 }
  0x1a   :  { %104 = vmatpush.bf16.msra.mxu0 %v176_v6  ;;  %200 = vmatpush.bf16.msra.mxu1 %v176_v6 }
  0x1e   :  { %105 = vmatpush.bf16.msra.mxu0 %v175_v7  ;;  %201 = vmatpush.bf16.msra.mxu1 %v175_v7 }
  0x21   :  { %106 = vmatmul.bf16.vlgmr.msra.gmra.mxu0 %v173_v8  ;;  %111 = vmatmul.bf16.vlgmr.msra.gmra.mxu1 %v174_v9 }
  0x9e   :  { %v107_v10 = vpop.f32.mrf.mxu0  ;;  %v112_v11 = vpop.f32.mrf.mxu1 }
  0x9f   :  { %v108_v13 = vadd.f32 %v202_v12, %v107_v10  ;;  %v113_v14 = vadd.f32 %v202_v12, %v112_v11 }
  0xa1   :  { %v117_v19 = vmax.f32 %v108_v13, 0.0  ;;  %v119_v20 = vmax.f32 %v113_v14, 0.0 }
  0xa6   :  { %v109_v15 = vpop.f32.mrf.mxu0  ;;  %v114_v16 = vpop.f32.mrf.mxu1 }
  0xa7   :  { %v110_v17 = vadd.f32 %v202_v12, %v109_v15  ;;  %v115_v18 = vadd.f32 %v202_v12, %v114_v16 }
  0xa9   :  { %v118_v21 = vmax.f32 %v110_v17, 0.0  ;;  %v120_v22 = vmax.f32 %v115_v18, 0.0 }
  0xab   :  { %v186_v23 = vpack.c.bf16 %v118_v21, %v117_v19  ;;  %v191_v24 = vpack.c.bf16 %v120_v22, %v119_v20 }
  0xad   :  { %187 = vst [vmem:[%s265_s3] sm:$0xff] %v186_v23  }
  0xae   :  { %193 = vst [vmem:[%s265_s3 + $0x8] sm:$0xff] %v191_v24  }

// kernel: resnet50_forward.67
= control target key start
LH: loop header
LB: loop body
LE: loop exit
PB: predicated region body
PF: predicated region fallthrough
CT: control target
= control target key end

     0   :  { %s258_s1 = inlined_call_operand.vmem [shape: bf16[128,128], index: 1, kind: input, shape index: {}]   ;;  %s259_s2 = inlined_call_operand.vmem [shape: f32[1,128], index: 2, kind: input, shape index: {}]   ;;  %s260_s0 = inlined_call_operand.vmem [shape: bf16[32,128], index: 0, kind: input, shape index: {}]   ;;  %s261_s3 = inlined_call_operand.vmem [shape: bf16[32,128], index: 3, kind: output, shape index: {}]  }
   0x1   :  { %v178_v0 = vld [vmem:[%s258_s1 + $0x38] sm:$0xff]  ;;  %v177_v1 = vld [vmem:[%s258_s1 + $0x30] sm:$0xff]  ;;  %v176_v2 = vld [vmem:[%s258_s1 + $0x28] sm:$0xff] }
   0x2   :  { %98 = vmatpush.bf16.msra.mxu0 %v178_v0  ;;  %190 = vmatpush.bf16.msra.mxu1 %v178_v0  ;;  %v175_v3 = vld [vmem:[%s258_s1 + $0x20] sm:$0xff]  ;;  %v174_v4 = vld [vmem:[%s258_s1 + $0x18] sm:$0xff]  ;;  %v173_v5 = vld [vmem:[%s258_s1 + $0x10] sm:$0xff] }
   0x3   :  { %v172_v6 = vld [vmem:[%s258_s1 + $0x8] sm:$0xff]  ;;  %v171_v7 = vld [vmem:[%s258_s1] sm:$0xff] }
   0x4   :  { %v169_v8 = vld [vmem:[%s260_s0] sm:$0xff]  ;;  %v170_v9 = vld [vmem:[%s260_s0 + $0x8] sm:$0xff] }
   0x5   :  { %v198_v12 = vld [vmem:[%s259_s2] ss:$0 sm:$0xff] }
   0x6   :  { %99 = vmatpush.bf16.msra.mxu0 %v177_v1  ;;  %191 = vmatpush.bf16.msra.mxu1 %v177_v1 }
   0xa   :  { %100 = vmatpush.bf16.msra.mxu0 %v176_v2  ;;  %192 = vmatpush.bf16.msra.mxu1 %v176_v2 }
   0xe   :  { %101 = vmatpush.bf16.msra.mxu0 %v175_v3  ;;  %193 = vmatpush.bf16.msra.mxu1 %v175_v3 }
  0x12   :  { %102 = vmatpush.bf16.msra.mxu0 %v174_v4  ;;  %194 = vmatpush.bf16.msra.mxu1 %v174_v4 }
  0x16   :  { %103 = vmatpush.bf16.msra.mxu0 %v173_v5  ;;  %195 = vmatpush.bf16.msra.mxu1 %v173_v5 }
  0x1a   :  { %104 = vmatpush.bf16.msra.mxu0 %v172_v6  ;;  %196 = vmatpush.bf16.msra.mxu1 %v172_v6 }
  0x1e   :  { %105 = vmatpush.bf16.msra.mxu0 %v171_v7  ;;  %197 = vmatpush.bf16.msra.mxu1 %v171_v7 }
  0x21   :  { %106 = vmatmul.bf16.vlgmr.msra.gmra.mxu0 %v169_v8  ;;  %111 = vmatmul.bf16.vlgmr.msra.gmra.mxu1 %v170_v9 }
  0x9e   :  { %v107_v10 = vpop.f32.mrf.mxu0  ;;  %v112_v11 = vpop.f32.mrf.mxu1 }
  0x9f   :  { %v108_v15 = vadd.f32 %v198_v12, %v107_v10  ;;  %v113_v16 = vadd.f32 %v198_v12, %v112_v11 }
  0xa6   :  { %v109_v13 = vpop.f32.mrf.mxu0  ;;  %v114_v14 = vpop.f32.mrf.mxu1 }
  0xa7   :  { %v110_v17 = vadd.f32 %v198_v12, %v109_v13  ;;  %v115_v18 = vadd.f32 %v198_v12, %v114_v14 }
  0xa9   :  { %v182_v19 = vpack.c.bf16 %v110_v17, %v108_v15  ;;  %v187_v20 = vpack.c.bf16 %v115_v18, %v113_v16 }
  0xab   :  { %183 = vst [vmem:[%s261_s3] sm:$0xff] %v182_v19  }
  0xac   :  { %189 = vst [vmem:[%s261_s3 + $0x8] sm:$0xff] %v187_v20  }

// kernel: resnet50_forward.82
= control target key start
LH: loop header
LB: loop body
LE: loop exit
PB: predicated region body
PF: predicated region fallthrough
CT: control target
= control target key end

     0   :  { %s539_s1 = inlined_call_operand.vmem [shape: bf16[384,128], index: 1, kind: input, shape index: {}]   ;;  %s540_s2 = inlined_call_operand.vmem [shape: f32[1,128], index: 2, kind: input, shape index: {}]   ;;  %s541_s0 = inlined_call_operand.vmem [shape: bf16[16,384], index: 0, kind: input, shape index: {}]   ;;  %s542_s3 = inlined_call_operand.vmem [shape: bf16[16,128], index: 3, kind: output, shape index: {}]  }
   0x1   :  { %v400_v0 = vld [vmem:[%s539_s1 + $0x38] sm:$0xff]  ;;  %v399_v3 = vld [vmem:[%s539_s1 + $0x30] sm:$0xff]  ;;  %v398_v6 = vld [vmem:[%s539_s1 + $0x28] sm:$0xff] }
   0x2   :  { %v408_v1 = vld [vmem:[%s539_s1 + $0x78] sm:$0xff]  ;;  %230 = vmatpush.bf16.msra.mxu0 %v400_v0  ;;  %v407_v4 = vld [vmem:[%s539_s1 + $0x70] sm:$0xff]  ;;  %v406_v7 = vld [vmem:[%s539_s1 + $0x68] sm:$0xff] }
   0x3   :  { %v416_v2 = vld [vmem:[%s539_s1 + $0xb8] sm:$0xff]  ;;  %244 = vmatpush.bf16.msra.mxu1 %v408_v1  ;;  %v415_v5 = vld [vmem:[%s539_s1 + $0xb0] sm:$0xff]  ;;  %v414_v8 = vld [vmem:[%s539_s1 + $0xa8] sm:$0xff] }
   0x4   :  { %258 = vmatpush.bf16.msra.mxu2 %v416_v2  ;;  %v397_v9 = vld [vmem:[%s539_s1 + $0x20] sm:$0xff]  ;;  %v396_v12 = vld [vmem:[%s539_s1 + $0x18] sm:$0xff]  ;;  %v395_v15 = vld [vmem:[%s539_s1 + $0x10] sm:$0xff] }
   0x5   :  { %v405_v10 = vld [vmem:[%s539_s1 + $0x60] sm:$0xff]  ;;  %v404_v13 = vld [vmem:[%s539_s1 + $0x58] sm:$0xff]  ;;  %v403_v16 = vld [vmem:[%s539_s1 + $0x50] sm:$0xff] }
   0x6   :  { %231 = vmatpush.bf16.msra.mxu0 %v399_v3  ;;  %v413_v11 = vld [vmem:[%s539_s1 + $0xa0] sm:$0xff]  ;;  %v412_v14 = vld [vmem:[%s539_s1 + $0x98] sm:$0xff]  ;;  %v411_v17 = vld [vmem:[%s539_s1 + $0x90] sm:$0xff] }
   0x7   :  { %245 = vmatpush.bf16.msra.mxu1 %v407_v4  ;;  %v394_v18 = vld [vmem:[%s539_s1 + $0x8] sm:$0xff]  ;;  %v393_v21 = vld [vmem:[%s539_s1] sm:$0xff]  ;;  %v286_v26 = vld [vmem:[%s541_s0 + $0xc] sm:$0xf0] }
   0x8   :  { %259 = vmatpush.bf16.msra.mxu2 %v415_v5  ;;  %v402_v19 = vld [vmem:[%s539_s1 + $0x48] sm:$0xff]  ;;  %v401_v22 = vld [vmem:[%s539_s1 + $0x40] sm:$0xff]  ;;  %v392_v29 = vld [vmem:[%s541_s0 + $0x10] sm:$0xf0] }
   0x9   :  { %v410_v20 = vld [vmem:[%s539_s1 + $0x88] sm:$0xff]  ;;  %v284_v23 = vld [vmem:[%s541_s0] sm:$0xf]  ;;  %v390_v25 = vld [vmem:[%s541_s0 + $0x4] sm:$0xf] }
   0xa   :  { %232 = vmatpush.bf16.msra.mxu0 %v398_v6  ;;  %v391_v24 = vld [vmem:[%s541_s0 + $0x8] sm:$0xf0]  ;;  %v409_v27 = vld [vmem:[%s539_s1 + $0x80] sm:$0xff]  ;;  %v292_v28 = vld [vmem:[%s541_s0 + $0x8] sm:$0xf]  ;;  %v289_v31 = vor.u32 %v390_v25, %v286_v26 }
   0xb   :  { %246 = vmatpush.bf16.msra.mxu1 %v406_v7  ;;  %v285_v30 = vor.u32 %v391_v24, %v284_v23  ;;  %v293_v32 = vor.u32 %v392_v29, %v292_v28  ;;  %v422_v34 = vld [vmem:[%s540_s2] ss:$0 sm:$0xff] }
   0xc   :  { %260 = vmatpush.bf16.msra.mxu2 %v414_v8 }
   0xe   :  { %233 = vmatpush.bf16.msra.mxu0 %v397_v9 }
   0xf   :  { %247 = vmatpush.bf16.msra.mxu1 %v405_v10 }
  0x10   :  { %261 = vmatpush.bf16.msra.mxu2 %v413_v11 }
  0x12   :  { %234 = vmatpush.bf16.msra.mxu0 %v396_v12 }
  0x13   :  { %248 = vmatpush.bf16.msra.mxu1 %v404_v13 }
  0x14   :  { %262 = vmatpush.bf16.msra.mxu2 %v412_v14 }
  0x16   :  { %235 = vmatpush.bf16.msra.mxu0 %v395_v15 }
  0x17   :  { %249 = vmatpush.bf16.msra.mxu1 %v403_v16 }
  0x18   :  { %263 = vmatpush.bf16.msra.mxu2 %v411_v17 }
  0x1a   :  { %236 = vmatpush.bf16.msra.mxu0 %v394_v18 }
  0x1b   :  { %250 = vmatpush.bf16.msra.mxu1 %v402_v19 }
  0x1c   :  { %264 = vmatpush.bf16.msra.mxu2 %v410_v20 }
  0x1e   :  { %237 = vmatpush.bf16.msra.mxu0 %v393_v21 }
  0x1f   :  { %251 = vmatpush.bf16.msra.mxu1 %v401_v22 }
  0x20   :  { %265 = vmatpush.bf16.msra.mxu2 %v409_v27 }
  0x21   :  { %238 = vmatmul.bf16.vlgmr.msra.gmra.mxu0 %v285_v30 }
  0x22   :  { %252 = vmatmul.bf16.vlgmr.msra.gmra.mxu1 %v289_v31 }
  0x23   :  { %266 = vmatmul.bf16.vlgmr.msra.gmra.mxu2 %v293_v32 }
  0x9e   :  { %v239_v33 = vpop.f32.mrf.mxu0 }
  0x9f   :  { %v253_v35 = vpop.f32.mrf.mxu1  ;;  %v240_v36 = vadd.f32 %v422_v34, %v239_v33 }
  0xa1   :  { %v254_v39 = vadd.f32 %v253_v35, %v240_v36 }
  0xa6   :  { %v267_v37 = vpop.f32.mrf.mxu2  ;;  %v241_v38 = vpop.f32.mrf.mxu0 }
  0xa7   :  { %v242_v40 = vadd.f32 %v422_v34, %v241_v38  ;;  %v255_v41 = vpop.f32.mrf.mxu1  ;;  %v268_v42 = vadd.f32 %v267_v37, %v254_v39 }
  0xa9   :  { %v256_v43 = vadd.f32 %v255_v41, %v242_v40  ;;  %v272_v46 = vmax.f32 %v268_v42, 0.0 }
  0xae   :  { %v269_v44 = vpop.f32.mrf.mxu2 }
  0xaf   :  { %v270_v45 = vadd.f32 %v269_v44, %v256_v43 }
  0xb1   :  { %v273_v47 = vmax.f32 %v270_v45, 0.0 }
  0xb3   :  { %v420_v48 = vpack.c.bf16 %v273_v47, %v272_v46 }
  0xb5   :  { %421 = vst [vmem:[%s542_s3] sm:$0xff] %v420_v48  }

// kernel: resnet50_forward.80
= control target key start
LH: loop header
LB: loop body
LE: loop exit
PB: predicated region body
PF: predicated region fallthrough
CT: control target
= control target key end

     0   :  { %s216_s1 = inlined_call_operand.vmem [shape: bf16[128,128], index: 1, kind: input, shape index: {}]   ;;  %s217_s2 = inlined_call_operand.vmem [shape: f32[1,128], index: 2, kind: input, shape index: {}]   ;;  %s218_s0 = inlined_call_operand.vmem [shape: bf16[16,128], index: 0, kind: input, shape index: {}]   ;;  %s219_s3 = inlined_call_operand.vmem [shape: bf16[16,128], index: 3, kind: output, shape index: {}]  }
   0x1   :  { %v156_v0 = vld [vmem:[%s216_s1 + $0x38] sm:$0xff]  ;;  %v155_v1 = vld [vmem:[%s216_s1 + $0x30] sm:$0xff]  ;;  %v154_v2 = vld [vmem:[%s216_s1 + $0x28] sm:$0xff] }
   0x2   :  { %90 = vmatpush.bf16.msra.mxu0 %v156_v0  ;;  %v153_v3 = vld [vmem:[%s216_s1 + $0x20] sm:$0xff]  ;;  %v152_v4 = vld [vmem:[%s216_s1 + $0x18] sm:$0xff]  ;;  %v151_v5 = vld [vmem:[%s216_s1 + $0x10] sm:$0xff] }
   0x3   :  { %v150_v6 = vld [vmem:[%s216_s1 + $0x8] sm:$0xff]  ;;  %v149_v7 = vld [vmem:[%s216_s1] sm:$0xff] }
   0x4   :  { %v148_v8 = vld [vmem:[%s218_s0] sm:$0xff] }
   0x5   :  { %v162_v10 = vld [vmem:[%s217_s2] ss:$0 sm:$0xff] }
   0x6   :  { %91 = vmatpush.bf16.msra.mxu0 %v155_v1 }
   0xa   :  { %92 = vmatpush.bf16.msra.mxu0 %v154_v2 }
   0xe   :  { %93 = vmatpush.bf16.msra.mxu0 %v153_v3 }
  0x12   :  { %94 = vmatpush.bf16.msra.mxu0 %v152_v4 }
  0x16   :  { %95 = vmatpush.bf16.msra.mxu0 %v151_v5 }
  0x1a   :  { %96 = vmatpush.bf16.msra.mxu0 %v150_v6 }
  0x1e   :  { %97 = vmatpush.bf16.msra.mxu0 %v149_v7 }
  0x21   :  { %98 = vmatmul.bf16.vlgmr.msra.gmra.mxu0 %v148_v8 }
  0x9e   :  { %v99_v9 = vpop.f32.mrf.mxu0 }
  0x9f   :  { %v100_v12 = vadd.f32 %v162_v10, %v99_v9 }
  0xa6   :  { %v101_v11 = vpop.f32.mrf.mxu0 }
  0xa7   :  { %v102_v13 = vadd.f32 %v162_v10, %v101_v11 }
  0xa9   :  { %v160_v14 = vpack.c.bf16 %v102_v13, %v100_v12 }
  0xab   :  { %161 = vst [vmem:[%s219_s3] sm:$0xff] %v160_v14  }

// kernel: resnet50_forward.83
= control target key start
LH: loop header
LB: loop body
LE: loop exit
PB: predicated region body
PF: predicated region fallthrough
CT: control target
= control target key end

     0   :  { %9 = vsyncpa [#allocation3], 0  ;;  %s224_s18 = smov [#allocation2]   ;;  %s225_s20 = smov 64   ;;  %s267_s0 = inlined_call_operand.vmem [shape: bf16[16,128], index: 0, kind: input, shape index: {}]   ;;  %s268_s1 = inlined_call_operand.hbm [shape: bf16[128,128], index: 1, kind: input, shape index: {}]   ;;  %s269_s2 = inlined_call_operand.vmem [shape: f32[1,128], index: 2, kind: input, shape index: {}]   ;;  %s270_s3 = inlined_call_operand.vmem [shape: bf16[16,128], index: 3, kind: input, shape index: {}]   ;;  %s271_s4 = inlined_call_operand.vmem [shape: bf16[16,128], index: 4, kind: output, shape index: {}]  }
   0x1   :  { %s16_s17 = sshll.u32 %s268_s1, 4  ;;  %s18_s19 = sshll.u32 %s224_s18, 4  ;;  %s17_s17 = int_to_ptr.hbm [resolvable:$true] %s16_s17  ;;  %s19_s19 = int_to_ptr.vmem [resolvable:$true] %s18_s19 }
   0x2   :  { %s226_s21 = smov 4  }
   0x3   :  { %24 = dma.hbm_to_vmem [thread:$0]  %s17_s17, 1024, %s19_s19, [#allocation3], %s225_s20, %s225_s20, %s226_s21  }
   0x4   :  { %222 = dma.done.wait [#allocation3], 1024  }
   0x5   :  { %223 = vsyncadd [#allocation3], 4294966272  ;;  %v184_v0 = vld [vmem:[#allocation2 + $0x38] sm:$0xff]  ;;  %v183_v1 = vld [vmem:[#allocation2 + $0x30] sm:$0xff] }
   0x6   :  { %109 = vmatpush.bf16.msra.mxu0 %v184_v0  ;;  %v182_v2 = vld [vmem:[#allocation2 + $0x28] sm:$0xff]  ;;  %v181_v3 = vld [vmem:[#allocation2 + $0x20] sm:$0xff]  ;;  %v180_v4 = vld [vmem:[#allocation2 + $0x18] sm:$0xff] }
   0x7   :  { %v179_v5 = vld [vmem:[#allocation2 + $0x10] sm:$0xff]  ;;  %v178_v6 = vld [vmem:[#allocation2 + $0x8] sm:$0xff]  ;;  %v177_v7 = vld [vmem:[#allocation2] sm:$0xff] }
   0x8   :  { %v176_v8 = vld [vmem:[%s267_s0] sm:$0xff] }
   0x9   :  { %v197_v10 = vld [vmem:[%s269_s2] ss:$0 sm:$0xff] }
   0xa   :  { %110 = vmatpush.bf16.msra.mxu0 %v183_v1  ;;  %v186_v11 = vld [vmem:[%s270_s3] sm:$0xff]  }
   0xb   :  { %v187_v13 = vunpack.c.l.bf16 %v186_v11  ;;  %v188_v14 = vunpack.c.h.bf16 %v186_v11 }
   0xe   :  { %111 = vmatpush.bf16.msra.mxu0 %v182_v2 }
  0x12   :  { %112 = vmatpush.bf16.msra.mxu0 %v181_v3 }
  0x16   :  { %113 = vmatpush.bf16.msra.mxu0 %v180_v4 }
  0x1a   :  { %114 = vmatpush.bf16.msra.mxu0 %v179_v5 }
  0x1e   :  { %115 = vmatpush.bf16.msra.mxu0 %v178_v6 }
  0x22   :  { %116 = vmatpush.bf16.msra.mxu0 %v177_v7 }
  0x25   :  { %117 = vmatmul.bf16.vlgmr.msra.gmra.mxu0 %v176_v8 }
  0xa2   :  { %v118_v9 = vpop.f32.mrf.mxu0 }
  0xa3   :  { %v119_v12 = vadd.f32 %v197_v10, %v118_v9 }
  0xa5   :  { %v127_v16 = vadd.f32 %v187_v13, %v119_v12 }
  0xa7   :  { %v129_v19 = vmax.f32 %v127_v16, 0.0 }
  0xaa   :  { %v120_v15 = vpop.f32.mrf.mxu0 }
  0xab   :  { %v121_v17 = vadd.f32 %v197_v10, %v120_v15 }
  0xad   :  { %v128_v18 = vadd.f32 %v188_v14, %v121_v17 }
  0xaf   :  { %v130_v20 = vmax.f32 %v128_v18, 0.0 }
  0xb1   :  { %v192_v21 = vpack.c.bf16 %v130_v20, %v129_v19 }
  0xb3   :  { %193 = vst [vmem:[%s271_s4] sm:$0xff] %v192_v21  }
  0xb4   :  { %139 = vsyncpa [#allocation3], 1 }

// kernel: resnet50_forward.84
= control target key start
LH: loop header
LB: loop body
LE: loop exit
PB: predicated region body
PF: predicated region fallthrough
CT: control target
= control target key end

     0   :  { %8 = vsyncpa [#allocation3], 0  ;;  %s211_s15 = smov [#allocation2]   ;;  %s212_s17 = smov 64   ;;  %s246_s0 = inlined_call_operand.vmem [shape: bf16[16,128], index: 0, kind: input, shape index: {}]   ;;  %s247_s1 = inlined_call_operand.hbm [shape: bf16[128,128], index: 1, kind: input, shape index: {}]   ;;  %s248_s2 = inlined_call_operand.vmem [shape: f32[1,128], index: 2, kind: input, shape index: {}]   ;;  %s249_s3 = inlined_call_operand.vmem [shape: bf16[16,128], index: 3, kind: output, shape index: {}]  }
   0x1   :  { %s15_s14 = sshll.u32 %s247_s1, 4  ;;  %s17_s16 = sshll.u32 %s211_s15, 4  ;;  %s16_s14 = int_to_ptr.hbm [resolvable:$true] %s15_s14  ;;  %s18_s16 = int_to_ptr.vmem [resolvable:$true] %s17_s16 }
   0x2   :  { %s213_s18 = smov 4  }
   0x3   :  { %23 = dma.hbm_to_vmem [thread:$0]  %s16_s14, 1024, %s18_s16, [#allocation3], %s212_s17, %s212_s17, %s213_s18  }
   0x4   :  { %209 = dma.done.wait [#allocation3], 1024  }
   0x5   :  { %210 = vsyncadd [#allocation3], 4294966272  ;;  %v175_v0 = vld [vmem:[#allocation2 + $0x38] sm:$0xff]  ;;  %v174_v1 = vld [vmem:[#allocation2 + $0x30] sm:$0xff] }
   0x6   :  { %106 = vmatpush.bf16.msra.mxu0 %v175_v0  ;;  %v173_v2 = vld [vmem:[#allocation2 + $0x28] sm:$0xff]  ;;  %v172_v3 = vld [vmem:[#allocation2 + $0x20] sm:$0xff]  ;;  %v171_v4 = vld [vmem:[#allocation2 + $0x18] sm:$0xff] }
   0x7   :  { %v170_v5 = vld [vmem:[#allocation2 + $0x10] sm:$0xff]  ;;  %v169_v6 = vld [vmem:[#allocation2 + $0x8] sm:$0xff]  ;;  %v168_v7 = vld [vmem:[#allocation2] sm:$0xff] }
   0x8   :  { %v167_v8 = vld [vmem:[%s246_s0] sm:$0xff] }
   0x9   :  { %v184_v10 = vld [vmem:[%s248_s2] ss:$0 sm:$0xff] }
   0xa   :  { %107 = vmatpush.bf16.msra.mxu0 %v174_v1 }
   0xe   :  { %108 = vmatpush.bf16.msra.mxu0 %v173_v2 }
  0x12   :  { %109 = vmatpush.bf16.msra.mxu0 %v172_v3 }
  0x16   :  { %110 = vmatpush.bf16.msra.mxu0 %v171_v4 }
  0x1a   :  { %111 = vmatpush.bf16.msra.mxu0 %v170_v5 }
  0x1e   :  { %112 = vmatpush.bf16.msra.mxu0 %v169_v6 }
  0x22   :  { %113 = vmatpush.bf16.msra.mxu0 %v168_v7 }
  0x25   :  { %114 = vmatmul.bf16.vlgmr.msra.gmra.mxu0 %v167_v8 }
  0xa2   :  { %v115_v9 = vpop.f32.mrf.mxu0 }
  0xa3   :  { %v116_v11 = vadd.f32 %v184_v10, %v115_v9 }
  0xa5   :  { %v120_v14 = vmax.f32 %v116_v11, 0.0 }
  0xaa   :  { %v117_v12 = vpop.f32.mrf.mxu0 }
  0xab   :  { %v118_v13 = vadd.f32 %v184_v10, %v117_v12 }
  0xad   :  { %v121_v15 = vmax.f32 %v118_v13, 0.0 }
  0xaf   :  { %v179_v16 = vpack.c.bf16 %v121_v15, %v120_v14 }
  0xb1   :  { %180 = vst [vmem:[%s249_s3] sm:$0xff] %v179_v16  }
  0xb2   :  { %130 = vsyncpa [#allocation3], 1 }

// kernel: resnet50_forward.87
= control target key start
LH: loop header
LB: loop body
LE: loop exit
PB: predicated region body
PF: predicated region fallthrough
CT: control target
= control target key end

     0   :  { %s218_s1 = inlined_call_operand.vmem [shape: bf16[128,128], index: 1, kind: input, shape index: {}]   ;;  %s219_s2 = inlined_call_operand.vmem [shape: f32[1,128], index: 2, kind: input, shape index: {}]   ;;  %s220_s0 = inlined_call_operand.vmem [shape: bf16[16,128], index: 0, kind: input, shape index: {}]   ;;  %s221_s3 = inlined_call_operand.vmem [shape: bf16[16,128], index: 3, kind: output, shape index: {}]  }
   0x1   :  { %v158_v0 = vld [vmem:[%s218_s1 + $0x38] sm:$0xff]  ;;  %v157_v1 = vld [vmem:[%s218_s1 + $0x30] sm:$0xff]  ;;  %v156_v2 = vld [vmem:[%s218_s1 + $0x28] sm:$0xff] }
   0x2   :  { %90 = vmatpush.bf16.msra.mxu0 %v158_v0  ;;  %v155_v3 = vld [vmem:[%s218_s1 + $0x20] sm:$0xff]  ;;  %v154_v4 = vld [vmem:[%s218_s1 + $0x18] sm:$0xff]  ;;  %v153_v5 = vld [vmem:[%s218_s1 + $0x10] sm:$0xff] }
   0x3   :  { %v152_v6 = vld [vmem:[%s218_s1 + $0x8] sm:$0xff]  ;;  %v151_v7 = vld [vmem:[%s218_s1] sm:$0xff] }
   0x4   :  { %v150_v8 = vld [vmem:[%s220_s0] sm:$0xff] }
   0x5   :  { %v164_v10 = vld [vmem:[%s219_s2] ss:$0 sm:$0xff] }
   0x6   :  { %91 = vmatpush.bf16.msra.mxu0 %v157_v1 }
   0xa   :  { %92 = vmatpush.bf16.msra.mxu0 %v156_v2 }
   0xe   :  { %93 = vmatpush.bf16.msra.mxu0 %v155_v3 }
  0x12   :  { %94 = vmatpush.bf16.msra.mxu0 %v154_v4 }
  0x16   :  { %95 = vmatpush.bf16.msra.mxu0 %v153_v5 }
  0x1a   :  { %96 = vmatpush.bf16.msra.mxu0 %v152_v6 }
  0x1e   :  { %97 = vmatpush.bf16.msra.mxu0 %v151_v7 }
  0x21   :  { %98 = vmatmul.bf16.vlgmr.msra.gmra.mxu0 %v150_v8 }
  0x9e   :  { %v99_v9 = vpop.f32.mrf.mxu0 }
  0x9f   :  { %v100_v11 = vadd.f32 %v164_v10, %v99_v9 }
  0xa1   :  { %v104_v14 = vmax.f32 %v100_v11, 0.0 }
  0xa6   :  { %v101_v12 = vpop.f32.mrf.mxu0 }
  0xa7   :  { %v102_v13 = vadd.f32 %v164_v10, %v101_v12 }
  0xa9   :  { %v105_v15 = vmax.f32 %v102_v13, 0.0 }
  0xab   :  { %v162_v16 = vpack.c.bf16 %v105_v15, %v104_v14 }
  0xad   :  { %163 = vst [vmem:[%s221_s3] sm:$0xff] %v162_v16  }

// kernel: resnet50_forward.86
= control target key start
LH: loop header
LB: loop body
LE: loop exit
PB: predicated region body
PF: predicated region fallthrough
CT: control target
= control target key end

     0   :  { %s239_s1 = inlined_call_operand.vmem [shape: bf16[128,128], index: 1, kind: input, shape index: {}]   ;;  %s240_s2 = inlined_call_operand.vmem [shape: f32[1,128], index: 2, kind: input, shape index: {}]   ;;  %s241_s0 = inlined_call_operand.vmem [shape: bf16[16,128], index: 0, kind: input, shape index: {}]   ;;  %s242_s3 = inlined_call_operand.vmem [shape: bf16[16,128], index: 3, kind: input, shape index: {}]   ;;  %s243_s4 = inlined_call_operand.vmem [shape: bf16[16,128], index: 4, kind: output, shape index: {}]  }
   0x1   :  { %v167_v0 = vld [vmem:[%s239_s1 + $0x38] sm:$0xff]  ;;  %v166_v1 = vld [vmem:[%s239_s1 + $0x30] sm:$0xff]  ;;  %v165_v2 = vld [vmem:[%s239_s1 + $0x28] sm:$0xff] }
   0x2   :  { %93 = vmatpush.bf16.msra.mxu0 %v167_v0  ;;  %v164_v3 = vld [vmem:[%s239_s1 + $0x20] sm:$0xff]  ;;  %v163_v4 = vld [vmem:[%s239_s1 + $0x18] sm:$0xff]  ;;  %v162_v5 = vld [vmem:[%s239_s1 + $0x10] sm:$0xff] }
   0x3   :  { %v161_v6 = vld [vmem:[%s239_s1 + $0x8] sm:$0xff]  ;;  %v160_v7 = vld [vmem:[%s239_s1] sm:$0xff] }
   0x4   :  { %v159_v8 = vld [vmem:[%s241_s0] sm:$0xff] }
   0x5   :  { %v177_v10 = vld [vmem:[%s240_s2] ss:$0 sm:$0xff] }
   0x6   :  { %94 = vmatpush.bf16.msra.mxu0 %v166_v1  ;;  %v169_v11 = vld [vmem:[%s242_s3] sm:$0xff]  }
   0x7   :  { %v170_v13 = vunpack.c.l.bf16 %v169_v11  ;;  %v171_v14 = vunpack.c.h.bf16 %v169_v11 }
   0xa   :  { %95 = vmatpush.bf16.msra.mxu0 %v165_v2 }
   0xe   :  { %96 = vmatpush.bf16.msra.mxu0 %v164_v3 }
  0x12   :  { %97 = vmatpush.bf16.msra.mxu0 %v163_v4 }
  0x16   :  { %98 = vmatpush.bf16.msra.mxu0 %v162_v5 }
  0x1a   :  { %99 = vmatpush.bf16.msra.mxu0 %v161_v6 }
  0x1e   :  { %100 = vmatpush.bf16.msra.mxu0 %v160_v7 }
  0x21   :  { %101 = vmatmul.bf16.vlgmr.msra.gmra.mxu0 %v159_v8 }
  0x9e   :  { %v102_v9 = vpop.f32.mrf.mxu0 }
  0x9f   :  { %v103_v12 = vadd.f32 %v177_v10, %v102_v9 }
  0xa1   :  { %v111_v16 = vadd.f32 %v170_v13, %v103_v12 }
  0xa3   :  { %v113_v19 = vmax.f32 %v111_v16, 0.0 }
  0xa6   :  { %v104_v15 = vpop.f32.mrf.mxu0 }
  0xa7   :  { %v105_v17 = vadd.f32 %v177_v10, %v104_v15 }
  0xa9   :  { %v112_v18 = vadd.f32 %v171_v14, %v105_v17 }
  0xab   :  { %v114_v20 = vmax.f32 %v112_v18, 0.0 }
  0xad   :  { %v175_v21 = vpack.c.bf16 %v114_v20, %v113_v19 }
  0xaf   :  { %176 = vst [vmem:[%s243_s4] sm:$0xff] %v175_v21  }

// kernel: resnet50_forward.99
= control target key start
LH: loop header
LB: loop body
LE: loop exit
PB: predicated region body
PF: predicated region fallthrough
CT: control target
= control target key end

     0   :  { %8 = vsyncpa [#allocation3], 0  ;;  %s291_s15 = smov [#allocation2]   ;;  %s292_s17 = smov 128   ;;  %s329_s0 = inlined_call_operand.vmem [shape: bf16[16,128], index: 0, kind: input, shape index: {}]   ;;  %s330_s1 = inlined_call_operand.hbm [shape: bf16[128,256], index: 1, kind: input, shape index: {}]   ;;  %s331_s2 = inlined_call_operand.vmem [shape: f32[1,256], index: 2, kind: input, shape index: {}]   ;;  %s332_s3 = inlined_call_operand.vmem [shape: bf16[16,256], index: 3, kind: output, shape index: {}]  }
   0x1   :  { %s15_s14 = sshll.u32 %s330_s1, 4  ;;  %s17_s16 = sshll.u32 %s291_s15, 4  ;;  %s16_s14 = int_to_ptr.hbm [resolvable:$true] %s15_s14  ;;  %s18_s16 = int_to_ptr.vmem [resolvable:$true] %s17_s16 }
   0x2   :  { %s293_s18 = smov 8  }
   0x3   :  { %23 = dma.hbm_to_vmem [thread:$0]  %s16_s14, 2048, %s18_s16, [#allocation3], %s292_s17, %s292_s17, %s293_s18  }
   0x4   :  { %289 = dma.done.wait [#allocation3], 2048  }
   0x5   :  { %290 = vsyncadd [#allocation3], 4294965248  ;;  %v239_v0 = vld [vmem:[#allocation2 + $0x70] sm:$0xf]  ;;  %v261_v1 = vld [vmem:[#allocation2 + $0x74] sm:$0xf0] }
   0x6   :  { %v260_v2 = vld [vmem:[#allocation2 + $0x74] sm:$0xf]  ;;  %v240_v3 = vor.u32 %v261_v1, %v239_v0  ;;  %v241_v4 = vld [vmem:[#allocation2 + $0x78] sm:$0xf0]  ;;  %v231_v5 = vld [vmem:[#allocation2 + $0x60] sm:$0xf] }
   0x7   :  { %v259_v6 = vld [vmem:[#allocation2 + $0x64] sm:$0xf0]  ;;  %v244_v7 = vor.u32 %v260_v2, %v241_v4  ;;  %v258_v8 = vld [vmem:[#allocation2 + $0x64] sm:$0xf]  ;;  %v233_v9 = vld [vmem:[#allocation2 + $0x68] sm:$0xf0] }
   0x8   :  { %140 = vmatpush.bf16.msra.mxu0 %v240_v3  ;;  %v232_v10 = vor.u32 %v259_v6, %v231_v5  ;;  %v236_v11 = vor.u32 %v258_v8, %v233_v9  ;;  %v223_v12 = vld [vmem:[#allocation2 + $0x50] sm:$0xf]  ;;  %v257_v13 = vld [vmem:[#allocation2 + $0x54] sm:$0xf0]  ;;  %v256_v14 = vld [vmem:[#allocation2 + $0x54] sm:$0xf] }
   0x9   :  { %154 = vmatpush.bf16.msra.mxu1 %v244_v7  ;;  %v225_v15 = vld [vmem:[#allocation2 + $0x58] sm:$0xf0]  ;;  %v224_v16 = vor.u32 %v257_v13, %v223_v12  ;;  %v215_v18 = vld [vmem:[#allocation2 + $0x40] sm:$0xf]  ;;  %v255_v19 = vld [vmem:[#allocation2 + $0x44] sm:$0xf0] }
   0xa   :  { %v228_v17 = vor.u32 %v256_v14, %v225_v15  ;;  %v254_v20 = vld [vmem:[#allocation2 + $0x44] sm:$0xf]  ;;  %v217_v21 = vld [vmem:[#allocation2 + $0x48] sm:$0xf0]  ;;  %v216_v22 = vor.u32 %v255_v19, %v215_v18  ;;  %v207_v24 = vld [vmem:[#allocation2 + $0x30] sm:$0xf] }
   0xb   :  { %v220_v23 = vor.u32 %v254_v20, %v217_v21  ;;  %v253_v25 = vld [vmem:[#allocation2 + $0x34] sm:$0xf0]  ;;  %v252_v26 = vld [vmem:[#allocation2 + $0x34] sm:$0xf]  ;;  %v209_v27 = vld [vmem:[#allocation2 + $0x38] sm:$0xf0] }
   0xc   :  { %141 = vmatpush.bf16.msra.mxu0 %v232_v10  ;;  %v208_v28 = vor.u32 %v253_v25, %v207_v24  ;;  %v212_v29 = vor.u32 %v252_v26, %v209_v27  ;;  %v199_v30 = vld [vmem:[#allocation2 + $0x20] sm:$0xf]  ;;  %v251_v31 = vld [vmem:[#allocation2 + $0x24] sm:$0xf0]  ;;  %v250_v32 = vld [vmem:[#allocation2 + $0x24] sm:$0xf] }
   0xd   :  { %155 = vmatpush.bf16.msra.mxu1 %v236_v11  ;;  %v201_v33 = vld [vmem:[#allocation2 + $0x28] sm:$0xf0]  ;;  %v200_v34 = vor.u32 %v251_v31, %v199_v30  ;;  %v191_v36 = vld [vmem:[#allocation2 + $0x10] sm:$0xf]  ;;  %v249_v37 = vld [vmem:[#allocation2 + $0x14] sm:$0xf0] }
   0xe   :  { %v204_v35 = vor.u32 %v250_v32, %v201_v33  ;;  %v248_v38 = vld [vmem:[#allocation2 + $0x14] sm:$0xf]  ;;  %v193_v39 = vld [vmem:[#allocation2 + $0x18] sm:$0xf0]  ;;  %v192_v40 = vor.u32 %v249_v37, %v191_v36  ;;  %v183_v42 = vld [vmem:[#allocation2] sm:$0xf] }
   0xf   :  { %v196_v41 = vor.u32 %v248_v38, %v193_v39  ;;  %v247_v43 = vld [vmem:[#allocation2 + $0x4] sm:$0xf0]  ;;  %v246_v44 = vld [vmem:[#allocation2 + $0x4] sm:$0xf]  ;;  %v185_v45 = vld [vmem:[#allocation2 + $0x8] sm:$0xf0] }
  0x10   :  { %142 = vmatpush.bf16.msra.mxu0 %v224_v16  ;;  %v184_v46 = vor.u32 %v247_v43, %v183_v42  ;;  %v188_v47 = vor.u32 %v246_v44, %v185_v45  ;;  %v245_v48 = vld [vmem:[%s329_s0] sm:$0xff] }
  0x11   :  { %156 = vmatpush.bf16.msra.mxu1 %v228_v17  ;;  %v48_v49 = vld [vmem:[%s331_s2] sm:$0x3] }
  0x12   :  { %v50_v50 = vperm.slane %v48_v49, 0  ;;  %v51_v51 = vperm.slane %v48_v49, 1 }
  0x14   :  { %143 = vmatpush.bf16.msra.mxu0 %v216_v22 }
  0x15   :  { %157 = vmatpush.bf16.msra.mxu1 %v220_v23 }
  0x18   :  { %144 = vmatpush.bf16.msra.mxu0 %v208_v28 }
  0x19   :  { %158 = vmatpush.bf16.msra.mxu1 %v212_v29 }
  0x1c   :  { %145 = vmatpush.bf16.msra.mxu0 %v200_v34 }
  0x1d   :  { %159 = vmatpush.bf16.msra.mxu1 %v204_v35 }
  0x20   :  { %146 = vmatpush.bf16.msra.mxu0 %v192_v40 }
  0x21   :  { %160 = vmatpush.bf16.msra.mxu1 %v196_v41 }
  0x24   :  { %147 = vmatpush.bf16.msra.mxu0 %v184_v46 }
  0x25   :  { %161 = vmatpush.bf16.msra.mxu1 %v188_v47 }
  0x27   :  { %148 = vmatmul.bf16.vlgmr.msra.gmra.mxu0 %v245_v48 }
  0x28   :  { %162 = vmatmul.bf16.vlgmr.msra.gmra.mxu1 %v245_v48 }
  0xa4   :  { %v149_v52 = vpop.f32.mrf.mxu0 }
  0xa5   :  { %v150_v53 = vadd.f32 %v149_v52, %v50_v50  ;;  %v163_v54 = vpop.f32.mrf.mxu1 }
  0xa6   :  { %v164_v55 = vadd.f32 %v163_v54, %v51_v51 }
  0xa8   :  { %v168_v56 = vpack.c.bf16 %v164_v55, %v150_v53 }
  0xaa   :  { %170 = vst [vmem:[%s332_s3] sm:$0xff] %v168_v56 }
  0xac   :  { %v151_v57 = vpop.f32.mrf.mxu0 }
  0xad   :  { %v152_v58 = vadd.f32 %v151_v57, %v50_v50  ;;  %v165_v59 = vpop.f32.mrf.mxu1 }
  0xae   :  { %v166_v60 = vadd.f32 %v165_v59, %v51_v51 }
  0xb0   :  { %v169_v61 = vpack.c.bf16 %v166_v60, %v152_v58 }
  0xb2   :  { %171 = vst [vmem:[%s332_s3 + $0x8] sm:$0xff] %v169_v61 }
  0xb3   :  { %176 = vsyncpa [#allocation3], 1 }

// kernel: resnet50_forward.101
= control target key start
LH: loop header
LB: loop body
LE: loop exit
PB: predicated region body
PF: predicated region fallthrough
CT: control target
= control target key end

     0   :  { %s857_s1 = inlined_call_operand.vmem [shape: bf16[640,128], index: 1, kind: input, shape index: {}]   ;;  %s858_s2 = inlined_call_operand.vmem [shape: f32[1,128], index: 2, kind: input, shape index: {}]   ;;  %s859_s0 = inlined_call_operand.vmem [shape: bf16[16,640], index: 0, kind: input, shape index: {}]   ;;  %s860_s3 = inlined_call_operand.vmem [shape: bf16[16,128], index: 3, kind: output, shape index: {}]  }
   0x1   :  { %v642_v0 = vld [vmem:[%s857_s1 + $0x38] sm:$0xff]  ;;  %v641_v4 = vld [vmem:[%s857_s1 + $0x30] sm:$0xff]  ;;  %v640_v8 = vld [vmem:[%s857_s1 + $0x28] sm:$0xff] }
   0x2   :  { %v658_v1 = vld [vmem:[%s857_s1 + $0xb8] sm:$0xff]  ;;  %370 = vmatpush.bf16.msra.mxu0 %v642_v0  ;;  %v657_v5 = vld [vmem:[%s857_s1 + $0xb0] sm:$0xff]  ;;  %v656_v9 = vld [vmem:[%s857_s1 + $0xa8] sm:$0xff] }
   0x3   :  { %v666_v2 = vld [vmem:[%s857_s1 + $0xf8] sm:$0xff]  ;;  %398 = vmatpush.bf16.msra.mxu2 %v658_v1  ;;  %v665_v6 = vld [vmem:[%s857_s1 + $0xf0] sm:$0xff]  ;;  %v664_v10 = vld [vmem:[%s857_s1 + $0xe8] sm:$0xff] }
   0x4   :  { %v650_v3 = vld [vmem:[%s857_s1 + $0x78] sm:$0xff]  ;;  %412 = vmatpush.bf16.msra.mxu3 %v666_v2  ;;  %v649_v7 = vld [vmem:[%s857_s1 + $0x70] sm:$0xff]  ;;  %v648_v11 = vld [vmem:[%s857_s1 + $0x68] sm:$0xff] }
   0x5   :  { %384 = vmatpush.bf16.msra.mxu1 %v650_v3  ;;  %v639_v12 = vld [vmem:[%s857_s1 + $0x20] sm:$0xff]  ;;  %v638_v16 = vld [vmem:[%s857_s1 + $0x18] sm:$0xff]  ;;  %v637_v20 = vld [vmem:[%s857_s1 + $0x10] sm:$0xff] }
   0x6   :  { %371 = vmatpush.bf16.msra.mxu0 %v641_v4  ;;  %v655_v13 = vld [vmem:[%s857_s1 + $0xa0] sm:$0xff]  ;;  %v654_v17 = vld [vmem:[%s857_s1 + $0x98] sm:$0xff]  ;;  %v653_v21 = vld [vmem:[%s857_s1 + $0x90] sm:$0xff] }
   0x7   :  { %399 = vmatpush.bf16.msra.mxu2 %v657_v5  ;;  %v663_v14 = vld [vmem:[%s857_s1 + $0xe0] sm:$0xff]  ;;  %v662_v18 = vld [vmem:[%s857_s1 + $0xd8] sm:$0xff]  ;;  %v661_v22 = vld [vmem:[%s857_s1 + $0xd0] sm:$0xff] }
   0x8   :  { %413 = vmatpush.bf16.msra.mxu3 %v665_v6  ;;  %v647_v15 = vld [vmem:[%s857_s1 + $0x60] sm:$0xff]  ;;  %v646_v19 = vld [vmem:[%s857_s1 + $0x58] sm:$0xff]  ;;  %v645_v23 = vld [vmem:[%s857_s1 + $0x50] sm:$0xff] }
   0x9   :  { %385 = vmatpush.bf16.msra.mxu1 %v649_v7  ;;  %v636_v24 = vld [vmem:[%s857_s1 + $0x8] sm:$0xff]  ;;  %v635_v28 = vld [vmem:[%s857_s1] sm:$0xff]  ;;  %v674_v29 = vld [vmem:[%s857_s1 + $0x138] sm:$0xff] }
   0xa   :  { %372 = vmatpush.bf16.msra.mxu0 %v640_v8  ;;  %v652_v25 = vld [vmem:[%s857_s1 + $0x88] sm:$0xff]  ;;  %v651_v30 = vld [vmem:[%s857_s1 + $0x80] sm:$0xff]  ;;  %v633_v32 = vld [vmem:[%s859_s0 + $0x18] sm:$0xf0] }
   0xb   :  { %400 = vmatpush.bf16.msra.mxu2 %v656_v9  ;;  %v660_v26 = vld [vmem:[%s857_s1 + $0xc8] sm:$0xff]  ;;  %v452_v33 = vld [vmem:[%s859_s0] sm:$0xf]  ;;  %v632_v34 = vld [vmem:[%s859_s0 + $0x10] sm:$0xf0] }
   0xc   :  { %414 = vmatpush.bf16.msra.mxu3 %v664_v10  ;;  %v644_v27 = vld [vmem:[%s857_s1 + $0x48] sm:$0xff]  ;;  %v659_v35 = vld [vmem:[%s857_s1 + $0xc0] sm:$0xff]  ;;  %v454_v40 = vld [vmem:[%s859_s0 + $0x14] sm:$0xf0]  ;;  %v453_v42 = vor.u32 %v632_v34, %v452_v33 }
   0xd   :  { %386 = vmatpush.bf16.msra.mxu1 %v648_v11  ;;  %v460_v31 = vld [vmem:[%s859_s0 + $0x8] sm:$0xf]  ;;  %v631_v36 = vld [vmem:[%s859_s0 + $0xc] sm:$0xf]  ;;  %v462_v37 = vld [vmem:[%s859_s0 + $0x1c] sm:$0xf0] }
   0xe   :  { %373 = vmatpush.bf16.msra.mxu0 %v639_v12  ;;  %v643_v38 = vld [vmem:[%s857_s1 + $0x40] sm:$0xff]  ;;  %v461_v41 = vor.u32 %v633_v32, %v460_v31  ;;  %v465_v43 = vor.u32 %v631_v36, %v462_v37  ;;  %v673_v44 = vld [vmem:[%s857_s1 + $0x130] sm:$0xff]  ;;  %v672_v46 = vld [vmem:[%s857_s1 + $0x128] sm:$0xff] }
   0xf   :  { %401 = vmatpush.bf16.msra.mxu2 %v655_v13  ;;  %v630_v39 = vld [vmem:[%s859_s0 + $0x4] sm:$0xf]  ;;  %v670_v48 = vld [vmem:[%s857_s1 + $0x118] sm:$0xff]  ;;  %v669_v49 = vld [vmem:[%s857_s1 + $0x110] sm:$0xff] }
  0x10   :  { %415 = vmatpush.bf16.msra.mxu3 %v663_v14  ;;  %v457_v45 = vor.u32 %v630_v39, %v454_v40  ;;  %v671_v47 = vld [vmem:[%s857_s1 + $0x120] sm:$0xff]  ;;  %v668_v50 = vld [vmem:[%s857_s1 + $0x108] sm:$0xff]  ;;  %v468_v52 = vld [vmem:[%s859_s0 + $0x10] sm:$0xf] }
  0x11   :  { %387 = vmatpush.bf16.msra.mxu1 %v647_v15  ;;  %v667_v51 = vld [vmem:[%s857_s1 + $0x100] sm:$0xff] }
  0x12   :  { %374 = vmatpush.bf16.msra.mxu0 %v638_v16  ;;  %v634_v53 = vld [vmem:[%s859_s0 + $0x20] sm:$0xf0]  ;;  %v680_v57 = vld [vmem:[%s858_s2] ss:$0 sm:$0xff] }
  0x13   :  { %402 = vmatpush.bf16.msra.mxu2 %v654_v17  ;;  %v469_v54 = vor.u32 %v634_v53, %v468_v52 }
  0x14   :  { %416 = vmatpush.bf16.msra.mxu3 %v662_v18 }
  0x15   :  { %388 = vmatpush.bf16.msra.mxu1 %v646_v19 }
  0x16   :  { %375 = vmatpush.bf16.msra.mxu0 %v637_v20 }
  0x17   :  { %403 = vmatpush.bf16.msra.mxu2 %v653_v21 }
  0x18   :  { %417 = vmatpush.bf16.msra.mxu3 %v661_v22 }
  0x19   :  { %389 = vmatpush.bf16.msra.mxu1 %v645_v23 }
  0x1a   :  { %376 = vmatpush.bf16.msra.mxu0 %v636_v24 }
  0x1b   :  { %404 = vmatpush.bf16.msra.mxu2 %v652_v25 }
  0x1c   :  { %418 = vmatpush.bf16.msra.mxu3 %v660_v26 }
  0x1d   :  { %390 = vmatpush.bf16.msra.mxu1 %v644_v27 }
  0x1e   :  { %377 = vmatpush.bf16.msra.mxu0 %v635_v28 }
  0x1f   :  { %405 = vmatpush.bf16.msra.mxu2 %v651_v30 }
  0x20   :  { %419 = vmatpush.bf16.msra.mxu3 %v659_v35 }
  0x21   :  { %391 = vmatpush.bf16.msra.mxu1 %v643_v38  ;;  %378 = vmatmul.bf16.vlgmr.msra.gmra.mxu0 %v453_v42 }
  0x22   :  { %426 = vmatpush.bf16.msrb.mxu0 %v674_v29  ;;  %406 = vmatmul.bf16.vlgmr.msra.gmra.mxu2 %v461_v41 }
  0x23   :  { %420 = vmatmul.bf16.vlgmr.msra.gmra.mxu3 %v465_v43 }
  0x24   :  { %392 = vmatmul.bf16.vlgmr.msra.gmra.mxu1 %v457_v45 }
  0x26   :  { %427 = vmatpush.bf16.msrb.mxu0 %v673_v44 }
  0x2a   :  { %428 = vmatpush.bf16.msrb.mxu0 %v672_v46 }
  0x2e   :  { %429 = vmatpush.bf16.msrb.mxu0 %v671_v47 }
  0x32   :  { %430 = vmatpush.bf16.msrb.mxu0 %v670_v48 }
  0x36   :  { %431 = vmatpush.bf16.msrb.mxu0 %v669_v49 }
  0x3a   :  { %432 = vmatpush.bf16.msrb.mxu0 %v668_v50 }
  0x3e   :  { %433 = vmatpush.bf16.msrb.mxu0 %v667_v51 }
  0x41   :  { %434 = vmatmul.bf16.vlgmr.msrb.gmra.mxu0 %v469_v54 }
  0x9e   :  { %v379_v55 = vpop.f32.mrf.mxu0 }
  0x9f   :  { %v380_v60 = vadd.f32 %v680_v57, %v379_v55 }
  0xa1   :  { %v393_v56 = vpop.f32.mrf.mxu1 }
  0xa2   :  { %v394_v0 = vadd.f32 %v393_v56, %v380_v60 }
  0xa5   :  { %v407_v58 = vpop.f32.mrf.mxu2 }
  0xa6   :  { %v381_v59 = vpop.f32.mrf.mxu0  ;;  %v421_v61 = vpop.f32.mrf.mxu3  ;;  %v408_v4 = vadd.f32 %v407_v58, %v394_v0 }
  0xa7   :  { %v382_v62 = vadd.f32 %v680_v57, %v381_v59 }
  0xa8   :  { %v422_v7 = vadd.f32 %v421_v61, %v408_v4 }
  0xa9   :  { %v395_v63 = vpop.f32.mrf.mxu1 }
  0xaa   :  { %v396_v1 = vadd.f32 %v395_v63, %v382_v62 }
  0xad   :  { %v409_v2 = vpop.f32.mrf.mxu2 }
  0xae   :  { %v410_v5 = vadd.f32 %v409_v2, %v396_v1  ;;  %v423_v6 = vpop.f32.mrf.mxu3 }
  0xb0   :  { %v424_v8 = vadd.f32 %v423_v6, %v410_v5 }
  0xbe   :  { %v435_v3 = vpop.f32.mrf.mxu0 }
  0xbf   :  { %v436_v9 = vadd.f32 %v435_v3, %v422_v7 }
  0xc1   :  { %v440_v12 = vmax.f32 %v436_v9, 0.0 }
  0xc6   :  { %v437_v10 = vpop.f32.mrf.mxu0 }
  0xc7   :  { %v438_v11 = vadd.f32 %v437_v10, %v424_v8 }
  0xc9   :  { %v441_v13 = vmax.f32 %v438_v11, 0.0 }
  0xcb   :  { %v678_v14 = vpack.c.bf16 %v441_v13, %v440_v12 }
  0xcd   :  { %679 = vst [vmem:[%s860_s3] sm:$0xff] %v678_v14  }

// kernel: resnet50_forward.102
= control target key start
LH: loop header
LB: loop body
LE: loop exit
PB: predicated region body
PF: predicated region fallthrough
CT: control target
= control target key end

     0   :  { %s401_s1 = inlined_call_operand.vmem [shape: bf16[128,256], index: 1, kind: input, shape index: {}]   ;;  %s402_s0 = inlined_call_operand.vmem [shape: bf16[16,128], index: 0, kind: input, shape index: {}]   ;;  %s403_s2 = inlined_call_operand.vmem [shape: f32[1,256], index: 2, kind: input, shape index: {}]   ;;  %s404_s3 = inlined_call_operand.vmem [shape: bf16[16,256], index: 3, kind: input, shape index: {}]   ;;  %s405_s4 = inlined_call_operand.vmem [shape: bf16[16,256], index: 4, kind: output, shape index: {}]  }
   0x1   :  { %v239_v0 = vld [vmem:[%s401_s1 + $0x70] sm:$0xf]  ;;  %v261_v1 = vld [vmem:[%s401_s1 + $0x74] sm:$0xf0]  ;;  %v260_v2 = vld [vmem:[%s401_s1 + $0x74] sm:$0xf] }
   0x2   :  { %v240_v3 = vor.u32 %v261_v1, %v239_v0  ;;  %v241_v4 = vld [vmem:[%s401_s1 + $0x78] sm:$0xf0]  ;;  %v231_v5 = vld [vmem:[%s401_s1 + $0x60] sm:$0xf]  ;;  %v259_v6 = vld [vmem:[%s401_s1 + $0x64] sm:$0xf0] }
   0x3   :  { %v244_v7 = vor.u32 %v260_v2, %v241_v4  ;;  %v258_v8 = vld [vmem:[%s401_s1 + $0x64] sm:$0xf]  ;;  %v233_v9 = vld [vmem:[%s401_s1 + $0x68] sm:$0xf0]  ;;  %v232_v10 = vor.u32 %v259_v6, %v231_v5  ;;  %v223_v12 = vld [vmem:[%s401_s1 + $0x50] sm:$0xf] }
   0x4   :  { %127 = vmatpush.bf16.msra.mxu0 %v240_v3  ;;  %v236_v11 = vor.u32 %v258_v8, %v233_v9  ;;  %v257_v13 = vld [vmem:[%s401_s1 + $0x54] sm:$0xf0]  ;;  %v256_v14 = vld [vmem:[%s401_s1 + $0x54] sm:$0xf]  ;;  %v225_v15 = vld [vmem:[%s401_s1 + $0x58] sm:$0xf0] }
   0x5   :  { %141 = vmatpush.bf16.msra.mxu1 %v244_v7  ;;  %v224_v16 = vor.u32 %v257_v13, %v223_v12  ;;  %v228_v17 = vor.u32 %v256_v14, %v225_v15  ;;  %v215_v18 = vld [vmem:[%s401_s1 + $0x40] sm:$0xf]  ;;  %v255_v19 = vld [vmem:[%s401_s1 + $0x44] sm:$0xf0]  ;;  %v254_v20 = vld [vmem:[%s401_s1 + $0x44] sm:$0xf] }
   0x6   :  { %v217_v21 = vld [vmem:[%s401_s1 + $0x48] sm:$0xf0]  ;;  %v216_v22 = vor.u32 %v255_v19, %v215_v18  ;;  %v207_v24 = vld [vmem:[%s401_s1 + $0x30] sm:$0xf]  ;;  %v253_v25 = vld [vmem:[%s401_s1 + $0x34] sm:$0xf0] }
   0x7   :  { %v220_v23 = vor.u32 %v254_v20, %v217_v21  ;;  %v252_v26 = vld [vmem:[%s401_s1 + $0x34] sm:$0xf]  ;;  %v209_v27 = vld [vmem:[%s401_s1 + $0x38] sm:$0xf0]  ;;  %v208_v28 = vor.u32 %v253_v25, %v207_v24  ;;  %v199_v30 = vld [vmem:[%s401_s1 + $0x20] sm:$0xf] }
   0x8   :  { %128 = vmatpush.bf16.msra.mxu0 %v232_v10  ;;  %v212_v29 = vor.u32 %v252_v26, %v209_v27  ;;  %v251_v31 = vld [vmem:[%s401_s1 + $0x24] sm:$0xf0]  ;;  %v250_v32 = vld [vmem:[%s401_s1 + $0x24] sm:$0xf]  ;;  %v201_v33 = vld [vmem:[%s401_s1 + $0x28] sm:$0xf0] }
   0x9   :  { %142 = vmatpush.bf16.msra.mxu1 %v236_v11  ;;  %v200_v34 = vor.u32 %v251_v31, %v199_v30  ;;  %v204_v35 = vor.u32 %v250_v32, %v201_v33  ;;  %v191_v36 = vld [vmem:[%s401_s1 + $0x10] sm:$0xf]  ;;  %v249_v37 = vld [vmem:[%s401_s1 + $0x14] sm:$0xf0]  ;;  %v248_v38 = vld [vmem:[%s401_s1 + $0x14] sm:$0xf] }
   0xa   :  { %v193_v39 = vld [vmem:[%s401_s1 + $0x18] sm:$0xf0]  ;;  %v192_v40 = vor.u32 %v249_v37, %v191_v36  ;;  %v183_v42 = vld [vmem:[%s401_s1] sm:$0xf]  ;;  %v247_v43 = vld [vmem:[%s401_s1 + $0x4] sm:$0xf0] }
   0xb   :  { %v196_v41 = vor.u32 %v248_v38, %v193_v39  ;;  %v246_v44 = vld [vmem:[%s401_s1 + $0x4] sm:$0xf]  ;;  %v185_v45 = vld [vmem:[%s401_s1 + $0x8] sm:$0xf0]  ;;  %v184_v46 = vor.u32 %v247_v43, %v183_v42  ;;  %v35_v49 = vld [vmem:[%s403_s2] sm:$0x3] }
   0xc   :  { %129 = vmatpush.bf16.msra.mxu0 %v224_v16  ;;  %v188_v47 = vor.u32 %v246_v44, %v185_v45  ;;  %v245_v48 = vld [vmem:[%s402_s0] sm:$0xff]  ;;  %v37_v51 = vperm.slane %v35_v49, 0  ;;  %v38_v52 = vperm.slane %v35_v49, 1  ;;  %v156_v61 = vld [vmem:[%s404_s3 + $0x8] sm:$0xff] }
   0xd   :  { %143 = vmatpush.bf16.msra.mxu1 %v228_v17  ;;  %v155_v50 = vld [vmem:[%s404_s3] sm:$0xff]  ;;  %v159_v0 = vunpack.c.l.bf16 %v156_v61  ;;  %v160_v3 = vunpack.c.h.bf16 %v156_v61 }
   0xe   :  { %v157_v53 = vunpack.c.l.bf16 %v155_v50  ;;  %v158_v55 = vunpack.c.h.bf16 %v155_v50 }
  0x10   :  { %130 = vmatpush.bf16.msra.mxu0 %v216_v22 }
  0x11   :  { %144 = vmatpush.bf16.msra.mxu1 %v220_v23 }
  0x14   :  { %131 = vmatpush.bf16.msra.mxu0 %v208_v28 }
  0x15   :  { %145 = vmatpush.bf16.msra.mxu1 %v212_v29 }
  0x18   :  { %132 = vmatpush.bf16.msra.mxu0 %v200_v34 }
  0x19   :  { %146 = vmatpush.bf16.msra.mxu1 %v204_v35 }
  0x1c   :  { %133 = vmatpush.bf16.msra.mxu0 %v192_v40 }
  0x1d   :  { %147 = vmatpush.bf16.msra.mxu1 %v196_v41 }
  0x20   :  { %134 = vmatpush.bf16.msra.mxu0 %v184_v46 }
  0x21   :  { %148 = vmatpush.bf16.msra.mxu1 %v188_v47 }
  0x23   :  { %135 = vmatmul.bf16.vlgmr.msra.gmra.mxu0 %v245_v48 }
  0x24   :  { %149 = vmatmul.bf16.vlgmr.msra.gmra.mxu1 %v245_v48 }
  0xa0   :  { %v136_v54 = vpop.f32.mrf.mxu0 }
  0xa1   :  { %v137_v56 = vadd.f32 %v136_v54, %v37_v51  ;;  %v150_v57 = vpop.f32.mrf.mxu1 }
  0xa2   :  { %v151_v58 = vadd.f32 %v150_v57, %v38_v52 }
  0xa3   :  { %v161_v59 = vadd.f32 %v157_v53, %v137_v56 }
  0xa4   :  { %v162_v60 = vadd.f32 %v158_v55, %v151_v58 }
  0xa5   :  { %v165_v62 = vmax.f32 %v161_v59, 0.0 }
  0xa6   :  { %v166_v63 = vmax.f32 %v162_v60, 0.0 }
  0xa8   :  { %v169_v1 = vpack.c.bf16 %v166_v63, %v165_v62  ;;  %v138_v2 = vpop.f32.mrf.mxu0 }
  0xa9   :  { %v139_v4 = vadd.f32 %v138_v2, %v37_v51  ;;  %v152_v5 = vpop.f32.mrf.mxu1 }
  0xaa   :  { %171 = vst [vmem:[%s405_s4] sm:$0xff] %v169_v1  ;;  %v153_v6 = vadd.f32 %v152_v5, %v38_v52 }
  0xab   :  { %v163_v7 = vadd.f32 %v159_v0, %v139_v4 }
  0xac   :  { %v164_v8 = vadd.f32 %v160_v3, %v153_v6 }
  0xad   :  { %v167_v9 = vmax.f32 %v163_v7, 0.0 }
  0xae   :  { %v168_v10 = vmax.f32 %v164_v8, 0.0 }
  0xb0   :  { %v170_v11 = vpack.c.bf16 %v168_v10, %v167_v9 }
  0xb2   :  { %172 = vst [vmem:[%s405_s4 + $0x8] sm:$0xff] %v170_v11 }

// kernel: resnet50_forward.103
= control target key start
LH: loop header
LB: loop body
LE: loop exit
PB: predicated region body
PF: predicated region fallthrough
CT: control target
= control target key end

     0   :  { %s378_s1 = inlined_call_operand.vmem [shape: bf16[256,128], index: 1, kind: input, shape index: {}]   ;;  %s379_s2 = inlined_call_operand.vmem [shape: f32[1,128], index: 2, kind: input, shape index: {}]   ;;  %s380_s0 = inlined_call_operand.vmem [shape: bf16[16,256], index: 0, kind: input, shape index: {}]   ;;  %s381_s3 = inlined_call_operand.vmem [shape: bf16[16,128], index: 3, kind: output, shape index: {}]  }
   0x1   :  { %v277_v0 = vld [vmem:[%s378_s1 + $0x38] sm:$0xff]  ;;  %v276_v2 = vld [vmem:[%s378_s1 + $0x30] sm:$0xff]  ;;  %v275_v4 = vld [vmem:[%s378_s1 + $0x28] sm:$0xff] }
   0x2   :  { %v285_v1 = vld [vmem:[%s378_s1 + $0x78] sm:$0xff]  ;;  %158 = vmatpush.bf16.msra.mxu0 %v277_v0  ;;  %v284_v3 = vld [vmem:[%s378_s1 + $0x70] sm:$0xff]  ;;  %v283_v5 = vld [vmem:[%s378_s1 + $0x68] sm:$0xff] }
   0x3   :  { %172 = vmatpush.bf16.msra.mxu1 %v285_v1  ;;  %v274_v6 = vld [vmem:[%s378_s1 + $0x20] sm:$0xff]  ;;  %v273_v8 = vld [vmem:[%s378_s1 + $0x18] sm:$0xff]  ;;  %v272_v10 = vld [vmem:[%s378_s1 + $0x10] sm:$0xff] }
   0x4   :  { %v282_v7 = vld [vmem:[%s378_s1 + $0x60] sm:$0xff]  ;;  %v281_v9 = vld [vmem:[%s378_s1 + $0x58] sm:$0xff]  ;;  %v280_v11 = vld [vmem:[%s378_s1 + $0x50] sm:$0xff] }
   0x5   :  { %v271_v12 = vld [vmem:[%s378_s1 + $0x8] sm:$0xff]  ;;  %v270_v14 = vld [vmem:[%s378_s1] sm:$0xff] }
   0x6   :  { %159 = vmatpush.bf16.msra.mxu0 %v276_v2  ;;  %v279_v13 = vld [vmem:[%s378_s1 + $0x48] sm:$0xff]  ;;  %v278_v15 = vld [vmem:[%s378_s1 + $0x40] sm:$0xff] }
   0x7   :  { %173 = vmatpush.bf16.msra.mxu1 %v284_v3  ;;  %v198_v16 = vld [vmem:[%s380_s0] sm:$0xf]  ;;  %v269_v17 = vld [vmem:[%s380_s0 + $0x4] sm:$0xf0]  ;;  %v268_v18 = vld [vmem:[%s380_s0 + $0x4] sm:$0xf] }
   0x8   :  { %v200_v19 = vld [vmem:[%s380_s0 + $0x8] sm:$0xf0]  ;;  %v199_v20 = vor.u32 %v269_v17, %v198_v16  ;;  %v291_v24 = vld [vmem:[%s379_s2] ss:$0 sm:$0xff] }
   0x9   :  { %v203_v21 = vor.u32 %v268_v18, %v200_v19 }
   0xa   :  { %160 = vmatpush.bf16.msra.mxu0 %v275_v4 }
   0xb   :  { %174 = vmatpush.bf16.msra.mxu1 %v283_v5 }
   0xe   :  { %161 = vmatpush.bf16.msra.mxu0 %v274_v6 }
   0xf   :  { %175 = vmatpush.bf16.msra.mxu1 %v282_v7 }
  0x12   :  { %162 = vmatpush.bf16.msra.mxu0 %v273_v8 }
  0x13   :  { %176 = vmatpush.bf16.msra.mxu1 %v281_v9 }
  0x16   :  { %163 = vmatpush.bf16.msra.mxu0 %v272_v10 }
  0x17   :  { %177 = vmatpush.bf16.msra.mxu1 %v280_v11 }
  0x1a   :  { %164 = vmatpush.bf16.msra.mxu0 %v271_v12 }
  0x1b   :  { %178 = vmatpush.bf16.msra.mxu1 %v279_v13 }
  0x1e   :  { %165 = vmatpush.bf16.msra.mxu0 %v270_v14 }
  0x1f   :  { %179 = vmatpush.bf16.msra.mxu1 %v278_v15 }
  0x21   :  { %166 = vmatmul.bf16.vlgmr.msra.gmra.mxu0 %v199_v20 }
  0x22   :  { %180 = vmatmul.bf16.vlgmr.msra.gmra.mxu1 %v203_v21 }
  0x9e   :  { %v167_v22 = vpop.f32.mrf.mxu0 }
  0x9f   :  { %v181_v23 = vpop.f32.mrf.mxu1  ;;  %v168_v25 = vadd.f32 %v291_v24, %v167_v22 }
  0xa1   :  { %v182_v27 = vadd.f32 %v181_v23, %v168_v25 }
  0xa3   :  { %v186_v31 = vmax.f32 %v182_v27, 0.0 }
  0xa6   :  { %v169_v26 = vpop.f32.mrf.mxu0 }
  0xa7   :  { %v170_v28 = vadd.f32 %v291_v24, %v169_v26  ;;  %v183_v29 = vpop.f32.mrf.mxu1 }
  0xa9   :  { %v184_v30 = vadd.f32 %v183_v29, %v170_v28 }
  0xab   :  { %v187_v32 = vmax.f32 %v184_v30, 0.0 }
  0xad   :  { %v289_v33 = vpack.c.bf16 %v187_v32, %v186_v31 }
  0xaf   :  { %290 = vst [vmem:[%s381_s3] sm:$0xff] %v289_v33  }

// kernel: resnet50_forward.108
= control target key start
LH: loop header
LB: loop body
LE: loop exit
PB: predicated region body
PF: predicated region fallthrough
CT: control target
= control target key end

     0   :  { %9 = vsyncpa [#allocation3], 0  ;;  %s308_s18 = smov [#allocation2]   ;;  %s309_s20 = smov 128   ;;  %s357_s0 = inlined_call_operand.vmem [shape: bf16[16,128], index: 0, kind: input, shape index: {}]   ;;  %s358_s1 = inlined_call_operand.hbm [shape: bf16[128,256], index: 1, kind: input, shape index: {}]   ;;  %s359_s2 = inlined_call_operand.vmem [shape: f32[1,256], index: 2, kind: input, shape index: {}]   ;;  %s360_s3 = inlined_call_operand.vmem [shape: bf16[16,256], index: 3, kind: input, shape index: {}]   ;;  %s361_s4 = inlined_call_operand.vmem [shape: bf16[16,256], index: 4, kind: output, shape index: {}]  }
   0x1   :  { %s16_s17 = sshll.u32 %s358_s1, 4  ;;  %s18_s19 = sshll.u32 %s308_s18, 4  ;;  %s17_s17 = int_to_ptr.hbm [resolvable:$true] %s16_s17  ;;  %s19_s19 = int_to_ptr.vmem [resolvable:$true] %s18_s19 }
   0x2   :  { %s310_s21 = smov 8  }
   0x3   :  { %24 = dma.hbm_to_vmem [thread:$0]  %s17_s17, 2048, %s19_s19, [#allocation3], %s309_s20, %s309_s20, %s310_s21  }
   0x4   :  { %306 = dma.done.wait [#allocation3], 2048  }
   0x5   :  { %307 = vsyncadd [#allocation3], 4294965248  ;;  %v256_v0 = vld [vmem:[#allocation2 + $0x70] sm:$0xf]  ;;  %v278_v1 = vld [vmem:[#allocation2 + $0x74] sm:$0xf0] }
   0x6   :  { %v277_v2 = vld [vmem:[#allocation2 + $0x74] sm:$0xf]  ;;  %v257_v3 = vor.u32 %v278_v1, %v256_v0  ;;  %v258_v4 = vld [vmem:[#allocation2 + $0x78] sm:$0xf0]  ;;  %v248_v5 = vld [vmem:[#allocation2 + $0x60] sm:$0xf] }
   0x7   :  { %v276_v6 = vld [vmem:[#allocation2 + $0x64] sm:$0xf0]  ;;  %v261_v7 = vor.u32 %v277_v2, %v258_v4  ;;  %v275_v8 = vld [vmem:[#allocation2 + $0x64] sm:$0xf]  ;;  %v250_v9 = vld [vmem:[#allocation2 + $0x68] sm:$0xf0] }
   0x8   :  { %143 = vmatpush.bf16.msra.mxu0 %v257_v3  ;;  %v249_v10 = vor.u32 %v276_v6, %v248_v5  ;;  %v253_v11 = vor.u32 %v275_v8, %v250_v9  ;;  %v240_v12 = vld [vmem:[#allocation2 + $0x50] sm:$0xf]  ;;  %v274_v13 = vld [vmem:[#allocation2 + $0x54] sm:$0xf0]  ;;  %v273_v14 = vld [vmem:[#allocation2 + $0x54] sm:$0xf] }
   0x9   :  { %157 = vmatpush.bf16.msra.mxu1 %v261_v7  ;;  %v242_v15 = vld [vmem:[#allocation2 + $0x58] sm:$0xf0]  ;;  %v241_v16 = vor.u32 %v274_v13, %v240_v12  ;;  %v232_v18 = vld [vmem:[#allocation2 + $0x40] sm:$0xf]  ;;  %v272_v19 = vld [vmem:[#allocation2 + $0x44] sm:$0xf0] }
   0xa   :  { %v245_v17 = vor.u32 %v273_v14, %v242_v15  ;;  %v271_v20 = vld [vmem:[#allocation2 + $0x44] sm:$0xf]  ;;  %v234_v21 = vld [vmem:[#allocation2 + $0x48] sm:$0xf0]  ;;  %v233_v22 = vor.u32 %v272_v19, %v232_v18  ;;  %v224_v24 = vld [vmem:[#allocation2 + $0x30] sm:$0xf] }
   0xb   :  { %v237_v23 = vor.u32 %v271_v20, %v234_v21  ;;  %v270_v25 = vld [vmem:[#allocation2 + $0x34] sm:$0xf0]  ;;  %v269_v26 = vld [vmem:[#allocation2 + $0x34] sm:$0xf]  ;;  %v226_v27 = vld [vmem:[#allocation2 + $0x38] sm:$0xf0] }
   0xc   :  { %144 = vmatpush.bf16.msra.mxu0 %v249_v10  ;;  %v225_v28 = vor.u32 %v270_v25, %v224_v24  ;;  %v229_v29 = vor.u32 %v269_v26, %v226_v27  ;;  %v216_v30 = vld [vmem:[#allocation2 + $0x20] sm:$0xf]  ;;  %v268_v31 = vld [vmem:[#allocation2 + $0x24] sm:$0xf0]  ;;  %v267_v32 = vld [vmem:[#allocation2 + $0x24] sm:$0xf] }
   0xd   :  { %158 = vmatpush.bf16.msra.mxu1 %v253_v11  ;;  %v218_v33 = vld [vmem:[#allocation2 + $0x28] sm:$0xf0]  ;;  %v217_v34 = vor.u32 %v268_v31, %v216_v30  ;;  %v208_v36 = vld [vmem:[#allocation2 + $0x10] sm:$0xf]  ;;  %v266_v37 = vld [vmem:[#allocation2 + $0x14] sm:$0xf0] }
   0xe   :  { %v221_v35 = vor.u32 %v267_v32, %v218_v33  ;;  %v265_v38 = vld [vmem:[#allocation2 + $0x14] sm:$0xf]  ;;  %v210_v39 = vld [vmem:[#allocation2 + $0x18] sm:$0xf0]  ;;  %v209_v40 = vor.u32 %v266_v37, %v208_v36  ;;  %v200_v42 = vld [vmem:[#allocation2] sm:$0xf] }
   0xf   :  { %v213_v41 = vor.u32 %v265_v38, %v210_v39  ;;  %v264_v43 = vld [vmem:[#allocation2 + $0x4] sm:$0xf0]  ;;  %v263_v44 = vld [vmem:[#allocation2 + $0x4] sm:$0xf]  ;;  %v202_v45 = vld [vmem:[#allocation2 + $0x8] sm:$0xf0] }
  0x10   :  { %145 = vmatpush.bf16.msra.mxu0 %v241_v16  ;;  %v201_v46 = vor.u32 %v264_v43, %v200_v42  ;;  %v205_v47 = vor.u32 %v263_v44, %v202_v45  ;;  %v262_v48 = vld [vmem:[%s357_s0] sm:$0xff]  ;;  %v172_v61 = vld [vmem:[%s360_s3 + $0x8] sm:$0xff] }
  0x11   :  { %159 = vmatpush.bf16.msra.mxu1 %v245_v17  ;;  %v51_v49 = vld [vmem:[%s359_s2] sm:$0x3]  ;;  %v175_v0 = vunpack.c.l.bf16 %v172_v61  ;;  %v176_v3 = vunpack.c.h.bf16 %v172_v61 }
  0x12   :  { %v171_v50 = vld [vmem:[%s360_s3] sm:$0xff]  ;;  %v53_v51 = vperm.slane %v51_v49, 0  ;;  %v54_v52 = vperm.slane %v51_v49, 1 }
  0x13   :  { %v173_v53 = vunpack.c.l.bf16 %v171_v50  ;;  %v174_v55 = vunpack.c.h.bf16 %v171_v50 }
  0x14   :  { %146 = vmatpush.bf16.msra.mxu0 %v233_v22 }
  0x15   :  { %160 = vmatpush.bf16.msra.mxu1 %v237_v23 }
  0x18   :  { %147 = vmatpush.bf16.msra.mxu0 %v225_v28 }
  0x19   :  { %161 = vmatpush.bf16.msra.mxu1 %v229_v29 }
  0x1c   :  { %148 = vmatpush.bf16.msra.mxu0 %v217_v34 }
  0x1d   :  { %162 = vmatpush.bf16.msra.mxu1 %v221_v35 }
  0x20   :  { %149 = vmatpush.bf16.msra.mxu0 %v209_v40 }
  0x21   :  { %163 = vmatpush.bf16.msra.mxu1 %v213_v41 }
  0x24   :  { %150 = vmatpush.bf16.msra.mxu0 %v201_v46 }
  0x25   :  { %164 = vmatpush.bf16.msra.mxu1 %v205_v47 }
  0x27   :  { %151 = vmatmul.bf16.vlgmr.msra.gmra.mxu0 %v262_v48 }
  0x28   :  { %165 = vmatmul.bf16.vlgmr.msra.gmra.mxu1 %v262_v48 }
  0xa4   :  { %v152_v54 = vpop.f32.mrf.mxu0 }
  0xa5   :  { %v153_v56 = vadd.f32 %v152_v54, %v53_v51  ;;  %v166_v57 = vpop.f32.mrf.mxu1 }
  0xa6   :  { %v167_v58 = vadd.f32 %v166_v57, %v54_v52 }
  0xa7   :  { %v177_v59 = vadd.f32 %v173_v53, %v153_v56 }
  0xa8   :  { %v178_v60 = vadd.f32 %v174_v55, %v167_v58 }
  0xa9   :  { %v181_v62 = vmax.f32 %v177_v59, 0.0 }
  0xaa   :  { %v182_v63 = vmax.f32 %v178_v60, 0.0 }
  0xac   :  { %v185_v1 = vpack.c.bf16 %v182_v63, %v181_v62  ;;  %v154_v2 = vpop.f32.mrf.mxu0 }
  0xad   :  { %v155_v4 = vadd.f32 %v154_v2, %v53_v51  ;;  %v168_v5 = vpop.f32.mrf.mxu1 }
  0xae   :  { %187 = vst [vmem:[%s361_s4] sm:$0xff] %v185_v1  ;;  %v169_v6 = vadd.f32 %v168_v5, %v54_v52 }
  0xaf   :  { %v179_v7 = vadd.f32 %v175_v0, %v155_v4 }
  0xb0   :  { %v180_v8 = vadd.f32 %v176_v3, %v169_v6 }
  0xb1   :  { %v183_v9 = vmax.f32 %v179_v7, 0.0 }
  0xb2   :  { %v184_v10 = vmax.f32 %v180_v8, 0.0 }
  0xb4   :  { %v186_v11 = vpack.c.bf16 %v184_v10, %v183_v9 }
  0xb6   :  { %188 = vst [vmem:[%s361_s4 + $0x8] sm:$0xff] %v186_v11 }
  0xb7   :  { %193 = vsyncpa [#allocation3], 1 }

// kernel: resnet50_forward.106
= control target key start
LH: loop header
LB: loop body
LE: loop exit
PB: predicated region body
PF: predicated region fallthrough
CT: control target
= control target key end

     0   :  { %8 = vsyncpa [#allocation3], 0  ;;  %s338_s15 = smov [#allocation2]   ;;  %s339_s17 = smov 64   ;;  %s382_s0 = inlined_call_operand.vmem [shape: bf16[16,256], index: 0, kind: input, shape index: {}]   ;;  %s383_s1 = inlined_call_operand.hbm [shape: bf16[256,128], index: 1, kind: input, shape index: {}]   ;;  %s384_s2 = inlined_call_operand.vmem [shape: f32[1,128], index: 2, kind: input, shape index: {}]   ;;  %s385_s3 = inlined_call_operand.vmem [shape: bf16[16,128], index: 3, kind: output, shape index: {}]  }
   0x1   :  { %s15_s14 = sshll.u32 %s383_s1, 4  ;;  %s17_s16 = sshll.u32 %s338_s15, 4  ;;  %s16_s14 = int_to_ptr.hbm [resolvable:$true] %s15_s14  ;;  %s18_s16 = int_to_ptr.vmem [resolvable:$true] %s17_s16 }
   0x2   :  { %s340_s18 = smov 4  }
   0x3   :  { %23 = dma.hbm_to_vmem [thread:$0]  %s16_s14, 2048, %s18_s16, [#allocation3], %s339_s17, %s339_s17, %s340_s18  }
   0x4   :  { %336 = dma.done.wait [#allocation3], 2048  }
   0x5   :  { %337 = vsyncadd [#allocation3], 4294965248  ;;  %v294_v0 = vld [vmem:[#allocation2 + $0x38] sm:$0xff]  ;;  %v293_v2 = vld [vmem:[#allocation2 + $0x30] sm:$0xff] }
   0x6   :  { %v302_v1 = vld [vmem:[#allocation2 + $0x78] sm:$0xff]  ;;  %174 = vmatpush.bf16.msra.mxu0 %v294_v0  ;;  %v301_v3 = vld [vmem:[#allocation2 + $0x70] sm:$0xff]  ;;  %v292_v4 = vld [vmem:[#allocation2 + $0x28] sm:$0xff] }
   0x7   :  { %188 = vmatpush.bf16.msra.mxu1 %v302_v1  ;;  %v300_v5 = vld [vmem:[#allocation2 + $0x68] sm:$0xff]  ;;  %v291_v6 = vld [vmem:[#allocation2 + $0x20] sm:$0xff]  ;;  %v290_v8 = vld [vmem:[#allocation2 + $0x18] sm:$0xff] }
   0x8   :  { %v299_v7 = vld [vmem:[#allocation2 + $0x60] sm:$0xff]  ;;  %v298_v9 = vld [vmem:[#allocation2 + $0x58] sm:$0xff]  ;;  %v289_v10 = vld [vmem:[#allocation2 + $0x10] sm:$0xff] }
   0x9   :  { %v297_v11 = vld [vmem:[#allocation2 + $0x50] sm:$0xff]  ;;  %v288_v12 = vld [vmem:[#allocation2 + $0x8] sm:$0xff]  ;;  %v287_v14 = vld [vmem:[#allocation2] sm:$0xff] }
   0xa   :  { %175 = vmatpush.bf16.msra.mxu0 %v293_v2  ;;  %v296_v13 = vld [vmem:[#allocation2 + $0x48] sm:$0xff]  ;;  %v295_v15 = vld [vmem:[#allocation2 + $0x40] sm:$0xff] }
   0xb   :  { %189 = vmatpush.bf16.msra.mxu1 %v301_v3  ;;  %v215_v16 = vld [vmem:[%s382_s0] sm:$0xf]  ;;  %v286_v17 = vld [vmem:[%s382_s0 + $0x4] sm:$0xf0]  ;;  %v285_v18 = vld [vmem:[%s382_s0 + $0x4] sm:$0xf] }
   0xc   :  { %v217_v19 = vld [vmem:[%s382_s0 + $0x8] sm:$0xf0]  ;;  %v216_v20 = vor.u32 %v286_v17, %v215_v16  ;;  %v311_v24 = vld [vmem:[%s384_s2] ss:$0 sm:$0xff] }
   0xd   :  { %v220_v21 = vor.u32 %v285_v18, %v217_v19 }
   0xe   :  { %176 = vmatpush.bf16.msra.mxu0 %v292_v4 }
   0xf   :  { %190 = vmatpush.bf16.msra.mxu1 %v300_v5 }
  0x12   :  { %177 = vmatpush.bf16.msra.mxu0 %v291_v6 }
  0x13   :  { %191 = vmatpush.bf16.msra.mxu1 %v299_v7 }
  0x16   :  { %178 = vmatpush.bf16.msra.mxu0 %v290_v8 }
  0x17   :  { %192 = vmatpush.bf16.msra.mxu1 %v298_v9 }
  0x1a   :  { %179 = vmatpush.bf16.msra.mxu0 %v289_v10 }
  0x1b   :  { %193 = vmatpush.bf16.msra.mxu1 %v297_v11 }
  0x1e   :  { %180 = vmatpush.bf16.msra.mxu0 %v288_v12 }
  0x1f   :  { %194 = vmatpush.bf16.msra.mxu1 %v296_v13 }
  0x22   :  { %181 = vmatpush.bf16.msra.mxu0 %v287_v14 }
  0x23   :  { %195 = vmatpush.bf16.msra.mxu1 %v295_v15 }
  0x25   :  { %182 = vmatmul.bf16.vlgmr.msra.gmra.mxu0 %v216_v20 }
  0x26   :  { %196 = vmatmul.bf16.vlgmr.msra.gmra.mxu1 %v220_v21 }
  0xa2   :  { %v183_v22 = vpop.f32.mrf.mxu0 }
  0xa3   :  { %v197_v23 = vpop.f32.mrf.mxu1  ;;  %v184_v25 = vadd.f32 %v311_v24, %v183_v22 }
  0xa5   :  { %v198_v27 = vadd.f32 %v197_v23, %v184_v25 }
  0xa7   :  { %v202_v31 = vmax.f32 %v198_v27, 0.0 }
  0xaa   :  { %v185_v26 = vpop.f32.mrf.mxu0 }
  0xab   :  { %v186_v28 = vadd.f32 %v311_v24, %v185_v26  ;;  %v199_v29 = vpop.f32.mrf.mxu1 }
  0xad   :  { %v200_v30 = vadd.f32 %v199_v29, %v186_v28 }
  0xaf   :  { %v203_v32 = vmax.f32 %v200_v30, 0.0 }
  0xb1   :  { %v306_v33 = vpack.c.bf16 %v203_v32, %v202_v31 }
  0xb3   :  { %307 = vst [vmem:[%s385_s3] sm:$0xff] %v306_v33  }
  0xb4   :  { %212 = vsyncpa [#allocation3], 1 }

// kernel: resnet50_forward.109
= control target key start
LH: loop header
LB: loop body
LE: loop exit
PB: predicated region body
PF: predicated region fallthrough
CT: control target
= control target key end

     0   :  { %8 = vsyncpa [#allocation3], 0  ;;  %s455_s15 = smov [#allocation2]   ;;  %s456_s17 = smov 64   ;;  %s540_s0 = inlined_call_operand.vmem [shape: bf16[8,1,256], index: 0, kind: input, shape index: {}]   ;;  %s541_s1 = inlined_call_operand.hbm [shape: bf16[256,128], index: 1, kind: input, shape index: {}]   ;;  %s542_s2 = inlined_call_operand.vmem [shape: f32[1,128], index: 2, kind: input, shape index: {}]   ;;  %s543_s3 = inlined_call_operand.vmem [shape: f32[8,128], index: 3, kind: output, shape index: {}]  }
   0x1   :  { %s15_s14 = sshll.u32 %s541_s1, 4  ;;  %s17_s16 = sshll.u32 %s455_s15, 4  ;;  %s16_s14 = int_to_ptr.hbm [resolvable:$true] %s15_s14  ;;  %s18_s16 = int_to_ptr.vmem [resolvable:$true] %s17_s16 }
   0x2   :  { %s457_s18 = smov 4  }
   0x3   :  { %23 = dma.hbm_to_vmem [thread:$0]  %s16_s14, 2048, %s18_s16, [#allocation3], %s456_s17, %s456_s17, %s457_s18  }
   0x4   :  { %453 = dma.done.wait [#allocation3], 2048  }
   0x5   :  { %454 = vsyncadd [#allocation3], 4294965248  ;;  %v416_v0 = vld [vmem:[#allocation2 + $0x38] sm:$0xff]  ;;  %v415_v2 = vld [vmem:[#allocation2 + $0x30] sm:$0xff]  ;;  %vm179_vm0 = vcmask 1041409   ;;  %vm182_vm1 = vcmask 1042434  }
   0x6   :  { %v424_v1 = vld [vmem:[#allocation2 + $0x78] sm:$0xff]  ;;  %313 = vmatpush.bf16.msra.mxu0 %v416_v0  ;;  %v423_v3 = vld [vmem:[#allocation2 + $0x70] sm:$0xff]  ;;  %v414_v4 = vld [vmem:[#allocation2 + $0x28] sm:$0xff]  ;;  %vm185_vm2 = vcmask 1043459   ;;  %vm188_vm3 = vcmask 1044484   ;;  %vm191_vm4 = vcmask 1045509  }
   0x7   :  { %326 = vmatpush.bf16.msra.mxu1 %v424_v1  ;;  %v422_v5 = vld [vmem:[#allocation2 + $0x68] sm:$0xff]  ;;  %v30_v6 = vld [vmem:[%s540_s0] sm:$0x3]  ;;  %v487_v7 = vld [vmem:[%s540_s0 + $0x2] sm:$0x3]  ;;  %vm194_vm5 = vcmask 1046534  }
   0x8   :  { %v492_v8 = vld [vmem:[%s540_s0 + $0x4] sm:$0x3]  ;;  %v33_v9 = vld [vmem:[%s540_s0 + $0x6] sm:$0x3]  ;;  %v34_v10 = vld [vmem:[%s540_s0 + $0x8] sm:$0x3]  ;;  %v38_v11 = vunpack.c.l.bf16 %v30_v6  ;;  %v39_v12 = vunpack.c.l.bf16 %v487_v7 }
   0x9   :  { %v504_v13 = vld [vmem:[%s540_s0 + $0xa] sm:$0x3]  ;;  %v509_v14 = vld [vmem:[%s540_s0 + $0xc] sm:$0x3]  ;;  %v514_v15 = vld [vmem:[%s540_s0 + $0xe] sm:$0x3]  ;;  %v40_v16 = vunpack.c.l.bf16 %v492_v8  ;;  %v41_v17 = vunpack.c.l.bf16 %v33_v9  ;;  %v42_v18 = vunpack.c.l.bf16 %v34_v10 }
   0xa   :  { %314 = vmatpush.bf16.msra.mxu0 %v415_v2  ;;  %v43_v19 = vunpack.c.l.bf16 %v504_v13  ;;  %v44_v20 = vunpack.c.l.bf16 %v509_v14  ;;  %v45_v21 = vunpack.c.l.bf16 %v514_v15  ;;  %v62_v22 = vperm.slane %v38_v11, 0  ;;  %v413_v27 = vld [vmem:[#allocation2 + $0x20] sm:$0xff]  ;;  %v412_v45 = vld [vmem:[#allocation2 + $0x18] sm:$0xff]  ;;  %v411_v62 = vld [vmem:[#allocation2 + $0x10] sm:$0xff] }
   0xb   :  { %327 = vmatpush.bf16.msra.mxu1 %v423_v3  ;;  %v64_v23 = vperm.slane %v39_v12, 0  ;;  %v66_v24 = vperm.slane %v40_v16, 0  ;;  %v68_v25 = vperm.slane %v41_v17, 0  ;;  %v70_v26 = vperm.slane %v42_v18, 0  ;;  %v421_v28 = vld [vmem:[#allocation2 + $0x60] sm:$0xff]  ;;  %v420_v46 = vld [vmem:[#allocation2 + $0x58] sm:$0xff] }
   0xc   :  { %v72_v29 = vperm.slane %v43_v19, 0  ;;  %v74_v30 = vperm.slane %v44_v20, 0  ;;  %v76_v31 = vperm.slane %v45_v21, 0  ;;  %v94_v32 = vpack.c.bf16 %v62_v22, %v62_v22  ;;  %v419_v63 = vld [vmem:[#allocation2 + $0x50] sm:$0xff] }
   0xd   :  { %v96_v33 = vpack.c.bf16 %v64_v23, %v64_v23  ;;  %v98_v34 = vpack.c.bf16 %v66_v24, %v66_v24  ;;  %v100_v35 = vpack.c.bf16 %v68_v25, %v68_v25  ;;  %v102_v36 = vpack.c.bf16 %v70_v26, %v70_v26 }
   0xe   :  { %315 = vmatpush.bf16.msra.mxu0 %v414_v4  ;;  %v104_v37 = vpack.c.bf16 %v72_v29, %v72_v29  ;;  %v106_v38 = vpack.c.bf16 %v74_v30, %v74_v30  ;;  %v108_v39 = vpack.c.bf16 %v76_v31, %v76_v31  ;;  %v162_v40 = vunpack.c.l.b16 %v94_v32  ;;  %v409_v31 = vld [vmem:[#allocation2] sm:$0xff] }
   0xf   :  { %328 = vmatpush.bf16.msra.mxu1 %v422_v5  ;;  %v164_v41 = vunpack.c.l.b16 %v96_v33  ;;  %v166_v42 = vunpack.c.l.b16 %v98_v34  ;;  %v168_v43 = vunpack.c.l.b16 %v100_v35  ;;  %v170_v44 = vunpack.c.l.b16 %v102_v36  ;;  %v417_v32 = vld [vmem:[#allocation2 + $0x40] sm:$0xff] }
  0x10   :  { %v172_v47 = vunpack.c.l.b16 %v104_v37  ;;  %v174_v48 = vunpack.c.l.b16 %v106_v38  ;;  %v176_v49 = vunpack.c.l.b16 %v108_v39  ;;  %vm197_vm6 = vcmask 1047559  }
  0x11   :  { %v178_v50 = vrot.slane %v164_v41, 7  ;;  %v181_v51 = vrot.slane %v166_v42, 6  ;;  %v184_v52 = vrot.slane %v168_v43, 5  ;;  %v63_v53 = vperm.slane %v38_v11, 2 }
  0x12   :  { %316 = vmatpush.bf16.msra.mxu0 %v413_v27  ;;  %v187_v54 = vrot.slane %v170_v44, 4  ;;  %v190_v55 = vrot.slane %v172_v47, 3  ;;  %v193_v56 = vrot.slane %v174_v48, 2  ;;  %v65_v57 = vperm.slane %v39_v12, 2 }
  0x13   :  { %329 = vmatpush.bf16.msra.mxu1 %v421_v28  ;;  %v180_v58 = vsel %vm179_vm0, %v178_v50, %v162_v40  ;;  %v67_v59 = vperm.slane %v40_v16, 2  ;;  %v69_v60 = vperm.slane %v41_v17, 2  ;;  %v71_v61 = vperm.slane %v42_v18, 2  ;;  %v410_v16 = vld [vmem:[#allocation2 + $0x8] sm:$0xff] }
  0x14   :  { %v183_v0 = vsel %vm182_vm1, %v181_v51, %v180_v58  ;;  %v73_v1 = vperm.slane %v43_v19, 2  ;;  %v75_v2 = vperm.slane %v44_v20, 2  ;;  %v77_v3 = vperm.slane %v45_v21, 2  ;;  %v418_v17 = vld [vmem:[#allocation2 + $0x48] sm:$0xff] }
  0x15   :  { %v186_v4 = vsel %vm185_vm2, %v184_v52, %v183_v0  ;;  %v95_v5 = vpack.c.bf16 %v63_v53, %v63_v53  ;;  %v97_v6 = vpack.c.bf16 %v65_v57, %v65_v57  ;;  %v99_v7 = vpack.c.bf16 %v67_v59, %v67_v59 }
  0x16   :  { %317 = vmatpush.bf16.msra.mxu0 %v412_v45  ;;  %v189_v8 = vsel %vm188_vm3, %v187_v54, %v186_v4  ;;  %v101_v9 = vpack.c.bf16 %v69_v60, %v69_v60  ;;  %v103_v10 = vpack.c.bf16 %v71_v61, %v71_v61  ;;  %v105_v11 = vpack.c.bf16 %v73_v1, %v73_v1 }
  0x17   :  { %330 = vmatpush.bf16.msra.mxu1 %v420_v46  ;;  %v192_v12 = vsel %vm191_vm4, %v190_v55, %v189_v8  ;;  %v196_v13 = vrot.slane %v176_v49, 1  ;;  %v107_v14 = vpack.c.bf16 %v75_v2, %v75_v2  ;;  %v109_v15 = vpack.c.bf16 %v77_v3, %v77_v3  ;;  %v428_v46 = vld [vmem:[%s542_s2] ss:$0 sm:$0xff] }
  0x18   :  { %v163_v18 = vunpack.c.l.b16 %v95_v5  ;;  %v165_v19 = vunpack.c.l.b16 %v97_v6  ;;  %v167_v20 = vunpack.c.l.b16 %v99_v7  ;;  %v169_v21 = vunpack.c.l.b16 %v101_v9 }
  0x19   :  { %v195_v22 = vsel %vm194_vm5, %v193_v56, %v192_v12  ;;  %v171_v23 = vunpack.c.l.b16 %v103_v10  ;;  %v173_v24 = vunpack.c.l.b16 %v105_v11  ;;  %v175_v25 = vunpack.c.l.b16 %v107_v14 }
  0x1a   :  { %318 = vmatpush.bf16.msra.mxu0 %v411_v62  ;;  %v177_v26 = vunpack.c.l.b16 %v109_v15  ;;  %v199_v27 = vrot.slane %v165_v19, 7  ;;  %v201_v28 = vrot.slane %v167_v20, 6  ;;  %v203_v29 = vrot.slane %v169_v21, 5 }
  0x1b   :  { %331 = vmatpush.bf16.msra.mxu1 %v419_v63  ;;  %v205_v30 = vrot.slane %v171_v23, 4  ;;  %v198_v33 = vsel %vm197_vm6, %v196_v13, %v195_v22  ;;  %v207_v35 = vrot.slane %v173_v24, 3  ;;  %v209_v37 = vrot.slane %v175_v25, 2 }
  0x1c   :  { %v200_v34 = vsel %vm179_vm0, %v199_v27, %v163_v18  ;;  %v211_v39 = vrot.slane %v177_v26, 1  ;;  %v213_v40 = vpack.c.b16 %v198_v33, %v198_v33 }
  0x1d   :  { %v202_v36 = vsel %vm182_vm1, %v201_v28, %v200_v34 }
  0x1e   :  { %319 = vmatpush.bf16.msra.mxu0 %v410_v16  ;;  %v204_v38 = vsel %vm185_vm2, %v203_v29, %v202_v36 }
  0x1f   :  { %332 = vmatpush.bf16.msra.mxu1 %v418_v17  ;;  %v206_v41 = vsel %vm188_vm3, %v205_v30, %v204_v38 }
  0x20   :  { %v208_v42 = vsel %vm191_vm4, %v207_v35, %v206_v41 }
  0x21   :  { %v210_v43 = vsel %vm194_vm5, %v209_v37, %v208_v42 }
  0x22   :  { %320 = vmatpush.bf16.msra.mxu0 %v409_v31  ;;  %v212_v44 = vsel %vm197_vm6, %v211_v39, %v210_v43 }
  0x23   :  { %333 = vmatpush.bf16.msra.mxu1 %v417_v32  ;;  %v214_v45 = vpack.c.b16 %v212_v44, %v212_v44 }
  0x25   :  { %321 = vmatmul.bf16.vlgmr.msra.gmra.mxu0 %v213_v40 }
  0x26   :  { %334 = vmatmul.bf16.vlgmr.msra.gmra.mxu1 %v214_v45 }
  0xa2   :  { %v322_v47 = vpop.f32.mrf.mxu0 }
  0xa3   :  { %v323_v48 = vadd.f32 %v428_v46, %v322_v47  ;;  %v335_v49 = vpop.f32.mrf.mxu1 }
  0xa5   :  { %v336_v50 = vadd.f32 %v335_v49, %v323_v48 }
  0xa7   :  { %339 = vst [vmem:[%s543_s3] sm:$0xff] %v336_v50 }
  0xaa   :  { %v324_v51 = vpop.f32.mrf.mxu0 }
  0xab   :  { %v337_v52 = vpop.f32.mrf.mxu1 }
  0xac   :  { %344 = vsyncpa [#allocation3], 1 }

</bundles_post_ra>
